<compile_context>
chip_gen: v6e
topology: v6e:2x2x1
jax: 0.10.0
libtpu: 0.0.40
codegen_flags: <defaults>
</compile_context>

<pallas_src>
import functools
import math

import numpy as np
import jax
import jax.numpy as jnp
from jax.experimental import pallas as pl
from jax.experimental.pallas import tpu as pltpu

EPS = 1e-5
LEAKY_SLOPE = 0.01            # torch.nn.LeakyReLU default negative_slope
COMPUTE_DTYPE = jnp.bfloat16  # MXU / activation streaming dtype

NF = 8                        # module default is 64; kept small for the self-test
CH = 3
NUM_HIDDEN = 3
N, H, W = 2, 16, 16

_TILE_BUDGET = 16 * 1024 * 1024   # per-block VMEM budget used for tile picking
_VMEM_LIMIT = 32 * 1024 * 1024    # explicit scoped-VMEM limit (safe on v5e..v7x)


# ---------------------------------------------------------------------------
# Flat padded-spatial layout helpers
#   padded grid (H+2, W+2), flat index p = r*Wp + c, interior pixel (i, j) at
#   p = (i+1)*Wp + (j+1); array last dim Msp = round_up(Hp*Wp, 128), tail = 0.
# ---------------------------------------------------------------------------
def _round_up(x, m):
    return (x + m - 1) // m * m


def _msp(h, w):
    return _round_up((h + 2) * (w + 2), 128)


def _sl(h, w):
    # compute-window length: s in [0, SL) covers all interior outputs
    return (h - 1) * (w + 2) + w


def _interior_mask_window(h, w):
    """(1, SL) f32 mask: 1 where s -> q = s + Wp + 1 is an interior position."""
    wp = w + 2
    sl = _sl(h, w)
    q = np.arange(sl) + (wp + 1)
    r, c = q // wp, q % wp
    m = ((r >= 1) & (r <= h) & (c >= 1) & (c <= w)).astype(np.float32)
    return jnp.asarray(m.reshape(1, sl))


def _interior_mask_full(h, w):
    """(1, 1, Msp) f32 mask over the full flat layout (interior = 1)."""
    wp, hp = w + 2, h + 2
    msp = _msp(h, w)
    p = np.arange(msp)
    r, c = p // wp, p % wp
    m = ((r >= 1) & (r <= h) & (c >= 1) & (c <= w) & (p < hp * wp))
    return jnp.asarray(m.astype(np.float32).reshape(1, 1, msp))


def _pack(x_nchw, h, w, dtype):
    """(N, C, H, W) -> (N, C, Msp) flat padded layout (zero borders/tail)."""
    n, c = x_nchw.shape[:2]
    hp, wp = h + 2, w + 2
    msp = _msp(h, w)
    xp = jnp.pad(x_nchw, ((0, 0), (0, 0), (1, 1), (1, 1))).reshape(n, c, hp * wp)
    xp = jnp.pad(xp, ((0, 0), (0, 0), (0, msp - hp * wp)))
    return xp.astype(dtype)


def _unpack(y_ncm, h, w):
    """(N, C, Msp) -> (N, C, H, W) (crop the interior; already NCHW order)."""
    n, c = y_ncm.shape[:2]
    hp, wp = h + 2, w + 2
    body = y_ncm[:, :, :hp * wp].reshape(n, c, hp, wp)
    return body[:, :, 1:1 + h, 1:1 + w]


def _downsample_repack(y_ncm, h, w, dtype):
    # F.interpolate(scale_factor=0.5, mode='nearest') == x[..., ::2, ::2]
    # TODO(synk): fold this strided selection into block3's conv reads to skip
    # the small intermediate tensor (currently one fused XLA slice+pad pass).
    ds = _unpack(y_ncm, h, w)[:, :, ::2, ::2]
    return _pack(ds, h // 2, w // 2, dtype)


# ---------------------------------------------------------------------------
# Tile pickers (budget- and generation-conservative)
# ---------------------------------------------------------------------------
def _pick_co_tile(cout, msp, out_bytes, budget=_TILE_BUDGET):
    # divisor of cout, multiple of 8 (sublane tiling), double-buffered output
    # block under ~budget/2, and >=2 grid steps along cout when possible.
    cands = [d for d in range(8, cout + 1, 8) if cout % d == 0] or [cout]
    fit = [d for d in cands if 2 * d * msp * out_bytes <= budget // 2] or [cands[0]]
    co = max(fit)
    if co == cout and (cout // 2) in fit:
        co = cout // 2
    return co


def _pick_bn_ct(c, n, msp, io_bytes, budget=_TILE_BUDGET):
    cands = [d for d in range(8, c + 1, 8) if c % d == 0] or [c]
    fit = [d for d in cands if 2 * d * n * msp * io_bytes <= budget] or [cands[0]]
    ct = max(fit)
    if ct == c and (c // 2) in fit:
        ct = c // 2
    return ct


# ---------------------------------------------------------------------------
# Kernel 1: 3x3 "same" conv as nine shifted-slice MXU matmuls (+ bias,
#           + optional fused LeakyReLU), output pre-padded for the next layer.
#   w_ref: (9, CO_T, CIN) bf16   tap-major weights (resident-ish, small)
#   x_ref: (CIN, MSP)     bf16   one padded image, flat spatial, zero borders
#   b_ref: (CO_T, 1)      f32
#   m_ref: (1, SL)        f32    interior mask over the compute window
#   o_ref: (CO_T, MSP)           interior written at offset Wp+1, rest zero
# ---------------------------------------------------------------------------
def _conv_kernel(w_ref, x_ref, b_ref, m_ref, o_ref, *, wp, sl, leaky_slope):
    o_ref[...] = jnp.zeros_like(o_ref)          # borders / tail stay exactly 0
    co = o_ref.shape[0]
    acc = jnp.zeros((co, sl), jnp.float32)
    for k in range(9):                           # nine shifted views, one MXU dot each
        dy, dx = divmod(k, 3)
        off = dy * wp + dx
        acc = acc + jnp.dot(w_ref[k], x_ref[:, off:off + sl],
                            preferred_element_type=jnp.float32)
    acc = acc + b_ref[...]
    if leaky_slope is not None and leaky_slope != 1.0:
        acc = jnp.where(acc >= 0.0, acc, leaky_slope * acc)
    acc = acc * m_ref[...]                       # zero the junk (non-interior) lanes
    o_ref[:, wp + 1:wp + 1 + sl] = acc.astype(o_ref.dtype)


def conv3x3_pallas(x_ncm, w_oihw, bias, h, w, *, leaky_slope, out_dtype):
    """3x3 same conv on the flat padded layout (N, Cin, Msp) -> (N, Cout, Msp)."""
    n, cin, msp = x_ncm.shape
    cout = w_oihw.shape[0]
    wp = w + 2
    sl = _sl(h, w)
    assert msp == _msp(h, w)

    w9 = jnp.transpose(w_oihw, (2, 3, 0, 1)).reshape(9, cout, cin).astype(COMPUTE_DTYPE)
    b2 = bias.reshape(cout, 1).astype(jnp.float32)
    mask = _interior_mask_window(h, w)

    co_t = _pick_co_tile(cout, msp, jnp.dtype(out_dtype).itemsize)
    # TODO(synk): for very large H*W one padded image per Cin no longer fits a
    # VMEM block; add halo row-tiling (manual DMA) for that regime.

    kern = functools.partial(_conv_kernel, wp=wp, sl=sl, leaky_slope=leaky_slope)
    return pl.pallas_call(
        kern,
        out_shape=jax.ShapeDtypeStruct((n, cout, msp), out_dtype),
        grid=(n, cout // co_t),
        in_specs=[
            pl.BlockSpec((9, co_t, cin), lambda i, j: (0, j, 0)),
            pl.BlockSpec((None, cin, msp), lambda i, j: (i, 0, 0)),   # resident across j
            pl.BlockSpec((co_t, 1), lambda i, j: (j, 0)),
            pl.BlockSpec((1, sl), lambda i, j: (0, 0)),
        ],
        out_specs=pl.BlockSpec((None, co_t, msp), lambda i, j: (i, j, 0)),
        compiler_params=pltpu.CompilerParams(
            dimension_semantics=("parallel", "parallel"),
            vmem_limit_bytes=_VMEM_LIMIT),
    )(w9, x_ncm, b2, mask)


# ---------------------------------------------------------------------------
# Kernel 2: training-mode BatchNorm2d + LeakyReLU, channel-tiled on the flat
#           padded layout.  Padding zeros do not perturb sum / sum-sq; divide
#           by the valid count; re-mask so padding stays exactly zero.
# ---------------------------------------------------------------------------
def _bn_lrelu_kernel(x_ref, g_ref, b_ref, m_ref, o_ref, *, inv_n, eps, leaky_slope):
    x = x_ref[...].astype(jnp.float32)                                  # (N, CT, MSP)
    s = jnp.sum(jnp.sum(x, axis=2, keepdims=True), axis=0, keepdims=True)
    ss = jnp.sum(jnp.sum(x * x, axis=2, keepdims=True), axis=0, keepdims=True)
    mean = s * inv_n
    var = jnp.maximum(ss * inv_n - mean * mean, 0.0)                    # one-pass biased var
    scale = g_ref[...].astype(jnp.float32) * jax.lax.rsqrt(var + eps)   # (1, CT, 1)
    shift = b_ref[...].astype(jnp.float32) - mean * scale
    y = x * scale + shift
    if leaky_slope is not None and leaky_slope != 1.0:
        y = jnp.where(y >= 0.0, y, leaky_slope * y)
    y = y * m_ref[...]                                                  # keep padding zero
    o_ref[...] = y.astype(o_ref.dtype)


def bn_lrelu_pallas(x_ncm, gamma, beta, h, w, *, leaky_slope, out_dtype):
    n, c, msp = x_ncm.shape
    io_bytes = x_ncm.dtype.itemsize + jnp.dtype(out_dtype).itemsize
    ct = _pick_bn_ct(c, n, msp, io_bytes)
    mask = _interior_mask_full(h, w)
    inv_n = 1.0 / float(n * h * w)
    kern = functools.partial(_bn_lrelu_kernel, inv_n=inv_n, eps=EPS,
                             leaky_slope=leaky_slope)
    return pl.pallas_call(
        kern,
        out_shape=jax.ShapeDtypeStruct((n, c, msp), out_dtype),
        grid=(c // ct,),
        in_specs=[
            pl.BlockSpec((n, ct, msp), lambda i: (0, i, 0)),
            pl.BlockSpec((1, ct, 1), lambda i: (0, i, 0)),
            pl.BlockSpec((1, ct, 1), lambda i: (0, i, 0)),
            pl.BlockSpec((1, 1, msp), lambda i: (0, 0, 0)),
        ],
        out_specs=pl.BlockSpec((n, ct, msp), lambda i: (0, i, 0)),
        compiler_params=pltpu.CompilerParams(
            dimension_semantics=("parallel",),
            vmem_limit_bytes=_VMEM_LIMIT),
    )(x_ncm,
      gamma.reshape(1, c, 1).astype(jnp.float32),
      beta.reshape(1, c, 1).astype(jnp.float32),
      mask)


# ---------------------------------------------------------------------------
# DCRNNCell forward
# ---------------------------------------------------------------------------
def dcrnn_cell_forward(x, params, hx=None, is_down=True, nf=NF):
    n, _, h, w = x.shape
    if hx is None:
        hx = jnp.ones((n, nf, h, w), dtype=x.dtype)      # torch.ones default
    cur = _pack(jnp.concatenate([x, hx], axis=1), h, w, COMPUTE_DTYPE)

    # block 0: Conv + LeakyReLU(0.01), fused in the conv kernel epilogue
    p = params[0]
    cur = conv3x3_pallas(cur, p["w"], p["b"], h, w,
                         leaky_slope=LEAKY_SLOPE, out_dtype=COMPUTE_DTYPE)
    # middle blocks: Conv + BN(train) + LeakyReLU(True)
    # (nn.LeakyReLU(True) sets negative_slope=True==1.0 -> identity; kept faithful)
    for p in params[1:-1]:
        cur = conv3x3_pallas(cur, p["w"], p["b"], h, w,
                             leaky_slope=None, out_dtype=COMPUTE_DTYPE)
        cur = bn_lrelu_pallas(cur, p["g"], p["beta"], h, w,
                              leaky_slope=None, out_dtype=COMPUTE_DTYPE)
    if is_down:
        cur = _downsample_repack(cur, h, w, COMPUTE_DTYPE)
        h, w = h // 2, w // 2
    # last block: Conv + BN + LeakyReLU(0.01); final output in f32 NCHW
    p = params[-1]
    cur = conv3x3_pallas(cur, p["w"], p["b"], h, w,
                         leaky_slope=None, out_dtype=COMPUTE_DTYPE)
    cur = bn_lrelu_pallas(cur, p["g"], p["beta"], h, w,
                          leaky_slope=LEAKY_SLOPE, out_dtype=jnp.float32)
    return _unpack(cur, h, w)
    # TODO(synk): BatchNorm2d running_mean/running_var updates (training-mode
    # side effect) are not modeled; only the forward output is produced.


# ---------------------------------------------------------------------------
# Pure-JAX reference mirroring the PyTorch forward (f32, highest precision)
# ---------------------------------------------------------------------------
def _reference(x, params, hx=None, is_down=True, nf=NF):
    n, _, h, w = x.shape
    if hx is None:
        hx = jnp.ones((n, nf, h, w), dtype=x.dtype)
    cur = jnp.concatenate([x, hx], axis=1)

    def conv(z, wgt, b):
        y = jax.lax.conv_general_dilated(
            z, wgt, window_strides=(1, 1), padding=((1, 1), (1, 1)),
            dimension_numbers=("NCHW", "OIHW", "NCHW"),
            precision=jax.lax.Precision.HIGHEST)
        return y + b.reshape(1, -1, 1, 1)

    def lrelu(z, slope):
        return jnp.where(z >= 0, z, slope * z)

    def bn(z, g, b):
        mean = jnp.mean(z, axis=(0, 2, 3), keepdims=True)
        var = jnp.mean((z - mean) ** 2, axis=(0, 2, 3), keepdims=True)
        zh = (z - mean) / jnp.sqrt(var + EPS)
        return g.reshape(1, -1, 1, 1) * zh + b.reshape(1, -1, 1, 1)

    cur = lrelu(conv(cur, params[0]["w"], params[0]["b"]), LEAKY_SLOPE)
    for p in params[1:-1]:
        cur = lrelu(bn(conv(cur, p["w"], p["b"]), p["g"], p["beta"]), 1.0)
    if is_down:
        cur = cur[:, :, ::2, ::2]
    p = params[-1]
    cur = lrelu(bn(conv(cur, p["w"], p["b"]), p["g"], p["beta"]), LEAKY_SLOPE)
    return cur


# ---------------------------------------------------------------------------
# Deterministic parameter construction
# ---------------------------------------------------------------------------
def _layer_dims(nf, ch, num_hidden):
    dims = [(ch + nf, nf)]
    nf_ = nf
    for _ in range(num_hidden - 1):
        dims.append((nf_, 2 * nf_))
        nf_ *= 2
    dims.append((nf_, nf))
    return dims


def init_params(key, nf=NF, ch=CH, num_hidden=NUM_HIDDEN):
    dims = _layer_dims(nf, ch, num_hidden)
    keys = jax.random.split(key, 2 * len(dims))
    params = []
    for idx, (cin, cout) in enumerate(dims):
        scale = 1.0 / math.sqrt(9 * cin)
        p = {
            "w": scale * jax.random.normal(keys[2 * idx], (cout, cin, 3, 3),
                                           dtype=jnp.float32),
            "b": 0.1 * jax.random.normal(keys[2 * idx + 1], (cout,),
                                         dtype=jnp.float32),
        }
        if idx > 0:  # blocks 1..last carry BatchNorm2d (weight=1, bias=0 at init)
            p["g"] = jnp.ones((cout,), jnp.float32)
            p["beta"] = jnp.zeros((cout,), jnp.float32)
        params.append(p)
    return params


if __name__ == "__main__":
    key = jax.random.PRNGKey(0)
    k_x, k_p = jax.random.split(key)

    x = jax.random.normal(k_x, (N, CH, H, W), dtype=jnp.float32)
    params = init_params(k_p)

    fwd = jax.jit(dcrnn_cell_forward)
    out = jax.block_until_ready(fwd(x, params))

    ref = _reference(x, params)
    assert out.shape == (N, NF, H // 2, W // 2), out.shape
    err = float(jnp.max(jnp.abs(out - ref)))
    # Tolerance covers the bf16 MXU/activation datapath vs the f32
    # Precision.HIGHEST reference; on the batch-normalized (unit-variance)
    # outputs structural bugs would produce O(1) errors, not ~1-2%.
    assert jnp.allclose(out, ref, atol=5e-2, rtol=5e-2), err
    print("KERNEL_OK")
</pallas_src>

<mosaic_0001>
module attributes {stable_mosaic.version = 11 : i64} {
  func.func @_bn_lrelu_kernel(%arg0: i32, %arg1: memref<2x8x384xbf16, #tpu.memory_space<vmem>>, %arg2: memref<1x8x1xf32, #tpu.memory_space<vmem>>, %arg3: memref<1x8x1xf32, #tpu.memory_space<vmem>>, %arg4: memref<1x1x384xf32, #tpu.memory_space<vmem>>, %arg5: memref<2x8x384xbf16, #tpu.memory_space<vmem>>) attributes {dimension_semantics = [#tpu.dimension_semantics<parallel>], iteration_bounds = array<i64: 2>, scalar_prefetch = 0 : i64, scratch_operands = 0 : i64, tpu.core_type = #tpu.core_type<tc>, window_params = [{transform_indices = @transform_0, window_bounds = array<i64: 2, 8, 384>}, {transform_indices = @transform_1, window_bounds = array<i64: 1, 8, 1>}, {transform_indices = @transform_2, window_bounds = array<i64: 1, 8, 1>}, {pipeline_mode = #tpu.pipeline_mode<synchronous>, transform_indices = @transform_3, window_bounds = array<i64: 1, 1, 384>}, {transform_indices = @transform_4, window_bounds = array<i64: 2, 8, 384>}]} {
    %c0 = arith.constant 0 : index
    %c0_0 = arith.constant 0 : index
    %c0_1 = arith.constant 0 : index
    %0 = vector.load %arg1[%c0, %c0_0, %c0_1] : memref<2x8x384xbf16, #tpu.memory_space<vmem>>, vector<2x8x384xbf16>
    %1 = arith.extf %0 : vector<2x8x384xbf16> to vector<2x8x384xf32>
    %cst = arith.constant dense<0.000000e+00> : vector<2x8xf32>
    %2 = vector.multi_reduction <add>, %1, %cst [2] : vector<2x8x384xf32> to vector<2x8xf32>
    %3 = vector.shape_cast %2 : vector<2x8xf32> to vector<2x8x1xf32>
    %cst_2 = arith.constant dense<0.000000e+00> : vector<8x1xf32>
    %4 = vector.multi_reduction <add>, %3, %cst_2 [0] : vector<2x8x1xf32> to vector<8x1xf32>
    %5 = vector.shape_cast %4 : vector<8x1xf32> to vector<1x8x1xf32>
    %6 = arith.mulf %1, %1 : vector<2x8x384xf32>
    %cst_3 = arith.constant dense<0.000000e+00> : vector<2x8xf32>
    %7 = vector.multi_reduction <add>, %6, %cst_3 [2] : vector<2x8x384xf32> to vector<2x8xf32>
    %8 = vector.shape_cast %7 : vector<2x8xf32> to vector<2x8x1xf32>
    %cst_4 = arith.constant dense<0.000000e+00> : vector<8x1xf32>
    %9 = vector.multi_reduction <add>, %8, %cst_4 [0] : vector<2x8x1xf32> to vector<8x1xf32>
    %10 = vector.shape_cast %9 : vector<8x1xf32> to vector<1x8x1xf32>
    %cst_5 = arith.constant 0.001953125 : f32
    %11 = vector.broadcast %cst_5 : f32 to vector<1x8x1xf32>
    %12 = arith.mulf %5, %11 : vector<1x8x1xf32>
    %cst_6 = arith.constant 0.001953125 : f32
    %13 = vector.broadcast %cst_6 : f32 to vector<1x8x1xf32>
    %14 = arith.mulf %10, %13 : vector<1x8x1xf32>
    %15 = arith.mulf %12, %12 : vector<1x8x1xf32>
    %16 = arith.subf %14, %15 : vector<1x8x1xf32>
    %cst_7 = arith.constant 0.000000e+00 : f32
    %17 = vector.broadcast %cst_7 : f32 to vector<1x8x1xf32>
    %18 = arith.maximumf %16, %17 : vector<1x8x1xf32>
    %c0_8 = arith.constant 0 : index
    %c0_9 = arith.constant 0 : index
    %c0_10 = arith.constant 0 : index
    %19 = vector.load %arg2[%c0_8, %c0_9, %c0_10] : memref<1x8x1xf32, #tpu.memory_space<vmem>>, vector<1x8x1xf32>
    %cst_11 = arith.constant 9.99999974E-6 : f32
    %20 = vector.broadcast %cst_11 : f32 to vector<1x8x1xf32>
    %21 = arith.addf %18, %20 : vector<1x8x1xf32>
    %22 = math.rsqrt %21 : vector<1x8x1xf32>
    %23 = arith.mulf %19, %22 : vector<1x8x1xf32>
    %c0_12 = arith.constant 0 : index
    %c0_13 = arith.constant 0 : index
    %c0_14 = arith.constant 0 : index
    %24 = vector.load %arg3[%c0_12, %c0_13, %c0_14] : memref<1x8x1xf32, #tpu.memory_space<vmem>>, vector<1x8x1xf32>
    %25 = arith.mulf %12, %23 : vector<1x8x1xf32>
    %26 = arith.subf %24, %25 : vector<1x8x1xf32>
    %27 = vector.broadcast %23 : vector<1x8x1xf32> to vector<2x8x384xf32>
    %28 = arith.mulf %1, %27 : vector<2x8x384xf32>
    %29 = vector.broadcast %26 : vector<1x8x1xf32> to vector<2x8x384xf32>
    %30 = arith.addf %28, %29 : vector<2x8x384xf32>
    %c0_15 = arith.constant 0 : index
    %c0_16 = arith.constant 0 : index
    %c0_17 = arith.constant 0 : index
    %31 = vector.load %arg4[%c0_15, %c0_16, %c0_17] : memref<1x1x384xf32, #tpu.memory_space<vmem>>, vector<1x1x384xf32>
    %32 = vector.broadcast %31 : vector<1x1x384xf32> to vector<2x8x384xf32>
    %33 = arith.mulf %30, %32 : vector<2x8x384xf32>
    %34 = arith.truncf %33 : vector<2x8x384xf32> to vector<2x8x384xbf16>
    %c0_18 = arith.constant 0 : index
    %c0_19 = arith.constant 0 : index
    %c0_20 = arith.constant 0 : index
    %35 = vector.load %arg5[%c0_18, %c0_19, %c0_20] : memref<2x8x384xbf16, #tpu.memory_space<vmem>>, vector<2x8x384xbf16>
    tpu.vector_store %arg5[%c0_18, %c0_19, %c0_20], %34 {strides = array<i32>} : memref<2x8x384xbf16, #tpu.memory_space<vmem>>, vector<2x8x384xbf16>,
    return
  }
  func.func @transform_0(%arg0: i32) -> (i32, i32, i32) {
    %c0_i32 = arith.constant 0 : i32
    %c0_i32_0 = arith.constant 0 : i32
    %c0_i32_1 = arith.constant 0 : i32
    return %c0_i32, %arg0, %c0_i32_0 : i32, i32, i32
  }
  func.func @transform_1(%arg0: i32) -> (i32, i32, i32) {
    %c0_i32 = arith.constant 0 : i32
    %c0_i32_0 = arith.constant 0 : i32
    %c0_i32_1 = arith.constant 0 : i32
    return %c0_i32, %arg0, %c0_i32_0 : i32, i32, i32
  }
  func.func @transform_2(%arg0: i32) -> (i32, i32, i32) {
    %c0_i32 = arith.constant 0 : i32
    %c0_i32_0 = arith.constant 0 : i32
    %c0_i32_1 = arith.constant 0 : i32
    return %c0_i32, %arg0, %c0_i32_0 : i32, i32, i32
  }
  func.func @transform_3(%arg0: i32) -> (i32, i32, i32) {
    %c0_i32 = arith.constant 0 : i32
    %c0_i32_0 = arith.constant 0 : i32
    %c0_i32_1 = arith.constant 0 : i32
    %c0_i32_2 = arith.constant 0 : i32
    return %c0_i32, %c0_i32_0, %c0_i32_1 : i32, i32, i32
  }
  func.func @transform_4(%arg0: i32) -> (i32, i32, i32) {
    %c0_i32 = arith.constant 0 : i32
    %c0_i32_0 = arith.constant 0 : i32
    %c0_i32_1 = arith.constant 0 : i32
    return %c0_i32, %arg0, %c0_i32_0 : i32, i32, i32
  }
}

module attributes {stable_mosaic.version = 11 : i64} {
  func.func @_conv_kernel(%arg0: i32, %arg1: i32, %arg2: memref<9x8x11xbf16, #tpu.memory_space<vmem>>, %arg3: memref<1x11x384xbf16, #tpu.memory_space<vmem>>, %arg4: memref<8x1xf32, #tpu.memory_space<vmem>>, %arg5: memref<1x286xf32, #tpu.memory_space<vmem>>, %arg6: memref<1x8x384xbf16, #tpu.memory_space<vmem>>) attributes {dimension_semantics = [#tpu.dimension_semantics<parallel>, #tpu.dimension_semantics<parallel>], iteration_bounds = array<i64: 2, 1>, scalar_prefetch = 0 : i64, scratch_operands = 0 : i64, tpu.core_type = #tpu.core_type<tc>, window_params = [{transform_indices = @transform_0, window_bounds = array<i64: 9, 8, 11>}, {transform_indices = @transform_1, window_bounds = array<i64: 1, 11, 384>}, {transform_indices = @transform_2, window_bounds = array<i64: 8, 1>}, {pipeline_mode = #tpu.pipeline_mode<synchronous>, transform_indices = @transform_3, window_bounds = array<i64: 1, 286>}, {transform_indices = @transform_4, window_bounds = array<i64: 1, 8, 384>}]} {
    %cst = arith.constant 0.000000e+00 : bf16
    %0 = vector.broadcast %cst : bf16 to vector<8x384xbf16>
    %c0 = arith.constant 0 : index
    %c0_0 = arith.constant 0 : index
    %c0_1 = arith.constant 0 : index
    %1 = vector.load %arg6[%c0, %c0_0, %c0_1] : memref<1x8x384xbf16, #tpu.memory_space<vmem>>, vector<1x8x384xbf16>
    %2 = vector.shape_cast %1 : vector<1x8x384xbf16> to vector<8x384xbf16>
    %3 = vector.shape_cast %0 : vector<8x384xbf16> to vector<1x8x384xbf16>
    tpu.vector_store %arg6[%c0, %c0_0, %c0_1], %3 {strides = array<i32>} : memref<1x8x384xbf16, #tpu.memory_space<vmem>>, vector<1x8x384xbf16>,
    %cst_2 = arith.constant 0.000000e+00 : f32
    %4 = vector.broadcast %cst_2 : f32 to vector<8x286xf32>
    %c0_3 = arith.constant 0 : index
    %c0_4 = arith.constant 0 : index
    %c0_5 = arith.constant 0 : index
    %5 = vector.load %arg2[%c0_3, %c0_4, %c0_5] : memref<9x8x11xbf16, #tpu.memory_space<vmem>>, vector<1x8x11xbf16>
    %6 = vector.shape_cast %5 : vector<1x8x11xbf16> to vector<8x11xbf16>
    %c0_6 = arith.constant 0 : index
    %c0_7 = arith.constant 0 : index
    %c0_8 = arith.constant 0 : index
    %7 = vector.load %arg3[%c0_6, %c0_7, %c0_8] : memref<1x11x384xbf16, #tpu.memory_space<vmem>>, vector<1x11x286xbf16>
    %8 = vector.shape_cast %7 : vector<1x11x286xbf16> to vector<11x286xbf16>
    %cst_9 = arith.constant dense<0.000000e+00> : vector<8x286xf32>
    %9 = tpu.matmul %6, %8, %cst_9 {dimension_numbers = #tpu.dot_dimension_numbers<[1], [0], [0], [1], [0, 0, 1, 1], [], []>} : vector<8x11xbf16>, vector<11x286xbf16>, vector<8x286xf32> -> vector<8x286xf32>
    %10 = arith.addf %4, %9 : vector<8x286xf32>
    %c1 = arith.constant 1 : index
    %c0_10 = arith.constant 0 : index
    %c0_11 = arith.constant 0 : index
    %11 = vector.load %arg2[%c1, %c0_10, %c0_11] : memref<9x8x11xbf16, #tpu.memory_space<vmem>>, vector<1x8x11xbf16>
    %12 = vector.shape_cast %11 : vector<1x8x11xbf16> to vector<8x11xbf16>
    %c0_12 = arith.constant 0 : index
    %c0_13 = arith.constant 0 : index
    %c1_14 = arith.constant 1 : index
    %13 = vector.load %arg3[%c0_12, %c0_13, %c1_14] : memref<1x11x384xbf16, #tpu.memory_space<vmem>>, vector<1x11x286xbf16>
    %14 = vector.shape_cast %13 : vector<1x11x286xbf16> to vector<11x286xbf16>
    %cst_15 = arith.constant dense<0.000000e+00> : vector<8x286xf32>
    %15 = tpu.matmul %12, %14, %cst_15 {dimension_numbers = #tpu.dot_dimension_numbers<[1], [0], [0], [1], [0, 0, 1, 1], [], []>} : vector<8x11xbf16>, vector<11x286xbf16>, vector<8x286xf32> -> vector<8x286xf32>
    %16 = arith.addf %10, %15 : vector<8x286xf32>
    %c2 = arith.constant 2 : index
    %c0_16 = arith.constant 0 : index
    %c0_17 = arith.constant 0 : index
    %17 = vector.load %arg2[%c2, %c0_16, %c0_17] : memref<9x8x11xbf16, #tpu.memory_space<vmem>>, vector<1x8x11xbf16>
    %18 = vector.shape_cast %17 : vector<1x8x11xbf16> to vector<8x11xbf16>
    %c0_18 = arith.constant 0 : index
    %c0_19 = arith.constant 0 : index
    %c2_20 = arith.constant 2 : index
    %19 = vector.load %arg3[%c0_18, %c0_19, %c2_20] : memref<1x11x384xbf16, #tpu.memory_space<vmem>>, vector<1x11x286xbf16>
    %20 = vector.shape_cast %19 : vector<1x11x286xbf16> to vector<11x286xbf16>
    %cst_21 = arith.constant dense<0.000000e+00> : vector<8x286xf32>
    %21 = tpu.matmul %18, %20, %cst_21 {dimension_numbers = #tpu.dot_dimension_numbers<[1], [0], [0], [1], [0, 0, 1, 1], [], []>} : vector<8x11xbf16>, vector<11x286xbf16>, vector<8x286xf32> -> vector<8x286xf32>
    %22 = arith.addf %16, %21 : vector<8x286xf32>
    %c3 = arith.constant 3 : index
    %c0_22 = arith.constant 0 : index
    %c0_23 = arith.constant 0 : index
    %23 = vector.load %arg2[%c3, %c0_22, %c0_23] : memref<9x8x11xbf16, #tpu.memory_space<vmem>>, vector<1x8x11xbf16>
    %24 = vector.shape_cast %23 : vector<1x8x11xbf16> to vector<8x11xbf16>
    %c0_24 = arith.constant 0 : index
    %c0_25 = arith.constant 0 : index
    %c18 = arith.constant 18 : index
    %25 = vector.load %arg3[%c0_24, %c0_25, %c18] : memref<1x11x384xbf16, #tpu.memory_space<vmem>>, vector<1x11x286xbf16>
    %26 = vector.shape_cast %25 : vector<1x11x286xbf16> to vector<11x286xbf16>
    %cst_26 = arith.constant dense<0.000000e+00> : vector<8x286xf32>
    %27 = tpu.matmul %24, %26, %cst_26 {dimension_numbers = #tpu.dot_dimension_numbers<[1], [0], [0], [1], [0, 0, 1, 1], [], []>} : vector<8x11xbf16>, vector<11x286xbf16>, vector<8x286xf32> -> vector<8x286xf32>
    %28 = arith.addf %22, %27 : vector<8x286xf32>
    %c4 = arith.constant 4 : index
    %c0_27 = arith.constant 0 : index
    %c0_28 = arith.constant 0 : index
    %29 = vector.load %arg2[%c4, %c0_27, %c0_28] : memref<9x8x11xbf16, #tpu.memory_space<vmem>>, vector<1x8x11xbf16>
    %30 = vector.shape_cast %29 : vector<1x8x11xbf16> to vector<8x11xbf16>
    %c0_29 = arith.constant 0 : index
    %c0_30 = arith.constant 0 : index
    %c19 = arith.constant 19 : index
    %31 = vector.load %arg3[%c0_29, %c0_30, %c19] : memref<1x11x384xbf16, #tpu.memory_space<vmem>>, vector<1x11x286xbf16>
    %32 = vector.shape_cast %31 : vector<1x11x286xbf16> to vector<11x286xbf16>
    %cst_31 = arith.constant dense<0.000000e+00> : vector<8x286xf32>
    %33 = tpu.matmul %30, %32, %cst_31 {dimension_numbers = #tpu.dot_dimension_numbers<[1], [0], [0], [1], [0, 0, 1, 1], [], []>} : vector<8x11xbf16>, vector<11x286xbf16>, vector<8x286xf32> -> vector<8x286xf32>
    %34 = arith.addf %28, %33 : vector<8x286xf32>
    %c5 = arith.constant 5 : index
    %c0_32 = arith.constant 0 : index
    %c0_33 = arith.constant 0 : index
    %35 = vector.load %arg2[%c5, %c0_32, %c0_33] : memref<9x8x11xbf16, #tpu.memory_space<vmem>>, vector<1x8x11xbf16>
    %36 = vector.shape_cast %35 : vector<1x8x11xbf16> to vector<8x11xbf16>
    %c0_34 = arith.constant 0 : index
    %c0_35 = arith.constant 0 : index
    %c20 = arith.constant 20 : index
    %37 = vector.load %arg3[%c0_34, %c0_35, %c20] : memref<1x11x384xbf16, #tpu.memory_space<vmem>>, vector<1x11x286xbf16>
    %38 = vector.shape_cast %37 : vector<1x11x286xbf16> to vector<11x286xbf16>
    %cst_36 = arith.constant dense<0.000000e+00> : vector<8x286xf32>
    %39 = tpu.matmul %36, %38, %cst_36 {dimension_numbers = #tpu.dot_dimension_numbers<[1], [0], [0], [1], [0, 0, 1, 1], [], []>} : vector<8x11xbf16>, vector<11x286xbf16>, vector<8x286xf32> -> vector<8x286xf32>
    %40 = arith.addf %34, %39 : vector<8x286xf32>
    %c6 = arith.constant 6 : index
    %c0_37 = arith.constant 0 : index
    %c0_38 = arith.constant 0 : index
    %41 = vector.load %arg2[%c6, %c0_37, %c0_38] : memref<9x8x11xbf16, #tpu.memory_space<vmem>>, vector<1x8x11xbf16>
    %42 = vector.shape_cast %41 : vector<1x8x11xbf16> to vector<8x11xbf16>
    %c0_39 = arith.constant 0 : index
    %c0_40 = arith.constant 0 : index
    %c36 = arith.constant 36 : index
    %43 = vector.load %arg3[%c0_39, %c0_40, %c36] : memref<1x11x384xbf16, #tpu.memory_space<vmem>>, vector<1x11x286xbf16>
    %44 = vector.shape_cast %43 : vector<1x11x286xbf16> to vector<11x286xbf16>
    %cst_41 = arith.constant dense<0.000000e+00> : vector<8x286xf32>
    %45 = tpu.matmul %42, %44, %cst_41 {dimension_numbers = #tpu.dot_dimension_numbers<[1], [0], [0], [1], [0, 0, 1, 1], [], []>} : vector<8x11xbf16>, vector<11x286xbf16>, vector<8x286xf32> -> vector<8x286xf32>
    %46 = arith.addf %40, %45 : vector<8x286xf32>
    %c7 = arith.constant 7 : index
    %c0_42 = arith.constant 0 : index
    %c0_43 = arith.constant 0 : index
    %47 = vector.load %arg2[%c7, %c0_42, %c0_43] : memref<9x8x11xbf16, #tpu.memory_space<vmem>>, vector<1x8x11xbf16>
    %48 = vector.shape_cast %47 : vector<1x8x11xbf16> to vector<8x11xbf16>
    %c0_44 = arith.constant 0 : index
    %c0_45 = arith.constant 0 : index
    %c37 = arith.constant 37 : index
    %49 = vector.load %arg3[%c0_44, %c0_45, %c37] : memref<1x11x384xbf16, #tpu.memory_space<vmem>>, vector<1x11x286xbf16>
    %50 = vector.shape_cast %49 : vector<1x11x286xbf16> to vector<11x286xbf16>
    %cst_46 = arith.constant dense<0.000000e+00> : vector<8x286xf32>
    %51 = tpu.matmul %48, %50, %cst_46 {dimension_numbers = #tpu.dot_dimension_numbers<[1], [0], [0], [1], [0, 0, 1, 1], [], []>} : vector<8x11xbf16>, vector<11x286xbf16>, vector<8x286xf32> -> vector<8x286xf32>
    %52 = arith.addf %46, %51 : vector<8x286xf32>
    %c8 = arith.constant 8 : index
    %c0_47 = arith.constant 0 : index
    %c0_48 = arith.constant 0 : index
    %53 = vector.load %arg2[%c8, %c0_47, %c0_48] : memref<9x8x11xbf16, #tpu.memory_space<vmem>>, vector<1x8x11xbf16>
    %54 = vector.shape_cast %53 : vector<1x8x11xbf16> to vector<8x11xbf16>
    %c0_49 = arith.constant 0 : index
    %c0_50 = arith.constant 0 : index
    %c38 = arith.constant 38 : index
    %55 = vector.load %arg3[%c0_49, %c0_50, %c38] : memref<1x11x384xbf16, #tpu.memory_space<vmem>>, vector<1x11x286xbf16>
    %56 = vector.shape_cast %55 : vector<1x11x286xbf16> to vector<11x286xbf16>
    %cst_51 = arith.constant dense<0.000000e+00> : vector<8x286xf32>
    %57 = tpu.matmul %54, %56, %cst_51 {dimension_numbers = #tpu.dot_dimension_numbers<[1], [0], [0], [1], [0, 0, 1, 1], [], []>} : vector<8x11xbf16>, vector<11x286xbf16>, vector<8x286xf32> -> vector<8x286xf32>
    %58 = arith.addf %52, %57 : vector<8x286xf32>
    %c0_52 = arith.constant 0 : index
    %c0_53 = arith.constant 0 : index
    %59 = vector.load %arg4[%c0_52, %c0_53] : memref<8x1xf32, #tpu.memory_space<vmem>>, vector<8x1xf32>
    %60 = vector.broadcast %59 : vector<8x1xf32> to vector<8x286xf32>
    %61 = arith.addf %58, %60 : vector<8x286xf32>
    %cst_54 = arith.constant 0.000000e+00 : f32
    %62 = vector.broadcast %cst_54 : f32 to vector<8x286xf32>
    %63 = arith.cmpf oge, %61, %62 : vector<8x286xf32>
    %cst_55 = arith.constant 0.00999999977 : f32
    %64 = vector.broadcast %cst_55 : f32 to vector<8x286xf32>
    %65 = arith.mulf %64, %61 : vector<8x286xf32>
    %66 = arith.select %63, %61, %65 : vector<8x286xi1>, vector<8x286xf32>
    %c0_56 = arith.constant 0 : index
    %c0_57 = arith.constant 0 : index
    %67 = vector.load %arg5[%c0_56, %c0_57] : memref<1x286xf32, #tpu.memory_space<vmem>>, vector<1x286xf32>
    %68 = vector.broadcast %67 : vector<1x286xf32> to vector<8x286xf32>
    %69 = arith.mulf %66, %68 : vector<8x286xf32>
    %70 = arith.truncf %69 : vector<8x286xf32> to vector<8x286xbf16>
    %c0_58 = arith.constant 0 : index
    %c0_59 = arith.constant 0 : index
    %c19_60 = arith.constant 19 : index
    %71 = vector.load %arg6[%c0_58, %c0_59, %c19_60] : memref<1x8x384xbf16, #tpu.memory_space<vmem>>, vector<1x8x286xbf16>
    %72 = vector.shape_cast %71 : vector<1x8x286xbf16> to vector<8x286xbf16>
    %73 = vector.shape_cast %70 : vector<8x286xbf16> to vector<1x8x286xbf16>
    tpu.vector_store %arg6[%c0_58, %c0_59, %c19_60], %73 {strides = array<i32>} : memref<1x8x384xbf16, #tpu.memory_space<vmem>>, vector<1x8x286xbf16>,
    return
  }
  func.func @transform_0(%arg0: i32, %arg1: i32) -> (i32, i32, i32) {
    %c0_i32 = arith.constant 0 : i32
    %c0_i32_0 = arith.constant 0 : i32
    %c0_i32_1 = arith.constant 0 : i32
    return %c0_i32, %arg1, %c0_i32_0 : i32, i32, i32
  }
  func.func @transform_1(%arg0: i32, %arg1: i32) -> (i32, i32, i32) {
    %c0_i32 = arith.constant 0 : i32
    %c0_i32_0 = arith.constant 0 : i32
    %c0_i32_1 = arith.constant 0 : i32
    return %arg0, %c0_i32, %c0_i32_0 : i32, i32, i32
  }
  func.func @transform_2(%arg0: i32, %arg1: i32) -> (i32, i32) {
    %c0_i32 = arith.constant 0 : i32
    %c0_i32_0 = arith.constant 0 : i32
    return %arg1, %c0_i32 : i32, i32
  }
  func.func @transform_3(%arg0: i32, %arg1: i32) -> (i32, i32) {
    %c0_i32 = arith.constant 0 : i32
    %c0_i32_0 = arith.constant 0 : i32
    %c0_i32_1 = arith.constant 0 : i32
    return %c0_i32, %c0_i32_0 : i32, i32
  }
  func.func @transform_4(%arg0: i32, %arg1: i32) -> (i32, i32, i32) {
    %c0_i32 = arith.constant 0 : i32
    %c0_i32_0 = arith.constant 0 : i32
    return %arg0, %arg1, %c0_i32 : i32, i32, i32
  }
}

module attributes {stable_mosaic.version = 11 : i64} {
  func.func @_conv_kernel(%arg0: i32, %arg1: i32, %arg2: memref<9x8x8xbf16, #tpu.memory_space<vmem>>, %arg3: memref<1x8x384xbf16, #tpu.memory_space<vmem>>, %arg4: memref<8x1xf32, #tpu.memory_space<vmem>>, %arg5: memref<1x286xf32, #tpu.memory_space<vmem>>, %arg6: memref<1x8x384xbf16, #tpu.memory_space<vmem>>) attributes {dimension_semantics = [#tpu.dimension_semantics<parallel>, #tpu.dimension_semantics<parallel>], iteration_bounds = array<i64: 2, 2>, scalar_prefetch = 0 : i64, scratch_operands = 0 : i64, tpu.core_type = #tpu.core_type<tc>, window_params = [{transform_indices = @transform_0, window_bounds = array<i64: 9, 8, 8>}, {transform_indices = @transform_1, window_bounds = array<i64: 1, 8, 384>}, {transform_indices = @transform_2, window_bounds = array<i64: 8, 1>}, {pipeline_mode = #tpu.pipeline_mode<synchronous>, transform_indices = @transform_3, window_bounds = array<i64: 1, 286>}, {transform_indices = @transform_4, window_bounds = array<i64: 1, 8, 384>}]} {
    %cst = arith.constant 0.000000e+00 : bf16
    %0 = vector.broadcast %cst : bf16 to vector<8x384xbf16>
    %c0 = arith.constant 0 : index
    %c0_0 = arith.constant 0 : index
    %c0_1 = arith.constant 0 : index
    %1 = vector.load %arg6[%c0, %c0_0, %c0_1] : memref<1x8x384xbf16, #tpu.memory_space<vmem>>, vector<1x8x384xbf16>
    %2 = vector.shape_cast %1 : vector<1x8x384xbf16> to vector<8x384xbf16>
    %3 = vector.shape_cast %0 : vector<8x384xbf16> to vector<1x8x384xbf16>
    tpu.vector_store %arg6[%c0, %c0_0, %c0_1], %3 {strides = array<i32>} : memref<1x8x384xbf16, #tpu.memory_space<vmem>>, vector<1x8x384xbf16>,
    %cst_2 = arith.constant 0.000000e+00 : f32
    %4 = vector.broadcast %cst_2 : f32 to vector<8x286xf32>
    %c0_3 = arith.constant 0 : index
    %c0_4 = arith.constant 0 : index
    %c0_5 = arith.constant 0 : index
    %5 = vector.load %arg2[%c0_3, %c0_4, %c0_5] : memref<9x8x8xbf16, #tpu.memory_space<vmem>>, vector<1x8x8xbf16>
    %6 = vector.shape_cast %5 : vector<1x8x8xbf16> to vector<8x8xbf16>
    %c0_6 = arith.constant 0 : index
    %c0_7 = arith.constant 0 : index
    %c0_8 = arith.constant 0 : index
    %7 = vector.load %arg3[%c0_6, %c0_7, %c0_8] : memref<1x8x384xbf16, #tpu.memory_space<vmem>>, vector<1x8x286xbf16>
    %8 = vector.shape_cast %7 : vector<1x8x286xbf16> to vector<8x286xbf16>
    %cst_9 = arith.constant dense<0.000000e+00> : vector<8x286xf32>
    %9 = tpu.matmul %6, %8, %cst_9 {dimension_numbers = #tpu.dot_dimension_numbers<[1], [0], [0], [1], [0, 0, 1, 1], [], []>} : vector<8x8xbf16>, vector<8x286xbf16>, vector<8x286xf32> -> vector<8x286xf32>
    %10 = arith.addf %4, %9 : vector<8x286xf32>
    %c1 = arith.constant 1 : index
    %c0_10 = arith.constant 0 : index
    %c0_11 = arith.constant 0 : index
    %11 = vector.load %arg2[%c1, %c0_10, %c0_11] : memref<9x8x8xbf16, #tpu.memory_space<vmem>>, vector<1x8x8xbf16>
    %12 = vector.shape_cast %11 : vector<1x8x8xbf16> to vector<8x8xbf16>
    %c0_12 = arith.constant 0 : index
    %c0_13 = arith.constant 0 : index
    %c1_14 = arith.constant 1 : index
    %13 = vector.load %arg3[%c0_12, %c0_13, %c1_14] : memref<1x8x384xbf16, #tpu.memory_space<vmem>>, vector<1x8x286xbf16>
    %14 = vector.shape_cast %13 : vector<1x8x286xbf16> to vector<8x286xbf16>
    %cst_15 = arith.constant dense<0.000000e+00> : vector<8x286xf32>
    %15 = tpu.matmul %12, %14, %cst_15 {dimension_numbers = #tpu.dot_dimension_numbers<[1], [0], [0], [1], [0, 0, 1, 1], [], []>} : vector<8x8xbf16>, vector<8x286xbf16>, vector<8x286xf32> -> vector<8x286xf32>
    %16 = arith.addf %10, %15 : vector<8x286xf32>
    %c2 = arith.constant 2 : index
    %c0_16 = arith.constant 0 : index
    %c0_17 = arith.constant 0 : index
    %17 = vector.load %arg2[%c2, %c0_16, %c0_17] : memref<9x8x8xbf16, #tpu.memory_space<vmem>>, vector<1x8x8xbf16>
    %18 = vector.shape_cast %17 : vector<1x8x8xbf16> to vector<8x8xbf16>
    %c0_18 = arith.constant 0 : index
    %c0_19 = arith.constant 0 : index
    %c2_20 = arith.constant 2 : index
    %19 = vector.load %arg3[%c0_18, %c0_19, %c2_20] : memref<1x8x384xbf16, #tpu.memory_space<vmem>>, vector<1x8x286xbf16>
    %20 = vector.shape_cast %19 : vector<1x8x286xbf16> to vector<8x286xbf16>
    %cst_21 = arith.constant dense<0.000000e+00> : vector<8x286xf32>
    %21 = tpu.matmul %18, %20, %cst_21 {dimension_numbers = #tpu.dot_dimension_numbers<[1], [0], [0], [1], [0, 0, 1, 1], [], []>} : vector<8x8xbf16>, vector<8x286xbf16>, vector<8x286xf32> -> vector<8x286xf32>
    %22 = arith.addf %16, %21 : vector<8x286xf32>
    %c3 = arith.constant 3 : index
    %c0_22 = arith.constant 0 : index
    %c0_23 = arith.constant 0 : index
    %23 = vector.load %arg2[%c3, %c0_22, %c0_23] : memref<9x8x8xbf16, #tpu.memory_space<vmem>>, vector<1x8x8xbf16>
    %24 = vector.shape_cast %23 : vector<1x8x8xbf16> to vector<8x8xbf16>
    %c0_24 = arith.constant 0 : index
    %c0_25 = arith.constant 0 : index
    %c18 = arith.constant 18 : index
    %25 = vector.load %arg3[%c0_24, %c0_25, %c18] : memref<1x8x384xbf16, #tpu.memory_space<vmem>>, vector<1x8x286xbf16>
    %26 = vector.shape_cast %25 : vector<1x8x286xbf16> to vector<8x286xbf16>
    %cst_26 = arith.constant dense<0.000000e+00> : vector<8x286xf32>
    %27 = tpu.matmul %24, %26, %cst_26 {dimension_numbers = #tpu.dot_dimension_numbers<[1], [0], [0], [1], [0, 0, 1, 1], [], []>} : vector<8x8xbf16>, vector<8x286xbf16>, vector<8x286xf32> -> vector<8x286xf32>
    %28 = arith.addf %22, %27 : vector<8x286xf32>
    %c4 = arith.constant 4 : index
    %c0_27 = arith.constant 0 : index
    %c0_28 = arith.constant 0 : index
    %29 = vector.load %arg2[%c4, %c0_27, %c0_28] : memref<9x8x8xbf16, #tpu.memory_space<vmem>>, vector<1x8x8xbf16>
    %30 = vector.shape_cast %29 : vector<1x8x8xbf16> to vector<8x8xbf16>
    %c0_29 = arith.constant 0 : index
    %c0_30 = arith.constant 0 : index
    %c19 = arith.constant 19 : index
    %31 = vector.load %arg3[%c0_29, %c0_30, %c19] : memref<1x8x384xbf16, #tpu.memory_space<vmem>>, vector<1x8x286xbf16>
    %32 = vector.shape_cast %31 : vector<1x8x286xbf16> to vector<8x286xbf16>
    %cst_31 = arith.constant dense<0.000000e+00> : vector<8x286xf32>
    %33 = tpu.matmul %30, %32, %cst_31 {dimension_numbers = #tpu.dot_dimension_numbers<[1], [0], [0], [1], [0, 0, 1, 1], [], []>} : vector<8x8xbf16>, vector<8x286xbf16>, vector<8x286xf32> -> vector<8x286xf32>
    %34 = arith.addf %28, %33 : vector<8x286xf32>
    %c5 = arith.constant 5 : index
    %c0_32 = arith.constant 0 : index
    %c0_33 = arith.constant 0 : index
    %35 = vector.load %arg2[%c5, %c0_32, %c0_33] : memref<9x8x8xbf16, #tpu.memory_space<vmem>>, vector<1x8x8xbf16>
    %36 = vector.shape_cast %35 : vector<1x8x8xbf16> to vector<8x8xbf16>
    %c0_34 = arith.constant 0 : index
    %c0_35 = arith.constant 0 : index
    %c20 = arith.constant 20 : index
    %37 = vector.load %arg3[%c0_34, %c0_35, %c20] : memref<1x8x384xbf16, #tpu.memory_space<vmem>>, vector<1x8x286xbf16>
    %38 = vector.shape_cast %37 : vector<1x8x286xbf16> to vector<8x286xbf16>
    %cst_36 = arith.constant dense<0.000000e+00> : vector<8x286xf32>
    %39 = tpu.matmul %36, %38, %cst_36 {dimension_numbers = #tpu.dot_dimension_numbers<[1], [0], [0], [1], [0, 0, 1, 1], [], []>} : vector<8x8xbf16>, vector<8x286xbf16>, vector<8x286xf32> -> vector<8x286xf32>
    %40 = arith.addf %34, %39 : vector<8x286xf32>
    %c6 = arith.constant 6 : index
    %c0_37 = arith.constant 0 : index
    %c0_38 = arith.constant 0 : index
    %41 = vector.load %arg2[%c6, %c0_37, %c0_38] : memref<9x8x8xbf16, #tpu.memory_space<vmem>>, vector<1x8x8xbf16>
    %42 = vector.shape_cast %41 : vector<1x8x8xbf16> to vector<8x8xbf16>
    %c0_39 = arith.constant 0 : index
    %c0_40 = arith.constant 0 : index
    %c36 = arith.constant 36 : index
    %43 = vector.load %arg3[%c0_39, %c0_40, %c36] : memref<1x8x384xbf16, #tpu.memory_space<vmem>>, vector<1x8x286xbf16>
    %44 = vector.shape_cast %43 : vector<1x8x286xbf16> to vector<8x286xbf16>
    %cst_41 = arith.constant dense<0.000000e+00> : vector<8x286xf32>
    %45 = tpu.matmul %42, %44, %cst_41 {dimension_numbers = #tpu.dot_dimension_numbers<[1], [0], [0], [1], [0, 0, 1, 1], [], []>} : vector<8x8xbf16>, vector<8x286xbf16>, vector<8x286xf32> -> vector<8x286xf32>
    %46 = arith.addf %40, %45 : vector<8x286xf32>
    %c7 = arith.constant 7 : index
    %c0_42 = arith.constant 0 : index
    %c0_43 = arith.constant 0 : index
    %47 = vector.load %arg2[%c7, %c0_42, %c0_43] : memref<9x8x8xbf16, #tpu.memory_space<vmem>>, vector<1x8x8xbf16>
    %48 = vector.shape_cast %47 : vector<1x8x8xbf16> to vector<8x8xbf16>
    %c0_44 = arith.constant 0 : index
    %c0_45 = arith.constant 0 : index
    %c37 = arith.constant 37 : index
    %49 = vector.load %arg3[%c0_44, %c0_45, %c37] : memref<1x8x384xbf16, #tpu.memory_space<vmem>>, vector<1x8x286xbf16>
    %50 = vector.shape_cast %49 : vector<1x8x286xbf16> to vector<8x286xbf16>
    %cst_46 = arith.constant dense<0.000000e+00> : vector<8x286xf32>
    %51 = tpu.matmul %48, %50, %cst_46 {dimension_numbers = #tpu.dot_dimension_numbers<[1], [0], [0], [1], [0, 0, 1, 1], [], []>} : vector<8x8xbf16>, vector<8x286xbf16>, vector<8x286xf32> -> vector<8x286xf32>
    %52 = arith.addf %46, %51 : vector<8x286xf32>
    %c8 = arith.constant 8 : index
    %c0_47 = arith.constant 0 : index
    %c0_48 = arith.constant 0 : index
    %53 = vector.load %arg2[%c8, %c0_47, %c0_48] : memref<9x8x8xbf16, #tpu.memory_space<vmem>>, vector<1x8x8xbf16>
    %54 = vector.shape_cast %53 : vector<1x8x8xbf16> to vector<8x8xbf16>
    %c0_49 = arith.constant 0 : index
    %c0_50 = arith.constant 0 : index
    %c38 = arith.constant 38 : index
    %55 = vector.load %arg3[%c0_49, %c0_50, %c38] : memref<1x8x384xbf16, #tpu.memory_space<vmem>>, vector<1x8x286xbf16>
    %56 = vector.shape_cast %55 : vector<1x8x286xbf16> to vector<8x286xbf16>
    %cst_51 = arith.constant dense<0.000000e+00> : vector<8x286xf32>
    %57 = tpu.matmul %54, %56, %cst_51 {dimension_numbers = #tpu.dot_dimension_numbers<[1], [0], [0], [1], [0, 0, 1, 1], [], []>} : vector<8x8xbf16>, vector<8x286xbf16>, vector<8x286xf32> -> vector<8x286xf32>
    %58 = arith.addf %52, %57 : vector<8x286xf32>
    %c0_52 = arith.constant 0 : index
    %c0_53 = arith.constant 0 : index
    %59 = vector.load %arg4[%c0_52, %c0_53] : memref<8x1xf32, #tpu.memory_space<vmem>>, vector<8x1xf32>
    %60 = vector.broadcast %59 : vector<8x1xf32> to vector<8x286xf32>
    %61 = arith.addf %58, %60 : vector<8x286xf32>
    %c0_54 = arith.constant 0 : index
    %c0_55 = arith.constant 0 : index
    %62 = vector.load %arg5[%c0_54, %c0_55] : memref<1x286xf32, #tpu.memory_space<vmem>>, vector<1x286xf32>
    %63 = vector.broadcast %62 : vector<1x286xf32> to vector<8x286xf32>
    %64 = arith.mulf %61, %63 : vector<8x286xf32>
    %65 = arith.truncf %64 : vector<8x286xf32> to vector<8x286xbf16>
    %c0_56 = arith.constant 0 : index
    %c0_57 = arith.constant 0 : index
    %c19_58 = arith.constant 19 : index
    %66 = vector.load %arg6[%c0_56, %c0_57, %c19_58] : memref<1x8x384xbf16, #tpu.memory_space<vmem>>, vector<1x8x286xbf16>
    %67 = vector.shape_cast %66 : vector<1x8x286xbf16> to vector<8x286xbf16>
    %68 = vector.shape_cast %65 : vector<8x286xbf16> to vector<1x8x286xbf16>
    tpu.vector_store %arg6[%c0_56, %c0_57, %c19_58], %68 {strides = array<i32>} : memref<1x8x384xbf16, #tpu.memory_space<vmem>>, vector<1x8x286xbf16>,
    return
  }
  func.func @transform_0(%arg0: i32, %arg1: i32) -> (i32, i32, i32) {
    %c0_i32 = arith.constant 0 : i32
    %c0_i32_0 = arith.constant 0 : i32
    %c0_i32_1 = arith.constant 0 : i32
    return %c0_i32, %arg1, %c0_i32_0 : i32, i32, i32
  }
  func.func @transform_1(%arg0: i32, %arg1: i32) -> (i32, i32, i32) {
    %c0_i32 = arith.constant 0 : i32
    %c0_i32_0 = arith.constant 0 : i32
    %c0_i32_1 = arith.constant 0 : i32
    return %arg0, %c0_i32, %c0_i32_0 : i32, i32, i32
  }
  func.func @transform_2(%arg0: i32, %arg1: i32) -> (i32, i32) {
    %c0_i32 = arith.constant 0 : i32
    %c0_i32_0 = arith.constant 0 : i32
    return %arg1, %c0_i32 : i32, i32
  }
  func.func @transform_3(%arg0: i32, %arg1: i32) -> (i32, i32) {
    %c0_i32 = arith.constant 0 : i32
    %c0_i32_0 = arith.constant 0 : i32
    %c0_i32_1 = arith.constant 0 : i32
    return %c0_i32, %c0_i32_0 : i32, i32
  }
  func.func @transform_4(%arg0: i32, %arg1: i32) -> (i32, i32, i32) {
    %c0_i32 = arith.constant 0 : i32
    %c0_i32_0 = arith.constant 0 : i32
    return %arg0, %arg1, %c0_i32 : i32, i32, i32
  }
}

module attributes {stable_mosaic.version = 11 : i64} {
  func.func @_conv_kernel(%arg0: i32, %arg1: i32, %arg2: memref<9x16x16xbf16, #tpu.memory_space<vmem>>, %arg3: memref<1x16x384xbf16, #tpu.memory_space<vmem>>, %arg4: memref<16x1xf32, #tpu.memory_space<vmem>>, %arg5: memref<1x286xf32, #tpu.memory_space<vmem>>, %arg6: memref<1x16x384xbf16, #tpu.memory_space<vmem>>) attributes {dimension_semantics = [#tpu.dimension_semantics<parallel>, #tpu.dimension_semantics<parallel>], iteration_bounds = array<i64: 2, 2>, scalar_prefetch = 0 : i64, scratch_operands = 0 : i64, tpu.core_type = #tpu.core_type<tc>, window_params = [{transform_indices = @transform_0, window_bounds = array<i64: 9, 16, 16>}, {transform_indices = @transform_1, window_bounds = array<i64: 1, 16, 384>}, {transform_indices = @transform_2, window_bounds = array<i64: 16, 1>}, {pipeline_mode = #tpu.pipeline_mode<synchronous>, transform_indices = @transform_3, window_bounds = array<i64: 1, 286>}, {transform_indices = @transform_4, window_bounds = array<i64: 1, 16, 384>}]} {
    %cst = arith.constant 0.000000e+00 : bf16
    %0 = vector.broadcast %cst : bf16 to vector<16x384xbf16>
    %c0 = arith.constant 0 : index
    %c0_0 = arith.constant 0 : index
    %c0_1 = arith.constant 0 : index
    %1 = vector.load %arg6[%c0, %c0_0, %c0_1] : memref<1x16x384xbf16, #tpu.memory_space<vmem>>, vector<1x16x384xbf16>
    %2 = vector.shape_cast %1 : vector<1x16x384xbf16> to vector<16x384xbf16>
    %3 = vector.shape_cast %0 : vector<16x384xbf16> to vector<1x16x384xbf16>
    tpu.vector_store %arg6[%c0, %c0_0, %c0_1], %3 {strides = array<i32>} : memref<1x16x384xbf16, #tpu.memory_space<vmem>>, vector<1x16x384xbf16>,
    %cst_2 = arith.constant 0.000000e+00 : f32
    %4 = vector.broadcast %cst_2 : f32 to vector<16x286xf32>
    %c0_3 = arith.constant 0 : index
    %c0_4 = arith.constant 0 : index
    %c0_5 = arith.constant 0 : index
    %5 = vector.load %arg2[%c0_3, %c0_4, %c0_5] : memref<9x16x16xbf16, #tpu.memory_space<vmem>>, vector<1x16x16xbf16>
    %6 = vector.shape_cast %5 : vector<1x16x16xbf16> to vector<16x16xbf16>
    %c0_6 = arith.constant 0 : index
    %c0_7 = arith.constant 0 : index
    %c0_8 = arith.constant 0 : index
    %7 = vector.load %arg3[%c0_6, %c0_7, %c0_8] : memref<1x16x384xbf16, #tpu.memory_space<vmem>>, vector<1x16x286xbf16>
    %8 = vector.shape_cast %7 : vector<1x16x286xbf16> to vector<16x286xbf16>
    %cst_9 = arith.constant dense<0.000000e+00> : vector<16x286xf32>
    %9 = tpu.matmul %6, %8, %cst_9 {dimension_numbers = #tpu.dot_dimension_numbers<[1], [0], [0], [1], [0, 0, 1, 1], [], []>} : vector<16x16xbf16>, vector<16x286xbf16>, vector<16x286xf32> -> vector<16x286xf32>
    %10 = arith.addf %4, %9 : vector<16x286xf32>
    %c1 = arith.constant 1 : index
    %c0_10 = arith.constant 0 : index
    %c0_11 = arith.constant 0 : index
    %11 = vector.load %arg2[%c1, %c0_10, %c0_11] : memref<9x16x16xbf16, #tpu.memory_space<vmem>>, vector<1x16x16xbf16>
    %12 = vector.shape_cast %11 : vector<1x16x16xbf16> to vector<16x16xbf16>
    %c0_12 = arith.constant 0 : index
    %c0_13 = arith.constant 0 : index
    %c1_14 = arith.constant 1 : index
    %13 = vector.load %arg3[%c0_12, %c0_13, %c1_14] : memref<1x16x384xbf16, #tpu.memory_space<vmem>>, vector<1x16x286xbf16>
    %14 = vector.shape_cast %13 : vector<1x16x286xbf16> to vector<16x286xbf16>
    %cst_15 = arith.constant dense<0.000000e+00> : vector<16x286xf32>
    %15 = tpu.matmul %12, %14, %cst_15 {dimension_numbers = #tpu.dot_dimension_numbers<[1], [0], [0], [1], [0, 0, 1, 1], [], []>} : vector<16x16xbf16>, vector<16x286xbf16>, vector<16x286xf32> -> vector<16x286xf32>
    %16 = arith.addf %10, %15 : vector<16x286xf32>
    %c2 = arith.constant 2 : index
    %c0_16 = arith.constant 0 : index
    %c0_17 = arith.constant 0 : index
    %17 = vector.load %arg2[%c2, %c0_16, %c0_17] : memref<9x16x16xbf16, #tpu.memory_space<vmem>>, vector<1x16x16xbf16>
    %18 = vector.shape_cast %17 : vector<1x16x16xbf16> to vector<16x16xbf16>
    %c0_18 = arith.constant 0 : index
    %c0_19 = arith.constant 0 : index
    %c2_20 = arith.constant 2 : index
    %19 = vector.load %arg3[%c0_18, %c0_19, %c2_20] : memref<1x16x384xbf16, #tpu.memory_space<vmem>>, vector<1x16x286xbf16>
    %20 = vector.shape_cast %19 : vector<1x16x286xbf16> to vector<16x286xbf16>
    %cst_21 = arith.constant dense<0.000000e+00> : vector<16x286xf32>
    %21 = tpu.matmul %18, %20, %cst_21 {dimension_numbers = #tpu.dot_dimension_numbers<[1], [0], [0], [1], [0, 0, 1, 1], [], []>} : vector<16x16xbf16>, vector<16x286xbf16>, vector<16x286xf32> -> vector<16x286xf32>
    %22 = arith.addf %16, %21 : vector<16x286xf32>
    %c3 = arith.constant 3 : index
    %c0_22 = arith.constant 0 : index
    %c0_23 = arith.constant 0 : index
    %23 = vector.load %arg2[%c3, %c0_22, %c0_23] : memref<9x16x16xbf16, #tpu.memory_space<vmem>>, vector<1x16x16xbf16>
    %24 = vector.shape_cast %23 : vector<1x16x16xbf16> to vector<16x16xbf16>
    %c0_24 = arith.constant 0 : index
    %c0_25 = arith.constant 0 : index
    %c18 = arith.constant 18 : index
    %25 = vector.load %arg3[%c0_24, %c0_25, %c18] : memref<1x16x384xbf16, #tpu.memory_space<vmem>>, vector<1x16x286xbf16>
    %26 = vector.shape_cast %25 : vector<1x16x286xbf16> to vector<16x286xbf16>
    %cst_26 = arith.constant dense<0.000000e+00> : vector<16x286xf32>
    %27 = tpu.matmul %24, %26, %cst_26 {dimension_numbers = #tpu.dot_dimension_numbers<[1], [0], [0], [1], [0, 0, 1, 1], [], []>} : vector<16x16xbf16>, vector<16x286xbf16>, vector<16x286xf32> -> vector<16x286xf32>
    %28 = arith.addf %22, %27 : vector<16x286xf32>
    %c4 = arith.constant 4 : index
    %c0_27 = arith.constant 0 : index
    %c0_28 = arith.constant 0 : index
    %29 = vector.load %arg2[%c4, %c0_27, %c0_28] : memref<9x16x16xbf16, #tpu.memory_space<vmem>>, vector<1x16x16xbf16>
    %30 = vector.shape_cast %29 : vector<1x16x16xbf16> to vector<16x16xbf16>
    %c0_29 = arith.constant 0 : index
    %c0_30 = arith.constant 0 : index
    %c19 = arith.constant 19 : index
    %31 = vector.load %arg3[%c0_29, %c0_30, %c19] : memref<1x16x384xbf16, #tpu.memory_space<vmem>>, vector<1x16x286xbf16>
    %32 = vector.shape_cast %31 : vector<1x16x286xbf16> to vector<16x286xbf16>
    %cst_31 = arith.constant dense<0.000000e+00> : vector<16x286xf32>
    %33 = tpu.matmul %30, %32, %cst_31 {dimension_numbers = #tpu.dot_dimension_numbers<[1], [0], [0], [1], [0, 0, 1, 1], [], []>} : vector<16x16xbf16>, vector<16x286xbf16>, vector<16x286xf32> -> vector<16x286xf32>
    %34 = arith.addf %28, %33 : vector<16x286xf32>
    %c5 = arith.constant 5 : index
    %c0_32 = arith.constant 0 : index
    %c0_33 = arith.constant 0 : index
    %35 = vector.load %arg2[%c5, %c0_32, %c0_33] : memref<9x16x16xbf16, #tpu.memory_space<vmem>>, vector<1x16x16xbf16>
    %36 = vector.shape_cast %35 : vector<1x16x16xbf16> to vector<16x16xbf16>
    %c0_34 = arith.constant 0 : index
    %c0_35 = arith.constant 0 : index
    %c20 = arith.constant 20 : index
    %37 = vector.load %arg3[%c0_34, %c0_35, %c20] : memref<1x16x384xbf16, #tpu.memory_space<vmem>>, vector<1x16x286xbf16>
    %38 = vector.shape_cast %37 : vector<1x16x286xbf16> to vector<16x286xbf16>
    %cst_36 = arith.constant dense<0.000000e+00> : vector<16x286xf32>
    %39 = tpu.matmul %36, %38, %cst_36 {dimension_numbers = #tpu.dot_dimension_numbers<[1], [0], [0], [1], [0, 0, 1, 1], [], []>} : vector<16x16xbf16>, vector<16x286xbf16>, vector<16x286xf32> -> vector<16x286xf32>
    %40 = arith.addf %34, %39 : vector<16x286xf32>
    %c6 = arith.constant 6 : index
    %c0_37 = arith.constant 0 : index
    %c0_38 = arith.constant 0 : index
    %41 = vector.load %arg2[%c6, %c0_37, %c0_38] : memref<9x16x16xbf16, #tpu.memory_space<vmem>>, vector<1x16x16xbf16>
    %42 = vector.shape_cast %41 : vector<1x16x16xbf16> to vector<16x16xbf16>
    %c0_39 = arith.constant 0 : index
    %c0_40 = arith.constant 0 : index
    %c36 = arith.constant 36 : index
    %43 = vector.load %arg3[%c0_39, %c0_40, %c36] : memref<1x16x384xbf16, #tpu.memory_space<vmem>>, vector<1x16x286xbf16>
    %44 = vector.shape_cast %43 : vector<1x16x286xbf16> to vector<16x286xbf16>
    %cst_41 = arith.constant dense<0.000000e+00> : vector<16x286xf32>
    %45 = tpu.matmul %42, %44, %cst_41 {dimension_numbers = #tpu.dot_dimension_numbers<[1], [0], [0], [1], [0, 0, 1, 1], [], []>} : vector<16x16xbf16>, vector<16x286xbf16>, vector<16x286xf32> -> vector<16x286xf32>
    %46 = arith.addf %40, %45 : vector<16x286xf32>
    %c7 = arith.constant 7 : index
    %c0_42 = arith.constant 0 : index
    %c0_43 = arith.constant 0 : index
    %47 = vector.load %arg2[%c7, %c0_42, %c0_43] : memref<9x16x16xbf16, #tpu.memory_space<vmem>>, vector<1x16x16xbf16>
    %48 = vector.shape_cast %47 : vector<1x16x16xbf16> to vector<16x16xbf16>
    %c0_44 = arith.constant 0 : index
    %c0_45 = arith.constant 0 : index
    %c37 = arith.constant 37 : index
    %49 = vector.load %arg3[%c0_44, %c0_45, %c37] : memref<1x16x384xbf16, #tpu.memory_space<vmem>>, vector<1x16x286xbf16>
    %50 = vector.shape_cast %49 : vector<1x16x286xbf16> to vector<16x286xbf16>
    %cst_46 = arith.constant dense<0.000000e+00> : vector<16x286xf32>
    %51 = tpu.matmul %48, %50, %cst_46 {dimension_numbers = #tpu.dot_dimension_numbers<[1], [0], [0], [1], [0, 0, 1, 1], [], []>} : vector<16x16xbf16>, vector<16x286xbf16>, vector<16x286xf32> -> vector<16x286xf32>
    %52 = arith.addf %46, %51 : vector<16x286xf32>
    %c8 = arith.constant 8 : index
    %c0_47 = arith.constant 0 : index
    %c0_48 = arith.constant 0 : index
    %53 = vector.load %arg2[%c8, %c0_47, %c0_48] : memref<9x16x16xbf16, #tpu.memory_space<vmem>>, vector<1x16x16xbf16>
    %54 = vector.shape_cast %53 : vector<1x16x16xbf16> to vector<16x16xbf16>
    %c0_49 = arith.constant 0 : index
    %c0_50 = arith.constant 0 : index
    %c38 = arith.constant 38 : index
    %55 = vector.load %arg3[%c0_49, %c0_50, %c38] : memref<1x16x384xbf16, #tpu.memory_space<vmem>>, vector<1x16x286xbf16>
    %56 = vector.shape_cast %55 : vector<1x16x286xbf16> to vector<16x286xbf16>
    %cst_51 = arith.constant dense<0.000000e+00> : vector<16x286xf32>
    %57 = tpu.matmul %54, %56, %cst_51 {dimension_numbers = #tpu.dot_dimension_numbers<[1], [0], [0], [1], [0, 0, 1, 1], [], []>} : vector<16x16xbf16>, vector<16x286xbf16>, vector<16x286xf32> -> vector<16x286xf32>
    %58 = arith.addf %52, %57 : vector<16x286xf32>
    %c0_52 = arith.constant 0 : index
    %c0_53 = arith.constant 0 : index
    %59 = vector.load %arg4[%c0_52, %c0_53] : memref<16x1xf32, #tpu.memory_space<vmem>>, vector<16x1xf32>
    %60 = vector.broadcast %59 : vector<16x1xf32> to vector<16x286xf32>
    %61 = arith.addf %58, %60 : vector<16x286xf32>
    %c0_54 = arith.constant 0 : index
    %c0_55 = arith.constant 0 : index
    %62 = vector.load %arg5[%c0_54, %c0_55] : memref<1x286xf32, #tpu.memory_space<vmem>>, vector<1x286xf32>
    %63 = vector.broadcast %62 : vector<1x286xf32> to vector<16x286xf32>
    %64 = arith.mulf %61, %63 : vector<16x286xf32>
    %65 = arith.truncf %64 : vector<16x286xf32> to vector<16x286xbf16>
    %c0_56 = arith.constant 0 : index
    %c0_57 = arith.constant 0 : index
    %c19_58 = arith.constant 19 : index
    %66 = vector.load %arg6[%c0_56, %c0_57, %c19_58] : memref<1x16x384xbf16, #tpu.memory_space<vmem>>, vector<1x16x286xbf16>
    %67 = vector.shape_cast %66 : vector<1x16x286xbf16> to vector<16x286xbf16>
    %68 = vector.shape_cast %65 : vector<16x286xbf16> to vector<1x16x286xbf16>
    tpu.vector_store %arg6[%c0_56, %c0_57, %c19_58], %68 {strides = array<i32>} : memref<1x16x384xbf16, #tpu.memory_space<vmem>>, vector<1x16x286xbf16>,
    return
  }
  func.func @transform_0(%arg0: i32, %arg1: i32) -> (i32, i32, i32) {
    %c0_i32 = arith.constant 0 : i32
    %c0_i32_0 = arith.constant 0 : i32
    %c0_i32_1 = arith.constant 0 : i32
    return %c0_i32, %arg1, %c0_i32_0 : i32, i32, i32
  }
  func.func @transform_1(%arg0: i32, %arg1: i32) -> (i32, i32, i32) {
    %c0_i32 = arith.constant 0 : i32
    %c0_i32_0 = arith.constant 0 : i32
    %c0_i32_1 = arith.constant 0 : i32
    return %arg0, %c0_i32, %c0_i32_0 : i32, i32, i32
  }
  func.func @transform_2(%arg0: i32, %arg1: i32) -> (i32, i32) {
    %c0_i32 = arith.constant 0 : i32
    %c0_i32_0 = arith.constant 0 : i32
    return %arg1, %c0_i32 : i32, i32
  }
  func.func @transform_3(%arg0: i32, %arg1: i32) -> (i32, i32) {
    %c0_i32 = arith.constant 0 : i32
    %c0_i32_0 = arith.constant 0 : i32
    %c0_i32_1 = arith.constant 0 : i32
    return %c0_i32, %c0_i32_0 : i32, i32
  }
  func.func @transform_4(%arg0: i32, %arg1: i32) -> (i32, i32, i32) {
    %c0_i32 = arith.constant 0 : i32
    %c0_i32_0 = arith.constant 0 : i32
    return %arg0, %arg1, %c0_i32 : i32, i32, i32
  }
}

module attributes {stable_mosaic.version = 11 : i64} {
  func.func @_bn_lrelu_kernel(%arg0: i32, %arg1: memref<2x16x384xbf16, #tpu.memory_space<vmem>>, %arg2: memref<1x16x1xf32, #tpu.memory_space<vmem>>, %arg3: memref<1x16x1xf32, #tpu.memory_space<vmem>>, %arg4: memref<1x1x384xf32, #tpu.memory_space<vmem>>, %arg5: memref<2x16x384xbf16, #tpu.memory_space<vmem>>) attributes {dimension_semantics = [#tpu.dimension_semantics<parallel>], iteration_bounds = array<i64: 2>, scalar_prefetch = 0 : i64, scratch_operands = 0 : i64, tpu.core_type = #tpu.core_type<tc>, window_params = [{transform_indices = @transform_0, window_bounds = array<i64: 2, 16, 384>}, {transform_indices = @transform_1, window_bounds = array<i64: 1, 16, 1>}, {transform_indices = @transform_2, window_bounds = array<i64: 1, 16, 1>}, {pipeline_mode = #tpu.pipeline_mode<synchronous>, transform_indices = @transform_3, window_bounds = array<i64: 1, 1, 384>}, {transform_indices = @transform_4, window_bounds = array<i64: 2, 16, 384>}]} {
    %c0 = arith.constant 0 : index
    %c0_0 = arith.constant 0 : index
    %c0_1 = arith.constant 0 : index
    %0 = vector.load %arg1[%c0, %c0_0, %c0_1] : memref<2x16x384xbf16, #tpu.memory_space<vmem>>, vector<2x16x384xbf16>
    %1 = arith.extf %0 : vector<2x16x384xbf16> to vector<2x16x384xf32>
    %cst = arith.constant dense<0.000000e+00> : vector<2x16xf32>
    %2 = vector.multi_reduction <add>, %1, %cst [2] : vector<2x16x384xf32> to vector<2x16xf32>
    %3 = vector.shape_cast %2 : vector<2x16xf32> to vector<2x16x1xf32>
    %cst_2 = arith.constant dense<0.000000e+00> : vector<16x1xf32>
    %4 = vector.multi_reduction <add>, %3, %cst_2 [0] : vector<2x16x1xf32> to vector<16x1xf32>
    %5 = vector.shape_cast %4 : vector<16x1xf32> to vector<1x16x1xf32>
    %6 = arith.mulf %1, %1 : vector<2x16x384xf32>
    %cst_3 = arith.constant dense<0.000000e+00> : vector<2x16xf32>
    %7 = vector.multi_reduction <add>, %6, %cst_3 [2] : vector<2x16x384xf32> to vector<2x16xf32>
    %8 = vector.shape_cast %7 : vector<2x16xf32> to vector<2x16x1xf32>
    %cst_4 = arith.constant dense<0.000000e+00> : vector<16x1xf32>
    %9 = vector.multi_reduction <add>, %8, %cst_4 [0] : vector<2x16x1xf32> to vector<16x1xf32>
    %10 = vector.shape_cast %9 : vector<16x1xf32> to vector<1x16x1xf32>
    %cst_5 = arith.constant 0.001953125 : f32
    %11 = vector.broadcast %cst_5 : f32 to vector<1x16x1xf32>
    %12 = arith.mulf %5, %11 : vector<1x16x1xf32>
    %cst_6 = arith.constant 0.001953125 : f32
    %13 = vector.broadcast %cst_6 : f32 to vector<1x16x1xf32>
    %14 = arith.mulf %10, %13 : vector<1x16x1xf32>
    %15 = arith.mulf %12, %12 : vector<1x16x1xf32>
    %16 = arith.subf %14, %15 : vector<1x16x1xf32>
    %cst_7 = arith.constant 0.000000e+00 : f32
    %17 = vector.broadcast %cst_7 : f32 to vector<1x16x1xf32>
    %18 = arith.maximumf %16, %17 : vector<1x16x1xf32>
    %c0_8 = arith.constant 0 : index
    %c0_9 = arith.constant 0 : index
    %c0_10 = arith.constant 0 : index
    %19 = vector.load %arg2[%c0_8, %c0_9, %c0_10] : memref<1x16x1xf32, #tpu.memory_space<vmem>>, vector<1x16x1xf32>
    %cst_11 = arith.constant 9.99999974E-6 : f32
    %20 = vector.broadcast %cst_11 : f32 to vector<1x16x1xf32>
    %21 = arith.addf %18, %20 : vector<1x16x1xf32>
    %22 = math.rsqrt %21 : vector<1x16x1xf32>
    %23 = arith.mulf %19, %22 : vector<1x16x1xf32>
    %c0_12 = arith.constant 0 : index
    %c0_13 = arith.constant 0 : index
    %c0_14 = arith.constant 0 : index
    %24 = vector.load %arg3[%c0_12, %c0_13, %c0_14] : memref<1x16x1xf32, #tpu.memory_space<vmem>>, vector<1x16x1xf32>
    %25 = arith.mulf %12, %23 : vector<1x16x1xf32>
    %26 = arith.subf %24, %25 : vector<1x16x1xf32>
    %27 = vector.broadcast %23 : vector<1x16x1xf32> to vector<2x16x384xf32>
    %28 = arith.mulf %1, %27 : vector<2x16x384xf32>
    %29 = vector.broadcast %26 : vector<1x16x1xf32> to vector<2x16x384xf32>
    %30 = arith.addf %28, %29 : vector<2x16x384xf32>
    %c0_15 = arith.constant 0 : index
    %c0_16 = arith.constant 0 : index
    %c0_17 = arith.constant 0 : index
    %31 = vector.load %arg4[%c0_15, %c0_16, %c0_17] : memref<1x1x384xf32, #tpu.memory_space<vmem>>, vector<1x1x384xf32>
    %32 = vector.broadcast %31 : vector<1x1x384xf32> to vector<2x16x384xf32>
    %33 = arith.mulf %30, %32 : vector<2x16x384xf32>
    %34 = arith.truncf %33 : vector<2x16x384xf32> to vector<2x16x384xbf16>
    %c0_18 = arith.constant 0 : index
    %c0_19 = arith.constant 0 : index
    %c0_20 = arith.constant 0 : index
    %35 = vector.load %arg5[%c0_18, %c0_19, %c0_20] : memref<2x16x384xbf16, #tpu.memory_space<vmem>>, vector<2x16x384xbf16>
    tpu.vector_store %arg5[%c0_18, %c0_19, %c0_20], %34 {strides = array<i32>} : memref<2x16x384xbf16, #tpu.memory_space<vmem>>, vector<2x16x384xbf16>,
    return
  }
  func.func @transform_0(%arg0: i32) -> (i32, i32, i32) {
    %c0_i32 = arith.constant 0 : i32
    %c0_i32_0 = arith.constant 0 : i32
    %c0_i32_1 = arith.constant 0 : i32
    return %c0_i32, %arg0, %c0_i32_0 : i32, i32, i32
  }
  func.func @transform_1(%arg0: i32) -> (i32, i32, i32) {
    %c0_i32 = arith.constant 0 : i32
    %c0_i32_0 = arith.constant 0 : i32
    %c0_i32_1 = arith.constant 0 : i32
    return %c0_i32, %arg0, %c0_i32_0 : i32, i32, i32
  }
  func.func @transform_2(%arg0: i32) -> (i32, i32, i32) {
    %c0_i32 = arith.constant 0 : i32
    %c0_i32_0 = arith.constant 0 : i32
    %c0_i32_1 = arith.constant 0 : i32
    return %c0_i32, %arg0, %c0_i32_0 : i32, i32, i32
  }
  func.func @transform_3(%arg0: i32) -> (i32, i32, i32) {
    %c0_i32 = arith.constant 0 : i32
    %c0_i32_0 = arith.constant 0 : i32
    %c0_i32_1 = arith.constant 0 : i32
    %c0_i32_2 = arith.constant 0 : i32
    return %c0_i32, %c0_i32_0, %c0_i32_1 : i32, i32, i32
  }
  func.func @transform_4(%arg0: i32) -> (i32, i32, i32) {
    %c0_i32 = arith.constant 0 : i32
    %c0_i32_0 = arith.constant 0 : i32
    %c0_i32_1 = arith.constant 0 : i32
    return %c0_i32, %arg0, %c0_i32_0 : i32, i32, i32
  }
}

module attributes {stable_mosaic.version = 11 : i64} {
  func.func @_bn_lrelu_kernel(%arg0: i32, %arg1: memref<2x8x128xbf16, #tpu.memory_space<vmem>>, %arg2: memref<1x8x1xf32, #tpu.memory_space<vmem>>, %arg3: memref<1x8x1xf32, #tpu.memory_space<vmem>>, %arg4: memref<1x1x128xf32, #tpu.memory_space<vmem>>, %arg5: memref<2x8x128xf32, #tpu.memory_space<vmem>>) attributes {dimension_semantics = [#tpu.dimension_semantics<parallel>], iteration_bounds = array<i64: 1>, scalar_prefetch = 0 : i64, scratch_operands = 0 : i64, tpu.core_type = #tpu.core_type<tc>, window_params = [{transform_indices = @transform_0, window_bounds = array<i64: 2, 8, 128>}, {transform_indices = @transform_1, window_bounds = array<i64: 1, 8, 1>}, {transform_indices = @transform_2, window_bounds = array<i64: 1, 8, 1>}, {pipeline_mode = #tpu.pipeline_mode<synchronous>, transform_indices = @transform_3, window_bounds = array<i64: 1, 1, 128>}, {transform_indices = @transform_4, window_bounds = array<i64: 2, 8, 128>}]} {
    %c0 = arith.constant 0 : index
    %c0_0 = arith.constant 0 : index
    %c0_1 = arith.constant 0 : index
    %0 = vector.load %arg1[%c0, %c0_0, %c0_1] : memref<2x8x128xbf16, #tpu.memory_space<vmem>>, vector<2x8x128xbf16>
    %1 = arith.extf %0 : vector<2x8x128xbf16> to vector<2x8x128xf32>
    %cst = arith.constant dense<0.000000e+00> : vector<2x8xf32>
    %2 = vector.multi_reduction <add>, %1, %cst [2] : vector<2x8x128xf32> to vector<2x8xf32>
    %3 = vector.shape_cast %2 : vector<2x8xf32> to vector<2x8x1xf32>
    %cst_2 = arith.constant dense<0.000000e+00> : vector<8x1xf32>
    %4 = vector.multi_reduction <add>, %3, %cst_2 [0] : vector<2x8x1xf32> to vector<8x1xf32>
    %5 = vector.shape_cast %4 : vector<8x1xf32> to vector<1x8x1xf32>
    %6 = arith.mulf %1, %1 : vector<2x8x128xf32>
    %cst_3 = arith.constant dense<0.000000e+00> : vector<2x8xf32>
    %7 = vector.multi_reduction <add>, %6, %cst_3 [2] : vector<2x8x128xf32> to vector<2x8xf32>
    %8 = vector.shape_cast %7 : vector<2x8xf32> to vector<2x8x1xf32>
    %cst_4 = arith.constant dense<0.000000e+00> : vector<8x1xf32>
    %9 = vector.multi_reduction <add>, %8, %cst_4 [0] : vector<2x8x1xf32> to vector<8x1xf32>
    %10 = vector.shape_cast %9 : vector<8x1xf32> to vector<1x8x1xf32>
    %cst_5 = arith.constant 7.812500e-03 : f32
    %11 = vector.broadcast %cst_5 : f32 to vector<1x8x1xf32>
    %12 = arith.mulf %5, %11 : vector<1x8x1xf32>
    %cst_6 = arith.constant 7.812500e-03 : f32
    %13 = vector.broadcast %cst_6 : f32 to vector<1x8x1xf32>
    %14 = arith.mulf %10, %13 : vector<1x8x1xf32>
    %15 = arith.mulf %12, %12 : vector<1x8x1xf32>
    %16 = arith.subf %14, %15 : vector<1x8x1xf32>
    %cst_7 = arith.constant 0.000000e+00 : f32
    %17 = vector.broadcast %cst_7 : f32 to vector<1x8x1xf32>
    %18 = arith.maximumf %16, %17 : vector<1x8x1xf32>
    %c0_8 = arith.constant 0 : index
    %c0_9 = arith.constant 0 : index
    %c0_10 = arith.constant 0 : index
    %19 = vector.load %arg2[%c0_8, %c0_9, %c0_10] : memref<1x8x1xf32, #tpu.memory_space<vmem>>, vector<1x8x1xf32>
    %cst_11 = arith.constant 9.99999974E-6 : f32
    %20 = vector.broadcast %cst_11 : f32 to vector<1x8x1xf32>
    %21 = arith.addf %18, %20 : vector<1x8x1xf32>
    %22 = math.rsqrt %21 : vector<1x8x1xf32>
    %23 = arith.mulf %19, %22 : vector<1x8x1xf32>
    %c0_12 = arith.constant 0 : index
    %c0_13 = arith.constant 0 : index
    %c0_14 = arith.constant 0 : index
    %24 = vector.load %arg3[%c0_12, %c0_13, %c0_14] : memref<1x8x1xf32, #tpu.memory_space<vmem>>, vector<1x8x1xf32>
    %25 = arith.mulf %12, %23 : vector<1x8x1xf32>
    %26 = arith.subf %24, %25 : vector<1x8x1xf32>
    %27 = vector.broadcast %23 : vector<1x8x1xf32> to vector<2x8x128xf32>
    %28 = arith.mulf %1, %27 : vector<2x8x128xf32>
    %29 = vector.broadcast %26 : vector<1x8x1xf32> to vector<2x8x128xf32>
    %30 = arith.addf %28, %29 : vector<2x8x128xf32>
    %cst_15 = arith.constant 0.000000e+00 : f32
    %31 = vector.broadcast %cst_15 : f32 to vector<2x8x128xf32>
    %32 = arith.cmpf oge, %30, %31 : vector<2x8x128xf32>
    %cst_16 = arith.constant 0.00999999977 : f32
    %33 = vector.broadcast %cst_16 : f32 to vector<2x8x128xf32>
    %34 = arith.mulf %33, %30 : vector<2x8x128xf32>
    %35 = arith.select %32, %30, %34 : vector<2x8x128xi1>, vector<2x8x128xf32>
    %c0_17 = arith.constant 0 : index
    %c0_18 = arith.constant 0 : index
    %c0_19 = arith.constant 0 : index
    %36 = vector.load %arg4[%c0_17, %c0_18, %c0_19] : memref<1x1x128xf32, #tpu.memory_space<vmem>>, vector<1x1x128xf32>
    %37 = vector.broadcast %36 : vector<1x1x128xf32> to vector<2x8x128xf32>
    %38 = arith.mulf %35, %37 : vector<2x8x128xf32>
    %c0_20 = arith.constant 0 : index
    %c0_21 = arith.constant 0 : index
    %c0_22 = arith.constant 0 : index
    %39 = vector.load %arg5[%c0_20, %c0_21, %c0_22] : memref<2x8x128xf32, #tpu.memory_space<vmem>>, vector<2x8x128xf32>
    tpu.vector_store %arg5[%c0_20, %c0_21, %c0_22], %38 {strides = array<i32>} : memref<2x8x128xf32, #tpu.memory_space<vmem>>, vector<2x8x128xf32>,
    return
  }
  func.func @transform_0(%arg0: i32) -> (i32, i32, i32) {
    %c0_i32 = arith.constant 0 : i32
    %c0_i32_0 = arith.constant 0 : i32
    %c0_i32_1 = arith.constant 0 : i32
    return %c0_i32, %arg0, %c0_i32_0 : i32, i32, i32
  }
  func.func @transform_1(%arg0: i32) -> (i32, i32, i32) {
    %c0_i32 = arith.constant 0 : i32
    %c0_i32_0 = arith.constant 0 : i32
    %c0_i32_1 = arith.constant 0 : i32
    return %c0_i32, %arg0, %c0_i32_0 : i32, i32, i32
  }
  func.func @transform_2(%arg0: i32) -> (i32, i32, i32) {
    %c0_i32 = arith.constant 0 : i32
    %c0_i32_0 = arith.constant 0 : i32
    %c0_i32_1 = arith.constant 0 : i32
    return %c0_i32, %arg0, %c0_i32_0 : i32, i32, i32
  }
  func.func @transform_3(%arg0: i32) -> (i32, i32, i32) {
    %c0_i32 = arith.constant 0 : i32
    %c0_i32_0 = arith.constant 0 : i32
    %c0_i32_1 = arith.constant 0 : i32
    %c0_i32_2 = arith.constant 0 : i32
    return %c0_i32, %c0_i32_0, %c0_i32_1 : i32, i32, i32
  }
  func.func @transform_4(%arg0: i32) -> (i32, i32, i32) {
    %c0_i32 = arith.constant 0 : i32
    %c0_i32_0 = arith.constant 0 : i32
    %c0_i32_1 = arith.constant 0 : i32
    return %c0_i32, %arg0, %c0_i32_0 : i32, i32, i32
  }
}

module attributes {stable_mosaic.version = 11 : i64} {
  func.func @_conv_kernel(%arg0: i32, %arg1: i32, %arg2: memref<9x8x32xbf16, #tpu.memory_space<vmem>>, %arg3: memref<1x32x128xbf16, #tpu.memory_space<vmem>>, %arg4: memref<8x1xf32, #tpu.memory_space<vmem>>, %arg5: memref<1x78xf32, #tpu.memory_space<vmem>>, %arg6: memref<1x8x128xbf16, #tpu.memory_space<vmem>>) attributes {dimension_semantics = [#tpu.dimension_semantics<parallel>, #tpu.dimension_semantics<parallel>], iteration_bounds = array<i64: 2, 1>, scalar_prefetch = 0 : i64, scratch_operands = 0 : i64, tpu.core_type = #tpu.core_type<tc>, window_params = [{transform_indices = @transform_0, window_bounds = array<i64: 9, 8, 32>}, {transform_indices = @transform_1, window_bounds = array<i64: 1, 32, 128>}, {transform_indices = @transform_2, window_bounds = array<i64: 8, 1>}, {pipeline_mode = #tpu.pipeline_mode<synchronous>, transform_indices = @transform_3, window_bounds = array<i64: 1, 78>}, {transform_indices = @transform_4, window_bounds = array<i64: 1, 8, 128>}]} {
    %cst = arith.constant 0.000000e+00 : bf16
    %0 = vector.broadcast %cst : bf16 to vector<8x128xbf16>
    %c0 = arith.constant 0 : index
    %c0_0 = arith.constant 0 : index
    %c0_1 = arith.constant 0 : index
    %1 = vector.load %arg6[%c0, %c0_0, %c0_1] : memref<1x8x128xbf16, #tpu.memory_space<vmem>>, vector<1x8x128xbf16>
    %2 = vector.shape_cast %1 : vector<1x8x128xbf16> to vector<8x128xbf16>
    %3 = vector.shape_cast %0 : vector<8x128xbf16> to vector<1x8x128xbf16>
    tpu.vector_store %arg6[%c0, %c0_0, %c0_1], %3 {strides = array<i32>} : memref<1x8x128xbf16, #tpu.memory_space<vmem>>, vector<1x8x128xbf16>,
    %cst_2 = arith.constant 0.000000e+00 : f32
    %4 = vector.broadcast %cst_2 : f32 to vector<8x78xf32>
    %c0_3 = arith.constant 0 : index
    %c0_4 = arith.constant 0 : index
    %c0_5 = arith.constant 0 : index
    %5 = vector.load %arg2[%c0_3, %c0_4, %c0_5] : memref<9x8x32xbf16, #tpu.memory_space<vmem>>, vector<1x8x32xbf16>
    %6 = vector.shape_cast %5 : vector<1x8x32xbf16> to vector<8x32xbf16>
    %c0_6 = arith.constant 0 : index
    %c0_7 = arith.constant 0 : index
    %c0_8 = arith.constant 0 : index
    %7 = vector.load %arg3[%c0_6, %c0_7, %c0_8] : memref<1x32x128xbf16, #tpu.memory_space<vmem>>, vector<1x32x78xbf16>
    %8 = vector.shape_cast %7 : vector<1x32x78xbf16> to vector<32x78xbf16>
    %cst_9 = arith.constant dense<0.000000e+00> : vector<8x78xf32>
    %9 = tpu.matmul %6, %8, %cst_9 {dimension_numbers = #tpu.dot_dimension_numbers<[1], [0], [0], [1], [0, 0, 1, 1], [], []>} : vector<8x32xbf16>, vector<32x78xbf16>, vector<8x78xf32> -> vector<8x78xf32>
    %10 = arith.addf %4, %9 : vector<8x78xf32>
    %c1 = arith.constant 1 : index
    %c0_10 = arith.constant 0 : index
    %c0_11 = arith.constant 0 : index
    %11 = vector.load %arg2[%c1, %c0_10, %c0_11] : memref<9x8x32xbf16, #tpu.memory_space<vmem>>, vector<1x8x32xbf16>
    %12 = vector.shape_cast %11 : vector<1x8x32xbf16> to vector<8x32xbf16>
    %c0_12 = arith.constant 0 : index
    %c0_13 = arith.constant 0 : index
    %c1_14 = arith.constant 1 : index
    %13 = vector.load %arg3[%c0_12, %c0_13, %c1_14] : memref<1x32x128xbf16, #tpu.memory_space<vmem>>, vector<1x32x78xbf16>
    %14 = vector.shape_cast %13 : vector<1x32x78xbf16> to vector<32x78xbf16>
    %cst_15 = arith.constant dense<0.000000e+00> : vector<8x78xf32>
    %15 = tpu.matmul %12, %14, %cst_15 {dimension_numbers = #tpu.dot_dimension_numbers<[1], [0], [0], [1], [0, 0, 1, 1], [], []>} : vector<8x32xbf16>, vector<32x78xbf16>, vector<8x78xf32> -> vector<8x78xf32>
    %16 = arith.addf %10, %15 : vector<8x78xf32>
    %c2 = arith.constant 2 : index
    %c0_16 = arith.constant 0 : index
    %c0_17 = arith.constant 0 : index
    %17 = vector.load %arg2[%c2, %c0_16, %c0_17] : memref<9x8x32xbf16, #tpu.memory_space<vmem>>, vector<1x8x32xbf16>
    %18 = vector.shape_cast %17 : vector<1x8x32xbf16> to vector<8x32xbf16>
    %c0_18 = arith.constant 0 : index
    %c0_19 = arith.constant 0 : index
    %c2_20 = arith.constant 2 : index
    %19 = vector.load %arg3[%c0_18, %c0_19, %c2_20] : memref<1x32x128xbf16, #tpu.memory_space<vmem>>, vector<1x32x78xbf16>
    %20 = vector.shape_cast %19 : vector<1x32x78xbf16> to vector<32x78xbf16>
    %cst_21 = arith.constant dense<0.000000e+00> : vector<8x78xf32>
    %21 = tpu.matmul %18, %20, %cst_21 {dimension_numbers = #tpu.dot_dimension_numbers<[1], [0], [0], [1], [0, 0, 1, 1], [], []>} : vector<8x32xbf16>, vector<32x78xbf16>, vector<8x78xf32> -> vector<8x78xf32>
    %22 = arith.addf %16, %21 : vector<8x78xf32>
    %c3 = arith.constant 3 : index
    %c0_22 = arith.constant 0 : index
    %c0_23 = arith.constant 0 : index
    %23 = vector.load %arg2[%c3, %c0_22, %c0_23] : memref<9x8x32xbf16, #tpu.memory_space<vmem>>, vector<1x8x32xbf16>
    %24 = vector.shape_cast %23 : vector<1x8x32xbf16> to vector<8x32xbf16>
    %c0_24 = arith.constant 0 : index
    %c0_25 = arith.constant 0 : index
    %c10 = arith.constant 10 : index
    %25 = vector.load %arg3[%c0_24, %c0_25, %c10] : memref<1x32x128xbf16, #tpu.memory_space<vmem>>, vector<1x32x78xbf16>
    %26 = vector.shape_cast %25 : vector<1x32x78xbf16> to vector<32x78xbf16>
    %cst_26 = arith.constant dense<0.000000e+00> : vector<8x78xf32>
    %27 = tpu.matmul %24, %26, %cst_26 {dimension_numbers = #tpu.dot_dimension_numbers<[1], [0], [0], [1], [0, 0, 1, 1], [], []>} : vector<8x32xbf16>, vector<32x78xbf16>, vector<8x78xf32> -> vector<8x78xf32>
    %28 = arith.addf %22, %27 : vector<8x78xf32>
    %c4 = arith.constant 4 : index
    %c0_27 = arith.constant 0 : index
    %c0_28 = arith.constant 0 : index
    %29 = vector.load %arg2[%c4, %c0_27, %c0_28] : memref<9x8x32xbf16, #tpu.memory_space<vmem>>, vector<1x8x32xbf16>
    %30 = vector.shape_cast %29 : vector<1x8x32xbf16> to vector<8x32xbf16>
    %c0_29 = arith.constant 0 : index
    %c0_30 = arith.constant 0 : index
    %c11 = arith.constant 11 : index
    %31 = vector.load %arg3[%c0_29, %c0_30, %c11] : memref<1x32x128xbf16, #tpu.memory_space<vmem>>, vector<1x32x78xbf16>
    %32 = vector.shape_cast %31 : vector<1x32x78xbf16> to vector<32x78xbf16>
    %cst_31 = arith.constant dense<0.000000e+00> : vector<8x78xf32>
    %33 = tpu.matmul %30, %32, %cst_31 {dimension_numbers = #tpu.dot_dimension_numbers<[1], [0], [0], [1], [0, 0, 1, 1], [], []>} : vector<8x32xbf16>, vector<32x78xbf16>, vector<8x78xf32> -> vector<8x78xf32>
    %34 = arith.addf %28, %33 : vector<8x78xf32>
    %c5 = arith.constant 5 : index
    %c0_32 = arith.constant 0 : index
    %c0_33 = arith.constant 0 : index
    %35 = vector.load %arg2[%c5, %c0_32, %c0_33] : memref<9x8x32xbf16, #tpu.memory_space<vmem>>, vector<1x8x32xbf16>
    %36 = vector.shape_cast %35 : vector<1x8x32xbf16> to vector<8x32xbf16>
    %c0_34 = arith.constant 0 : index
    %c0_35 = arith.constant 0 : index
    %c12 = arith.constant 12 : index
    %37 = vector.load %arg3[%c0_34, %c0_35, %c12] : memref<1x32x128xbf16, #tpu.memory_space<vmem>>, vector<1x32x78xbf16>
    %38 = vector.shape_cast %37 : vector<1x32x78xbf16> to vector<32x78xbf16>
    %cst_36 = arith.constant dense<0.000000e+00> : vector<8x78xf32>
    %39 = tpu.matmul %36, %38, %cst_36 {dimension_numbers = #tpu.dot_dimension_numbers<[1], [0], [0], [1], [0, 0, 1, 1], [], []>} : vector<8x32xbf16>, vector<32x78xbf16>, vector<8x78xf32> -> vector<8x78xf32>
    %40 = arith.addf %34, %39 : vector<8x78xf32>
    %c6 = arith.constant 6 : index
    %c0_37 = arith.constant 0 : index
    %c0_38 = arith.constant 0 : index
    %41 = vector.load %arg2[%c6, %c0_37, %c0_38] : memref<9x8x32xbf16, #tpu.memory_space<vmem>>, vector<1x8x32xbf16>
    %42 = vector.shape_cast %41 : vector<1x8x32xbf16> to vector<8x32xbf16>
    %c0_39 = arith.constant 0 : index
    %c0_40 = arith.constant 0 : index
    %c20 = arith.constant 20 : index
    %43 = vector.load %arg3[%c0_39, %c0_40, %c20] : memref<1x32x128xbf16, #tpu.memory_space<vmem>>, vector<1x32x78xbf16>
    %44 = vector.shape_cast %43 : vector<1x32x78xbf16> to vector<32x78xbf16>
    %cst_41 = arith.constant dense<0.000000e+00> : vector<8x78xf32>
    %45 = tpu.matmul %42, %44, %cst_41 {dimension_numbers = #tpu.dot_dimension_numbers<[1], [0], [0], [1], [0, 0, 1, 1], [], []>} : vector<8x32xbf16>, vector<32x78xbf16>, vector<8x78xf32> -> vector<8x78xf32>
    %46 = arith.addf %40, %45 : vector<8x78xf32>
    %c7 = arith.constant 7 : index
    %c0_42 = arith.constant 0 : index
    %c0_43 = arith.constant 0 : index
    %47 = vector.load %arg2[%c7, %c0_42, %c0_43] : memref<9x8x32xbf16, #tpu.memory_space<vmem>>, vector<1x8x32xbf16>
    %48 = vector.shape_cast %47 : vector<1x8x32xbf16> to vector<8x32xbf16>
    %c0_44 = arith.constant 0 : index
    %c0_45 = arith.constant 0 : index
    %c21 = arith.constant 21 : index
    %49 = vector.load %arg3[%c0_44, %c0_45, %c21] : memref<1x32x128xbf16, #tpu.memory_space<vmem>>, vector<1x32x78xbf16>
    %50 = vector.shape_cast %49 : vector<1x32x78xbf16> to vector<32x78xbf16>
    %cst_46 = arith.constant dense<0.000000e+00> : vector<8x78xf32>
    %51 = tpu.matmul %48, %50, %cst_46 {dimension_numbers = #tpu.dot_dimension_numbers<[1], [0], [0], [1], [0, 0, 1, 1], [], []>} : vector<8x32xbf16>, vector<32x78xbf16>, vector<8x78xf32> -> vector<8x78xf32>
    %52 = arith.addf %46, %51 : vector<8x78xf32>
    %c8 = arith.constant 8 : index
    %c0_47 = arith.constant 0 : index
    %c0_48 = arith.constant 0 : index
    %53 = vector.load %arg2[%c8, %c0_47, %c0_48] : memref<9x8x32xbf16, #tpu.memory_space<vmem>>, vector<1x8x32xbf16>
    %54 = vector.shape_cast %53 : vector<1x8x32xbf16> to vector<8x32xbf16>
    %c0_49 = arith.constant 0 : index
    %c0_50 = arith.constant 0 : index
    %c22 = arith.constant 22 : index
    %55 = vector.load %arg3[%c0_49, %c0_50, %c22] : memref<1x32x128xbf16, #tpu.memory_space<vmem>>, vector<1x32x78xbf16>
    %56 = vector.shape_cast %55 : vector<1x32x78xbf16> to vector<32x78xbf16>
    %cst_51 = arith.constant dense<0.000000e+00> : vector<8x78xf32>
    %57 = tpu.matmul %54, %56, %cst_51 {dimension_numbers = #tpu.dot_dimension_numbers<[1], [0], [0], [1], [0, 0, 1, 1], [], []>} : vector<8x32xbf16>, vector<32x78xbf16>, vector<8x78xf32> -> vector<8x78xf32>
    %58 = arith.addf %52, %57 : vector<8x78xf32>
    %c0_52 = arith.constant 0 : index
    %c0_53 = arith.constant 0 : index
    %59 = vector.load %arg4[%c0_52, %c0_53] : memref<8x1xf32, #tpu.memory_space<vmem>>, vector<8x1xf32>
    %60 = vector.broadcast %59 : vector<8x1xf32> to vector<8x78xf32>
    %61 = arith.addf %58, %60 : vector<8x78xf32>
    %c0_54 = arith.constant 0 : index
    %c0_55 = arith.constant 0 : index
    %62 = vector.load %arg5[%c0_54, %c0_55] : memref<1x78xf32, #tpu.memory_space<vmem>>, vector<1x78xf32>
    %63 = vector.broadcast %62 : vector<1x78xf32> to vector<8x78xf32>
    %64 = arith.mulf %61, %63 : vector<8x78xf32>
    %65 = arith.truncf %64 : vector<8x78xf32> to vector<8x78xbf16>
    %c0_56 = arith.constant 0 : index
    %c0_57 = arith.constant 0 : index
    %c11_58 = arith.constant 11 : index
    %66 = vector.load %arg6[%c0_56, %c0_57, %c11_58] : memref<1x8x128xbf16, #tpu.memory_space<vmem>>, vector<1x8x78xbf16>
    %67 = vector.shape_cast %66 : vector<1x8x78xbf16> to vector<8x78xbf16>
    %68 = vector.shape_cast %65 : vector<8x78xbf16> to vector<1x8x78xbf16>
    tpu.vector_store %arg6[%c0_56, %c0_57, %c11_58], %68 {strides = array<i32>} : memref<1x8x128xbf16, #tpu.memory_space<vmem>>, vector<1x8x78xbf16>,
    return
  }
  func.func @transform_0(%arg0: i32, %arg1: i32) -> (i32, i32, i32) {
    %c0_i32 = arith.constant 0 : i32
    %c0_i32_0 = arith.constant 0 : i32
    %c0_i32_1 = arith.constant 0 : i32
    return %c0_i32, %arg1, %c0_i32_0 : i32, i32, i32
  }
  func.func @transform_1(%arg0: i32, %arg1: i32) -> (i32, i32, i32) {
    %c0_i32 = arith.constant 0 : i32
    %c0_i32_0 = arith.constant 0 : i32
    %c0_i32_1 = arith.constant 0 : i32
    return %arg0, %c0_i32, %c0_i32_0 : i32, i32, i32
  }
  func.func @transform_2(%arg0: i32, %arg1: i32) -> (i32, i32) {
    %c0_i32 = arith.constant 0 : i32
    %c0_i32_0 = arith.constant 0 : i32
    return %arg1, %c0_i32 : i32, i32
  }
  func.func @transform_3(%arg0: i32, %arg1: i32) -> (i32, i32) {
    %c0_i32 = arith.constant 0 : i32
    %c0_i32_0 = arith.constant 0 : i32
    %c0_i32_1 = arith.constant 0 : i32
    return %c0_i32, %c0_i32_0 : i32, i32
  }
  func.func @transform_4(%arg0: i32, %arg1: i32) -> (i32, i32, i32) {
    %c0_i32 = arith.constant 0 : i32
    %c0_i32_0 = arith.constant 0 : i32
    return %arg0, %arg1, %c0_i32 : i32, i32, i32
  }
}

</mosaic_0001>

<bundles_post_ra>
// kernel: dcrnn_cell_forward.9
= control target key start
LH: loop header
LB: loop body
LE: loop exit
PB: predicated region body
PF: predicated region fallthrough
CT: control target
= control target key end

     0   :  { %s624_s15 = smov 0   ;;  %s626_s16 = smov 0   ;;  %s735_s0 = inlined_call_operand.vmem [shape: bf16[2,16,384], index: 0, kind: input, shape index: {}]   ;;  %s736_s1 = inlined_call_operand.vmem [shape: f32[1,16,1], index: 1, kind: input, shape index: {}]   ;;  %s737_s2 = inlined_call_operand.vmem [shape: f32[1,16,1], index: 2, kind: input, shape index: {}]   ;;  %s738_s3 = inlined_call_operand.vmem [shape: f32[1,1,384], index: 3, kind: input, shape index: {}]   ;;  %s739_s4 = inlined_call_operand.vmem [shape: bf16[2,16,384], index: 4, kind: output, shape index: {}]  }
   0x1   :  { %s628_s17 = smov 0  }
   0x2 LB: > { %s640_s18 = sadd.s32 4294967295, %s596_s17   ;;  %s643_s19 = sadd.s32 1, %s596_s17   ;;  %s596_s17 = sphi %s628_s17, %s743_s17   ;;  %s592_s16 = sphi %s626_s16, %s742_s16   ;;  %s588_s15 = sphi %s624_s15, %s741_s15  }
   0x3   : > { %s18_s20 = ssub.s32 %s596_s17, %s643_s19  ;;  %s21_s21 = sadd.s32 1, %s592_s16 }
   0x4   : > { %p19_p0 = scmp.eq.s32.totalorder %s18_s20, 0  ;;  %p28_p1 = scmp.ne.s32.totalorder %s592_s16, %s588_s15 }
   0x5   : > { %p29_p2 = scmp.eq.s32.totalorder %s596_s17, 0  ;;  %p131_p3 = scmp.eq.s32.totalorder %s640_s18, 1 }
   0x6   : > { %s653_s22 = scalar_select %p19_p0, %s592_s16, %s21_s21  }
   0x7   : > { %p30_p4 = por %p29_p2, %p28_p1  ;;  %p655_p5 = por %p131_p3, %p28_p1 }
   0x8   : > { %p517_p6 = scmp.ge.s32.totalorder %s596_s17, 2 }
   0xa   : > { %156 = sbr.rel (%p517_p6) target bundleno = 22 (0x16), region = 20 }
   0xf   : > { %159 = sbr.rel (!%p30_p4) target bundleno = 22 (0x16), region = 24  ;;  %s161_s24 = sand.u32 (%p30_p4), 1, %s592_s16  }
  0x10   : > { %s542_s25 = smul.u32 (%p30_p4), 12, %s596_s17 }
  0x11   : > { %s541_s26 = smul.u32 (%p30_p4), 24, %s161_s24 }
  0x12   : > { %s166_s29 = scalar_lea.vmem (%p30_p4), %s735_s0, %s542_s25 }
  0x13   : > { %v181_v0 = vld [vmem:[%s166_s29] sm:$0xff] (%p30_p4)  ;;  %v183_v1 = vld [vmem:[%s166_s29 + $0x18] sm:$0xff] (%p30_p4)  ;;  %v519_v2 = vld [vmem:[%s166_s29 + $0x8] sm:$0xf] (%p30_p4)  ;;  %s163_s30 = scalar_lea.vmem (%p30_p4), [#allocation2], %s541_s26 }
  0x14   : > { %182 = vst [vmem:[%s163_s30] sm:$0xff] %v181_v0  ;;  %184 = vst [vmem:[%s163_s30 + $0xc] sm:$0xff] %v183_v1  ;;  %v521_v3 = vld [vmem:[%s166_s29 + $0x20] sm:$0xf] }
  0x15   : > { %520 = vst [vmem:[%s163_s30 + $0x8] sm:$0xf] %v519_v2  ;;  %522 = vst [vmem:[%s163_s30 + $0x14] sm:$0xf] %v521_v3 }
  0x16 PF: > { %p523_p7 = scmp.ge.s32.totalorder %s596_s17, 1  ;;  %p215_p8 = scmp.lt.s32.totalorder %s596_s17, 3 }
  0x18   : > { %p216_p9 = pnand %p523_p7, %p215_p8 }
  0x19   : > { %s222_s5 = sand.u32 (!%p216_p9), 1, %s588_s15   ;;  %p254_p10 = scmp.lt.s32.totalorder (!%p216_p9), %s640_s18, 1 }
  0x1a   : > { %219 = sbr.rel (%p216_p9) target bundleno = 352 (0x160), region = 58 }
  0x1b   : > { %s668_s6 = smul.u32 (!%p216_p9), 24, %s222_s5 }
  0x1d   : > { %s224_s7 = scalar_lea.vmem (!%p216_p9), [#allocation2], %s668_s6  ;;  %s253_s21 = scalar_lea.vmem (!%p216_p9), [#allocation3], %s668_s6 }
  0x1f   : > { %v262_v4 = vld [vmem:[%s224_s7] sm:$0xff]  ;;  %v263_v5 = vld [vmem:[%s224_s7 + $0x8] ss:$12 sps:$4 sm:$0xff]   ;;  %v264_v6 = vld [vmem:[%s224_s7 + $0xc] sm:$0xff]  ;;  %v598_v27 = vmov 0   ;;  %s255_s8 = scalar_select %p254_p10, %s640_s18, 1  ;;  %v332_v46 = vlaneseq }
  0x20   : > { %v671_v7 = vunpack.c.l.bf16 %v262_v4  ;;  %v673_v8 = vunpack.c.h.bf16 %v262_v4  ;;  %v675_v9 = vunpack.c.l.bf16 %v263_v5  ;;  %v677_v10 = vunpack.c.l.bf16 %v264_v6  ;;  %570 = vset.pattern.permute.xlu0 %v598_v27  ;;  %571 = vset.pattern.permute.xlu1 %v598_v27  ;;  %v330_v51 = vld [vmem:[%s738_s3] sm:$0x7]  ;;  %s544_s24 = smul.u32 (%p655_p5), 12, %s640_s18 }
  0x21   : > { %v679_v11 = vunpack.c.h.bf16 %v264_v6  ;;  %v681_v12 = vunpack.c.h.bf16 %v263_v5  ;;  %s524_s9 = sshll.u32 %s255_s8, 3  ;;  %v333_v47 = vshrl.u32 %v332_v46, 7 }
  0x22   : > { %v272_v13 = vadd.f32 %v673_v8, %v671_v7  ;;  %v281_v14 = vmul.f32 %v671_v7, %v671_v7  ;;  %v282_v15 = vmul.f32 %v673_v8, %v673_v8  ;;  %v283_v16 = vmul.f32 %v675_v9, %v675_v9  ;;  %s257_s12 = scalar_lea.vmem %s736_s1, %s524_s9  ;;  %s261_s15 = scalar_lea.vmem %s737_s2, %s524_s9 }
  0x23   : > { %v276_v17 = vadd.f32 %v679_v11, %v677_v10  ;;  %v284_v18 = vmul.f32 %v677_v10, %v677_v10  ;;  %v285_v19 = vmul.f32 %v679_v11, %v679_v11  ;;  %v286_v22 = vmul.f32 %v681_v12, %v681_v12  ;;  %v301_v40 = vld [vmem:[%s257_s12] sm:$0xff]  ;;  %s392_s27 = scalar_lea.vmem (%p655_p5), %s739_s4, %s544_s24 }
  0x24   : > { %v273_v20 = vadd.f32 %v272_v13, %v675_v9  ;;  %v287_v21 = vadd.f32 %v282_v15, %v281_v14  ;;  %v305_v43 = vld [vmem:[%s261_s15] sm:$0xff]  ;;  %v334_v48 = vsub.s32 0, %v333_v47  ;;  %v338_v49 = vsub.s32 1, %v333_v47 }
  0x25   : > { %v291_v23 = vadd.f32 %v285_v19, %v284_v18  ;;  %v277_v25 = vadd.f32 %v276_v17, %v681_v12  ;;  %v342_v50 = vsub.s32 2, %v333_v47 }
  0x26   : > { %274 = vadd.xlane.f32.xlu0 %v273_v20  ;;  %v288_v24 = vadd.f32 %v287_v21, %v283_v16  ;;  %v335_v53 = vrot.slane %v330_v51, %v334_v48  ;;  %v339_v54 = vrot.slane %v330_v51, %v338_v49 }
  0x27   : > { %v292_v26 = vadd.f32 %v291_v23, %v286_v22  ;;  %v343_v55 = vrot.slane %v330_v51, %v342_v50 }
  0x28   : > { %289 = vadd.xlane.f32.xlu1 %v288_v24 }
  0x2a   : > { %278 = vadd.xlane.f32.xlu0 %v277_v25 }
  0x2c   : > { %293 = vadd.xlane.f32.xlu1 %v292_v26 }
  0xaf   : > { %v275_v28 = vpop.xlane.xlu0 %274 }
  0xb1   : > { %v290_v29 = vpop.xlane.xlu1 %289 }
  0xb3   : > { %v279_v30 = vpop.xlane.xlu0 %278 }
  0xb4   : > { %v280_v31 = vadd.f32 %v279_v30, %v275_v28 }
  0xb5   : > { %v294_v32 = vpop.xlane.xlu1 %293 }
  0xb6   : > { %v296_v33 = vmul.f32 0.001953125, %v280_v31  ;;  %v295_v34 = vadd.f32 %v294_v32, %v290_v29 }
  0xb8   : > { %v298_v35 = vmul.f32 %v296_v33, %v296_v33  ;;  %v297_v36 = vmul.f32 0.001953125, %v295_v34 }
  0xba   : > { %v299_v37 = vsub.f32 %v297_v36, %v298_v35 }
  0xbc   : > { %v300_v38 = vmax.f32 %v299_v37, 0.0 }
  0xbe   : > { %v302_v39 = vadd.f32 1e-05, %v300_v38 }
  0xc0   : > { %572 = vrsqrt.f32 %v302_v39 }
  0xcd   : > { %v573_v41 = vpop.eup %572 }
  0xce   : > { %v304_v42 = vmul.f32 %v573_v41, %v301_v40 }
  0xd0   : > { %310 = vperm.xlu0 %570, %v304_v42   ;;  %v306_v44 = vmul.f32 %v304_v42, %v296_v33 }
  0xd2   : > { %v307_v45 = vsub.f32 %v305_v43, %v306_v44 }
  0xd4   : > { %321 = vperm.xlu1 %571, %v307_v45  }
 0x14b   : > { %v311_v52 = vpop.permute.xlu0 %310 }
 0x14c   : > { %v313_v56 = vmul.f32 %v311_v52, %v671_v7  ;;  %v314_v57 = vmul.f32 %v311_v52, %v673_v8  ;;  %v315_v58 = vmul.f32 %v311_v52, %v675_v9  ;;  %v316_v59 = vmul.f32 %v311_v52, %v677_v10 }
 0x14d   : > { %v317_v60 = vmul.f32 %v311_v52, %v679_v11  ;;  %v318_v61 = vmul.f32 %v311_v52, %v681_v12 }
 0x14f   : > { %v322_v62 = vpop.permute.xlu1 %321 }
 0x150   : > { %v324_v63 = vadd.f32 %v322_v62, %v313_v56  ;;  %v325_v0 = vadd.f32 %v322_v62, %v314_v57  ;;  %v326_v1 = vadd.f32 %v322_v62, %v315_v58  ;;  %v327_v2 = vadd.f32 %v322_v62, %v316_v59 }
 0x151   : > { %v328_v3 = vadd.f32 %v322_v62, %v317_v60  ;;  %v329_v4 = vadd.f32 %v322_v62, %v318_v61 }
 0x152   : > { %v347_v5 = vmul.f32 %v335_v53, %v324_v63  ;;  %v348_v6 = vmul.f32 %v339_v54, %v325_v0  ;;  %v349_v7 = vmul.f32 %v343_v55, %v326_v1  ;;  %v350_v8 = vmul.f32 %v335_v53, %v327_v2 }
 0x153   : > { %v351_v13 = vmul.f32 %v339_v54, %v328_v3  ;;  %v352_v9 = vmul.f32 %v343_v55, %v329_v4  ;;  %389 = sbr.rel (!%p655_p5) target bundleno = 352 (0x160), region = 66 }
 0x154   : > { %v537_v14 = vpack.c.bf16 %v348_v6, %v347_v5  ;;  %v538_v10 = vpack.c.bf16 %v349_v7, %v349_v7 }
 0x155   : > { %v539_v15 = vpack.c.bf16 %v351_v13, %v350_v8  ;;  %v540_v11 = vpack.c.bf16 %v352_v9, %v352_v9 }
 0x156   : > { %379 = vst [vmem:[%s253_s21] sm:$0xff] %v537_v14  ;;  %380 = vst [vmem:[%s253_s21 + $0x8] sm:$0xf] %v538_v10 }
 0x157   : > { %381 = vst [vmem:[%s253_s21 + $0xc] sm:$0xff] %v539_v15  ;;  %382 = vst [vmem:[%s253_s21 + $0x14] sm:$0xf] %v540_v11 }
 0x15d   : > { %v407_v12 = vld [vmem:[%s253_s21] sm:$0xff]  ;;  %v531_v17 = vld [vmem:[%s253_s21 + $0x8] sm:$0xf] }
 0x15e   : > { %v409_v16 = vld [vmem:[%s253_s21 + $0xc] sm:$0xff]  ;;  %v533_v18 = vld [vmem:[%s253_s21 + $0x14] sm:$0xf]  ;;  %408 = vst [vmem:[%s392_s27] sm:$0xff] %v407_v12  ;;  %532 = vst [vmem:[%s392_s27 + $0x8] sm:$0xf] %v531_v17 }
 0x15f   : > { %410 = vst [vmem:[%s392_s27 + $0x18] sm:$0xff] %v409_v16  ;;  %534 = vst [vmem:[%s392_s27 + $0x20] sm:$0xf] %v533_v18 }
 0x160 PF: > { %p11_p11 = scmp.ge.s32.totalorder %s643_s19, 4   ;;  %s741_s15 = smov %s592_s16 }
 0x161   : > { %s742_s16 = smov %s653_s22  ;;  %s743_s17 = smov %s643_s19 }
 0x162   :  { %13 = sbr.rel (!%p11_p11) target bundleno = 2 (0x2), region = 141 }

// kernel: dcrnn_cell_forward.8
= control target key start
LH: loop header
LB: loop body
LE: loop exit
PB: predicated region body
PF: predicated region fallthrough
CT: control target
= control target key end

     0   :  { %s1761_s15 = smov 0   ;;  %s1763_s16 = smov 0   ;;  %s1987_s0 = inlined_call_operand.vmem [shape: bf16[9,16,8], index: 0, kind: input, shape index: {}]   ;;  %s1988_s1 = inlined_call_operand.vmem [shape: bf16[2,8,384], index: 1, kind: input, shape index: {}]   ;;  %s1989_s2 = inlined_call_operand.vmem [shape: f32[16,1], index: 2, kind: input, shape index: {}]   ;;  %s1990_s3 = inlined_call_operand.vmem [shape: f32[1,286], index: 3, kind: input, shape index: {}]   ;;  %s1991_s4 = inlined_call_operand.vmem [shape: bf16[2,16,384], index: 4, kind: output, shape index: {}]  }
   0x1   :  { %s1765_s17 = smov 0   ;;  %s1767_s18 = smov 0  }
   0x2   :  { %s1769_s19 = smov 0   ;;  %s1771_s20 = smov 0  }
   0x3   :  { %s1773_s21 = smov 0  }
   0x4 LB: > { %s23_s22 = sadd.s32 1, %s1714_s19  ;;  %s26_s23 = sadd.s32 1, %s1718_s20  ;;  %s1722_s21 = sphi %s1773_s21, %s14_s21   ;;  %s1718_s20 = sphi %s1771_s20, %s1997_s20   ;;  %s1714_s19 = sphi %s1769_s19, %s1996_s19   ;;  %s1710_s18 = sphi %s1767_s18, %s1995_s18   ;;  %s1706_s17 = sphi %s1765_s17, %s1994_s17   ;;  %s1702_s16 = sphi %s1763_s16, %s1993_s16   ;;  %s1698_s15 = sphi %s1761_s15, %s1992_s15  }
   0x5   : > { %p24_p0 = scmp.ge.s32.totalorder %s23_s22, 2  ;;  %s33_s24 = sadd.s32 1, %s1702_s16 }
   0x6   : > { %p40_p1 = scmp.ne.s32.totalorder %s1702_s16, %s1698_s15  ;;  %p41_p2 = scmp.eq.s32.totalorder %s1722_s21, 0 }
   0x7   : > { %s1999_s22 = smov (%p24_p0, %s23_s22), 0  ;;  %s2001_s23 = smov (!%p24_p0, %s26_s23), %s1718_s20 }
   0x8   : > { %s30_s25 = ssub.s32 %s1714_s19, %s1999_s22  ;;  %p42_p3 = por %p41_p2, %p40_p1 }
   0x9   : > { %p28_p4 = scmp.ge.s32.totalorder %s2001_s23, 2  ;;  %p31_p5 = scmp.eq.s32.totalorder %s30_s25, 0 }
   0xa   : > { %p1469_p6 = scmp.ge.s32.totalorder %s1722_s21, 4 }
   0xb   : > { %s2003_s23 = smov (%p28_p4, %s2001_s23), 0 }
   0xc   : > { %s1810_s26 = scalar_select %p31_p5, %s1702_s16, %s33_s24  }
   0xd   : > { %170 = sbr.rel (%p1469_p6) target bundleno = 28 (0x1c), region = 20 }
  0x12   : > { %173 = sbr.rel (!%p42_p3) target bundleno = 28 (0x1c), region = 24  ;;  %s175_s27 = sand.u32 (%p42_p3), 1, %s1702_s16  }
  0x13   : > { %s1470_s28 = sshll.u32 (%p42_p3), %s1714_s19, 2  ;;  %s1591_s29 = smul.u32 (%p42_p3), 36, %s175_s27 }
  0x14   : > { %s179_s6 = scalar_lea.vmem (%p42_p3), %s1987_s0, %s1470_s28 }
  0x15   : > { %v196_v0 = vld [vmem:[%s179_s6] sm:$0xf] (%p42_p3)  ;;  %v198_v1 = vld [vmem:[%s179_s6 + $0x8] sm:$0xf] (%p42_p3)  ;;  %v200_v2 = vld [vmem:[%s179_s6 + $0x10] sm:$0xf] (%p42_p3) }
  0x16   : > { %v202_v3 = vld [vmem:[%s179_s6 + $0x18] sm:$0xf] (%p42_p3)  ;;  %v204_v4 = vld [vmem:[%s179_s6 + $0x20] sm:$0xf] (%p42_p3)  ;;  %s177_s7 = scalar_lea.vmem (%p42_p3), [#allocation2], %s1591_s29 }
  0x17   : > { %197 = vst [vmem:[%s177_s7] sm:$0xf] %v196_v0  ;;  %199 = vst [vmem:[%s177_s7 + $0x4] sm:$0xf] %v198_v1  ;;  %v206_v5 = vld [vmem:[%s179_s6 + $0x28] sm:$0xf] }
  0x18   : > { %201 = vst [vmem:[%s177_s7 + $0x8] sm:$0xf] %v200_v2  ;;  %203 = vst [vmem:[%s177_s7 + $0xc] sm:$0xf] %v202_v3  ;;  %v208_v6 = vld [vmem:[%s179_s6 + $0x30] sm:$0xf] }
  0x19   : > { %205 = vst [vmem:[%s177_s7 + $0x10] sm:$0xf] %v204_v4  ;;  %v210_v7 = vld [vmem:[%s179_s6 + $0x38] sm:$0xf]  ;;  %207 = vst [vmem:[%s177_s7 + $0x14] sm:$0xf] %v206_v5 }
  0x1a   : > { %209 = vst [vmem:[%s177_s7 + $0x18] sm:$0xf] %v208_v6  ;;  %211 = vst [vmem:[%s177_s7 + $0x1c] sm:$0xf] %v210_v7  ;;  %v212_v8 = vld [vmem:[%s179_s6 + $0x40] sm:$0xf] }
  0x1b   : > { %213 = vst [vmem:[%s177_s7 + $0x20] sm:$0xf] %v212_v8 }
  0x1c PF: > { %p1471_p7 = scmp.ge.s32.totalorder %s1722_s21, 1  ;;  %p269_p8 = scmp.lt.s32.totalorder %s1722_s21, 5 }
  0x1e   : > { %p270_p9 = pnand %p1471_p7, %p269_p8 }
  0x1f   : > { %p314_p10 = scmp.lt.s32.totalorder (!%p270_p9), %s1710_s18, 1  ;;  %s1727_s12 = smov (!%p270_p9), 127  }
  0x20   : > { %273 = sbr.rel (%p270_p9) target bundleno = 556 (0x22c), region = 73  ;;  %s1728_s13 = smov (!%p270_p9), 126  }
  0x21   : > { %s1729_s14 = smov (!%p270_p9), 110   ;;  %s1730_s24 = smov (!%p270_p9), 109  }
  0x22   : > { %s1731_s25 = smov (!%p270_p9), 108   ;;  %s1732_s27 = smov (!%p270_p9), 92  }
  0x23   : > { %s1733_s28 = smov (!%p270_p9), 91   ;;  %s1734_s29 = smov (!%p270_p9), 90  }
  0x24   : > { %p319_p11 = scmp.lt.s32.totalorder (!%p270_p9), %s1706_s17, 1 }
  0x25   : > { %v1724_v9 = vmov 0.0   ;;  %vm1725_vm0 = vmmov 0   ;;  %s2005_s18 = smov (!%p314_p10, %s1710_s18), 1  ;;  %v1726_v10 = vmov 0   ;;  %vm361_vm1 = vcmask 1043456  }
  0x26   : > { %1537 = vmatprep.subr.bf16.mxu1 %v1724_v9  ;;  %1539 = vmatprep.mubr.msk.bf16.mxu1 %vm1725_vm0, %v1724_v9  ;;  %s1593_s8 = smul.u32 12, %s2005_s18  ;;  %s2007_s17 = smov (!%p319_p11, %s1706_s17), 1  ;;  %vm357_vm2 = vcmask 64512   ;;  %vm354_vm3 = vcmask 1039360   ;;  %vm553_vm4 = vcmask 1031168   ;;  %vm660_vm5 = vcmask 900096  }
  0x27   : > { %403 = vmatprep.mubr.bf16.mxu0 %v1726_v10  ;;  %1664 = vset.pattern.permute.xlu0 %v1726_v10  ;;  %s1595_s30 = smul.u32 6, %s2005_s18  ;;  %s1473_s5 = sshll.u32 %s2007_s17, 3  ;;  %vm767_vm6 = vcmask 891904   ;;  %vm874_vm7 = vcmask 883712   ;;  %vm981_vm8 = vcmask 752640   ;;  %vm1088_vm9 = vcmask 744448  }
  0x28   : > { %s318_s11 = scalar_lea.vmem %s1988_s1, %s1593_s8  ;;  %s1594_s6 = smul.u32 3, %s2007_s17  ;;  %vm1195_vm10 = vcmask 736256   ;;  %vm1344_vm11 = vcmask 1043608   ;;  %vm1345_vm12 = vcmask 1047556   ;;  %vm1339_vm13 = vcmask 154624  }
  0x29   : > { %v1665_v11 = vld [vmem:[%s318_s11 + $0x8] ss:$0 sps:$4 sm:$0xff]   ;;  %v336_v12 = vld [vmem:[%s318_s11] sm:$0xff]  ;;  %s322_s9 = scalar_lea.vmem %s1989_s2, %s1473_s5  ;;  %s276_s17 = sand.u32 1, %s1698_s15   ;;  %vm1346_vm14 = vmor %vm1345_vm12, %vm1344_vm11  ;;  %vm1348_vm15 = vcmask 396288  }
  0x2a   : > { %v1833_v13 = vcombine.low %v336_v12, %v336_v12  ;;  %352 = vrot.lane.b32.xlu1 %v1665_v11, %s1727_s12  ;;  %v1836_v14 = vcombine.high %v336_v12, %v336_v12  ;;  %s329_s10 = sadd.s32 %s1595_s30, %s1594_s6  ;;  %v1294_v15 = vld [vmem:[%s322_s9] sm:$0xff]  ;;  %s1592_s18 = smul.u32 36, %s276_s17  ;;  %v462_v20 = vsel %vm361_vm1, %v1665_v11, 0 }
  0x2b   : > { %s1474_s11 = sshll.u32 %s329_s10, 2 }
  0x2c   : > { %348 = vrot.lane.b32.xlu0 %v1833_v13, %s1727_s12  ;;  %v456_v27 = vsel %vm361_vm1, %v1833_v13, 0 }
  0x2e   : > { %547 = vrot.lane.b32.xlu1 %v1833_v13, %s1728_s13 }
  0x30   : > { %350 = vrot.lane.b32.xlu0 %v1836_v14, %s1727_s12 }
  0x32   : > { %551 = vrot.lane.b32.xlu1 %v1665_v11, %s1728_s13 }
  0x34   : > { %549 = vrot.lane.b32.xlu0 %v1836_v14, %s1728_s13 }
  0x36   : > { %656 = vrot.lane.b32.xlu1 %v1836_v14, %s1729_s14 }
  0x38   : > { %654 = vrot.lane.b32.xlu0 %v1833_v13, %s1729_s14 }
  0x3a   : > { %761 = vrot.lane.b32.xlu1 %v1833_v13, %s1730_s24 }
  0x3c   : > { %658 = vrot.lane.b32.xlu0 %v1665_v11, %s1729_s14  ;;  %s1862_s14 = scalar_lea.vmem %s1991_s4, %s1474_s11 }
  0x3d   : > { %333 = vst [vmem:[%s1862_s14] sm:$0xff] %v1726_v10  ;;  %334 = vst [vmem:[%s1862_s14 + $0x8] sm:$0xf] %v1726_v10 }
  0x3e   : > { %765 = vrot.lane.b32.xlu1 %v1665_v11, %s1730_s24 }
  0x40   : > { %763 = vrot.lane.b32.xlu0 %v1836_v14, %s1730_s24  ;;  %s1870_s24 = scalar_lea.vmem [#allocation2], %s1592_s18 }
  0x41   : > { %v1475_v19 = vld [vmem:[%s1870_s24 + $0x4] sm:$0xf]  ;;  %v335_v29 = vld [vmem:[%s1870_s24] sm:$0xf]  ;;  %v1485_v38 = vld [vmem:[%s1870_s24 + $0x8] sm:$0xf] }
  0x42   : > { %870 = vrot.lane.b32.xlu1 %v1836_v14, %s1731_s25  ;;  %v1489_v46 = vld [vmem:[%s1870_s24 + $0xc] sm:$0xf]  ;;  %v1493_v54 = vld [vmem:[%s1870_s24 + $0x10] sm:$0xf]  ;;  %v1497_v62 = vld [vmem:[%s1870_s24 + $0x14] sm:$0xf] }
  0x43   : > { %v1501_v6 = vld [vmem:[%s1870_s24 + $0x18] sm:$0xf] }
  0x44   : > { %868 = vrot.lane.b32.xlu0 %v1833_v13, %s1731_s25 }
  0x46   : > { %975 = vrot.lane.b32.xlu1 %v1833_v13, %s1732_s27 }
  0x48   : > { %872 = vrot.lane.b32.xlu0 %v1665_v11, %s1731_s25 }
  0x4a   : > { %979 = vrot.lane.b32.xlu1 %v1665_v11, %s1732_s27 }
  0x4c   : > { %977 = vrot.lane.b32.xlu0 %v1836_v14, %s1732_s27  ;;  %s1735_s27 = smov 19  }
  0x4e   : > { %1084 = vrot.lane.b32.xlu1 %v1836_v14, %s1733_s28 }
  0x50   : > { %1082 = vrot.lane.b32.xlu0 %v1833_v13, %s1733_s28 }
  0x52   : > { %1189 = vrot.lane.b32.xlu1 %v1833_v13, %s1734_s29 }
  0x54   : > { %1086 = vrot.lane.b32.xlu0 %v1665_v11, %s1733_s28 }
  0x56   : > { %1193 = vrot.lane.b32.xlu1 %v1665_v11, %s1734_s29 }
  0x58   : > { %1191 = vrot.lane.b32.xlu0 %v1836_v14, %s1734_s29 }
  0x5c   : > { %1297 = vperm.xlu0 %1664, %v1294_v15   ;;  %v1505_v15 = vld [vmem:[%s1870_s24 + $0x1c] sm:$0xf] }
  0x9c   : > { %v353_v16 = vpop.permute.xlu1 %352 }
  0x9d   : > { %v369_v18 = vsel %vm361_vm1, %v353_v16, 0 }
  0x9e   : > { %v349_v17 = vpop.permute.xlu0 %348  ;;  %1538 = vmatpush3.bf16.msra.mxu1 %v369_v18 }
  0x9f   : > { %1543 = vmatprep.subr.bf16.mxu1 %v1724_v9 }
  0xa0   : > { %v548_v21 = vpop.permute.xlu1 %547 }
  0xa1   : > { %1540 = vmatmul.mubr.msk.bf16.vlgmr.msra.gmra.mxu1 %vm357_vm2, %v1475_v19 }
  0xa2   : > { %v351_v22 = vpop.permute.xlu0 %350  ;;  %1544 = vmatpush3.bf16.msra.mxu1 %v462_v20  ;;  %1545 = vmatprep.mubr.msk.bf16.mxu1 %vm1725_vm0, %v1724_v9  ;;  %v1509_v20 = vld [vmem:[%s1870_s24 + $0x20] sm:$0xf] }
  0xa3   : > { %v356_v23 = vsel %vm354_vm3, %v351_v22, %v353_v16  ;;  %v355_v24 = vsel %vm354_vm3, %v349_v17, %v351_v22  ;;  %1549 = vmatprep.subr.bf16.mxu1 %v1724_v9 }
  0xa4   : > { %1479 = vmatprep.subr.msk.bf16.mxu0 %vm361_vm1, %v356_v23  ;;  %v363_v25 = vsel %vm361_vm1, %v355_v24, 0  ;;  %v552_v26 = vpop.permute.xlu1 %551 }
  0xa5   : > { %386 = vmatpush1.bf16.msra.mxu0 %v363_v25  ;;  %v566_v31 = vsel %vm361_vm1, %v552_v26, 0 }
  0xa6   : > { %1482 = vmatprep.subr.msk.bf16.mxu0 %vm361_vm1, %v1836_v14  ;;  %v550_v28 = vpop.permute.xlu0 %549 }
  0xa7   : > { %v555_v30 = vsel %vm553_vm4, %v550_v28, %v552_v26  ;;  %v554_v34 = vsel %vm553_vm4, %v548_v21, %v550_v28 }
  0xa8   : > { %1480 = vmatmul.mubr.msk.bf16.vlgmr.msra.gmra.mxu0 %vm357_vm2, %v1475_v19  ;;  %v657_v32 = vpop.permute.xlu1 %656  ;;  %v560_v35 = vsel %vm361_vm1, %v554_v34, 0 }
  0xa9   : > { %479 = vmatpush1.bf16.msra.mxu0 %v456_v27  ;;  %496 = vmatprep.mubr.bf16.mxu0 %v1726_v10 }
  0xaa   : > { %1546 = vmatmul.mubr.msk.bf16.vlgmr.msra.gmra.mxu1 %vm357_vm2, %v335_v29  ;;  %1486 = vmatprep.subr.msk.bf16.mxu0 %vm361_vm1, %v555_v30  ;;  %v655_v33 = vpop.permute.xlu0 %654 }
  0xab   : > { %1550 = vmatpush3.bf16.msra.mxu1 %v566_v31  ;;  %1551 = vmatprep.mubr.msk.bf16.mxu1 %vm1725_vm0, %v1724_v9  ;;  %v661_v42 = vsel %vm660_vm5, %v655_v33, %v657_v32 }
  0xac   : > { %1555 = vmatprep.subr.bf16.mxu1 %v1724_v9  ;;  %v762_v37 = vpop.permute.xlu1 %761  ;;  %v667_v44 = vsel %vm361_vm1, %v661_v42, 0 }
  0xae   : > { %v659_v36 = vpop.permute.xlu0 %658 }
  0xaf   : > { %v662_v39 = vsel %vm660_vm5, %v657_v32, %v659_v36  ;;  %v673_v40 = vsel %vm361_vm1, %v659_v36, 0 }
  0xb0   : > { %1483 = vmatmul.mubr.msk.bf16.vlgmr.msra.gmra.mxu0 %vm357_vm2, %v335_v29  ;;  %v766_v43 = vpop.permute.xlu1 %765 }
  0xb1   : > { %583 = vmatpush1.bf16.msra.mxu0 %v560_v35  ;;  %600 = vmatprep.mubr.bf16.mxu0 %v1726_v10  ;;  %v780_v48 = vsel %vm361_vm1, %v766_v43, 0 }
  0xb2   : > { %1552 = vmatmul.mubr.msk.bf16.vlgmr.msra.gmra.mxu1 %vm357_vm2, %v1485_v38  ;;  %1490 = vmatprep.subr.msk.bf16.mxu0 %vm361_vm1, %v662_v39  ;;  %v764_v41 = vpop.permute.xlu0 %763 }
  0xb3   : > { %1556 = vmatpush3.bf16.msra.mxu1 %v673_v40  ;;  %1557 = vmatprep.mubr.msk.bf16.mxu1 %vm1725_vm0, %v1724_v9  ;;  %v769_v47 = vsel %vm767_vm6, %v764_v41, %v766_v43  ;;  %v768_v50 = vsel %vm767_vm6, %v762_v37, %v764_v41 }
  0xb4   : > { %1561 = vmatprep.subr.bf16.mxu1 %v1724_v9  ;;  %v871_v49 = vpop.permute.xlu1 %870  ;;  %v774_v52 = vsel %vm361_vm1, %v768_v50, 0 }
  0xb6   : > { %v869_v45 = vpop.permute.xlu0 %868 }
  0xb7   : > { %v875_v58 = vsel %vm874_vm7, %v869_v45, %v871_v49 }
  0xb8   : > { %1487 = vmatmul.mubr.msk.bf16.vlgmr.msra.gmra.mxu0 %vm357_vm2, %v1485_v38  ;;  %v976_v53 = vpop.permute.xlu1 %975  ;;  %v881_v60 = vsel %vm361_vm1, %v875_v58, 0 }
  0xb9   : > { %690 = vmatpush1.bf16.msra.mxu0 %v667_v44  ;;  %707 = vmatprep.mubr.bf16.mxu0 %v1726_v10 }
  0xba   : > { %1558 = vmatmul.mubr.msk.bf16.vlgmr.msra.gmra.mxu1 %vm357_vm2, %v1489_v46  ;;  %1494 = vmatprep.subr.msk.bf16.mxu0 %vm361_vm1, %v769_v47  ;;  %v873_v51 = vpop.permute.xlu0 %872 }
  0xbb   : > { %1562 = vmatpush3.bf16.msra.mxu1 %v780_v48  ;;  %1563 = vmatprep.mubr.msk.bf16.mxu1 %vm1725_vm0, %v1724_v9  ;;  %v876_v55 = vsel %vm874_vm7, %v871_v49, %v873_v51  ;;  %v887_v56 = vsel %vm361_vm1, %v873_v51, 0 }
  0xbc   : > { %1567 = vmatprep.subr.bf16.mxu1 %v1724_v9  ;;  %v980_v59 = vpop.permute.xlu1 %979 }
  0xbd   : > { %v994_v0 = vsel %vm361_vm1, %v980_v59, 0 }
  0xbe   : > { %v978_v57 = vpop.permute.xlu0 %977 }
  0xbf   : > { %v983_v63 = vsel %vm981_vm8, %v978_v57, %v980_v59  ;;  %v982_v2 = vsel %vm981_vm8, %v976_v53, %v978_v57 }
  0xc0   : > { %1491 = vmatmul.mubr.msk.bf16.vlgmr.msra.gmra.mxu0 %vm357_vm2, %v1489_v46  ;;  %v1085_v1 = vpop.permute.xlu1 %1084  ;;  %v988_v4 = vsel %vm361_vm1, %v982_v2, 0 }
  0xc1   : > { %797 = vmatpush1.bf16.msra.mxu0 %v774_v52  ;;  %814 = vmatprep.mubr.bf16.mxu0 %v1726_v10 }
  0xc2   : > { %1564 = vmatmul.mubr.msk.bf16.vlgmr.msra.gmra.mxu1 %vm357_vm2, %v1493_v54  ;;  %1498 = vmatprep.subr.msk.bf16.mxu0 %vm361_vm1, %v876_v55  ;;  %v1083_v61 = vpop.permute.xlu0 %1082 }
  0xc3   : > { %1568 = vmatpush3.bf16.msra.mxu1 %v887_v56  ;;  %1569 = vmatprep.mubr.msk.bf16.mxu1 %vm1725_vm0, %v1724_v9  ;;  %v1089_v11 = vsel %vm1088_vm9, %v1083_v61, %v1085_v1 }
  0xc4   : > { %1573 = vmatprep.subr.bf16.mxu1 %v1724_v9  ;;  %v1190_v5 = vpop.permute.xlu1 %1189  ;;  %v1095_v14 = vsel %vm361_vm1, %v1089_v11, 0 }
  0xc6   : > { %v1087_v3 = vpop.permute.xlu0 %1086 }
  0xc7   : > { %v1090_v7 = vsel %vm1088_vm9, %v1085_v1, %v1087_v3  ;;  %v1101_v8 = vsel %vm361_vm1, %v1087_v3, 0 }
  0xc8   : > { %1495 = vmatmul.mubr.msk.bf16.vlgmr.msra.gmra.mxu0 %vm357_vm2, %v1493_v54  ;;  %v1194_v13 = vpop.permute.xlu1 %1193 }
  0xc9   : > { %904 = vmatpush1.bf16.msra.mxu0 %v881_v60  ;;  %921 = vmatprep.mubr.bf16.mxu0 %v1726_v10  ;;  %v1208_v17 = vsel %vm361_vm1, %v1194_v13, 0 }
  0xca   : > { %1570 = vmatmul.mubr.msk.bf16.vlgmr.msra.gmra.mxu1 %vm357_vm2, %v1497_v62  ;;  %1502 = vmatprep.subr.msk.bf16.mxu0 %vm361_vm1, %v983_v63  ;;  %v1192_v12 = vpop.permute.xlu0 %1191 }
  0xcb   : > { %1574 = vmatpush3.bf16.msra.mxu1 %v994_v0  ;;  %1575 = vmatprep.mubr.msk.bf16.mxu1 %vm1725_vm0, %v1724_v9  ;;  %v1197_v16 = vsel %vm1195_vm10, %v1192_v12, %v1194_v13  ;;  %v1196_v18 = vsel %vm1195_vm10, %v1190_v5, %v1192_v12 }
  0xcc   : > { %1579 = vmatprep.subr.bf16.mxu1 %v1724_v9  ;;  %v1202_v19 = vsel %vm361_vm1, %v1196_v18, 0 }
  0xd0   : > { %1499 = vmatmul.mubr.msk.bf16.vlgmr.msra.gmra.mxu0 %vm357_vm2, %v1497_v62 }
  0xd1   : > { %1011 = vmatpush1.bf16.msra.mxu0 %v988_v4  ;;  %1028 = vmatprep.mubr.bf16.mxu0 %v1726_v10 }
  0xd2   : > { %1576 = vmatmul.mubr.msk.bf16.vlgmr.msra.gmra.mxu1 %vm357_vm2, %v1501_v6  ;;  %1506 = vmatprep.subr.msk.bf16.mxu0 %vm361_vm1, %v1090_v7 }
  0xd3   : > { %1580 = vmatpush3.bf16.msra.mxu1 %v1101_v8  ;;  %1581 = vmatprep.mubr.msk.bf16.mxu1 %vm1725_vm0, %v1724_v9 }
  0xd4   : > { %1585 = vmatprep.subr.bf16.mxu1 %v1724_v9 }
  0xd8   : > { %1503 = vmatmul.mubr.msk.bf16.vlgmr.msra.gmra.mxu0 %vm357_vm2, %v1501_v6 }
  0xd9   : > { %1118 = vmatpush1.bf16.msra.mxu0 %v1095_v14  ;;  %1135 = vmatprep.mubr.bf16.mxu0 %v1726_v10 }
  0xda   : > { %1582 = vmatmul.mubr.msk.bf16.vlgmr.msra.gmra.mxu1 %vm357_vm2, %v1505_v15  ;;  %1510 = vmatprep.subr.msk.bf16.mxu0 %vm361_vm1, %v1197_v16 }
  0xdb   : > { %1586 = vmatpush3.bf16.msra.mxu1 %v1208_v17  ;;  %1587 = vmatprep.mubr.msk.bf16.mxu1 %vm1725_vm0, %v1724_v9 }
  0xe0   : > { %1507 = vmatmul.mubr.msk.bf16.vlgmr.msra.gmra.mxu0 %vm357_vm2, %v1505_v15 }
  0xe1   : > { %1225 = vmatpush1.bf16.msra.mxu0 %v1202_v19  ;;  %1242 = vmatprep.mubr.bf16.mxu0 %v1726_v10 }
  0xe2   : > { %1588 = vmatmul.mubr.msk.bf16.vlgmr.msra.gmra.mxu1 %vm357_vm2, %v1509_v20 }
  0xe8   : > { %1511 = vmatmul.mubr.msk.bf16.vlgmr.msra.gmra.mxu0 %vm357_vm2, %v1509_v20 }
 0x161   : > { %v446_v21 = vpop.f32.mrf.mxu1 }
 0x163   : > { %v1541_v22 = vpop.f32.mrf.mxu1 }
 0x165   : > { %v449_v23 = vpop.f32.mrf.mxu1 }
 0x167   : > { %v1542_v25 = vpop.f32.mrf.mxu1 }
 0x168   : > { %v405_v24 = vpop.f32.mrf.mxu0 }
 0x16a   : > { %v407_v26 = vpop.f32.mrf.mxu0  ;;  %v539_v27 = vpop.f32.mrf.mxu1 }
 0x16b   : > { %v540_v12 = vadd.f32 %v539_v27, %v446_v21 }
 0x16c   : > { %v409_v9 = vpop.f32.mrf.mxu0  ;;  %v1547_v28 = vpop.f32.mrf.mxu1 }
 0x16e   : > { %v410_v29 = vpop.f32.mrf.mxu0  ;;  %v542_v30 = vpop.f32.mrf.mxu1 }
 0x16f   : > { %v1305_v29 = vlaneseq }
 0x170   : > { %v498_v31 = vpop.f32.mrf.mxu0  ;;  %v1548_v32 = vpop.f32.mrf.mxu1 }
 0x171   : > { %v499_v13 = vadd.f32 %v498_v31, %v405_v24 }
 0x172   : > { %v500_v33 = vpop.f32.mrf.mxu0  ;;  %v643_v34 = vpop.f32.mrf.mxu1 }
 0x173   : > { %v501_v16 = vadd.f32 %v500_v33, %v407_v26  ;;  %v651_v17 = vadd.f32 %v643_v34, %v540_v12  ;;  %v1306_v26 = vshrl.u32 %v1305_v29, 7 }
 0x174   : > { %v502_v10 = vpop.f32.mrf.mxu0  ;;  %v1553_v35 = vpop.f32.mrf.mxu1 }
 0x176   : > { %v503_v36 = vpop.f32.mrf.mxu0  ;;  %v646_v37 = vpop.f32.mrf.mxu1 }
 0x178   : > { %v602_v38 = vpop.f32.mrf.mxu0  ;;  %v1554_v39 = vpop.f32.mrf.mxu1 }
 0x179   : > { %v649_v18 = vadd.f32 %v602_v38, %v499_v13 }
 0x17a   : > { %v604_v40 = vpop.f32.mrf.mxu0  ;;  %v750_v41 = vpop.f32.mrf.mxu1 }
 0x17b   : > { %v650_v22 = vadd.f32 %v604_v40, %v501_v16  ;;  %v758_v23 = vadd.f32 %v750_v41, %v651_v17  ;;  %v1307_v40 = vsub.s32 0, %v1306_v26 }
 0x17c   : > { %v606_v42 = vpop.f32.mrf.mxu0  ;;  %v1559_v43 = vpop.f32.mrf.mxu1 }
 0x17e   : > { %v607_v44 = vpop.f32.mrf.mxu0  ;;  %v753_v45 = vpop.f32.mrf.mxu1 }
 0x17f   : > { %v1311_v45 = vsub.s32 1, %v1306_v26 }
 0x180   : > { %v709_v46 = vpop.f32.mrf.mxu0  ;;  %v1560_v47 = vpop.f32.mrf.mxu1 }
 0x181   : > { %v756_v25 = vadd.f32 %v709_v46, %v649_v18 }
 0x182   : > { %v711_v48 = vpop.f32.mrf.mxu0  ;;  %v857_v49 = vpop.f32.mrf.mxu1 }
 0x183   : > { %v757_v30 = vadd.f32 %v711_v48, %v650_v22  ;;  %v865_v32 = vadd.f32 %v857_v49, %v758_v23 }
 0x184   : > { %v713_v50 = vpop.f32.mrf.mxu0  ;;  %v1565_v51 = vpop.f32.mrf.mxu1 }
 0x185   : > { %v1315_v50 = vsub.s32 2, %v1306_v26 }
 0x186   : > { %v714_v52 = vpop.f32.mrf.mxu0  ;;  %v860_v53 = vpop.f32.mrf.mxu1 }
 0x187   : > { %v1303_v52 = vld [vmem:[%s1990_s3] sm:$0x7]  ;;  %v1298_v53 = vpop.permute.xlu0 %1297 }
 0x188   : > { %v816_v54 = vpop.f32.mrf.mxu0  ;;  %v1566_v55 = vpop.f32.mrf.mxu1 }
 0x189   : > { %v863_v10 = vadd.f32 %v816_v54, %v756_v25 }
 0x18a   : > { %v818_v56 = vpop.f32.mrf.mxu0  ;;  %v964_v57 = vpop.f32.mrf.mxu1 }
 0x18b   : > { %v864_v21 = vadd.f32 %v818_v56, %v757_v30  ;;  %v972_v24 = vadd.f32 %v964_v57, %v865_v32  ;;  %v1308_v56 = vrot.slane %v1303_v52, %v1307_v40 }
 0x18c   : > { %v820_v58 = vpop.f32.mrf.mxu0  ;;  %v1571_v59 = vpop.f32.mrf.mxu1 }
 0x18d   : > { %v1312_v58 = vrot.slane %v1303_v52, %v1311_v45 }
 0x18e   : > { %v821_v60 = vpop.f32.mrf.mxu0  ;;  %v967_v61 = vpop.f32.mrf.mxu1 }
 0x18f   : > { %v1316_v60 = vrot.slane %v1303_v52, %v1315_v50 }
 0x190   : > { %v923_v62 = vpop.f32.mrf.mxu0  ;;  %v1572_v63 = vpop.f32.mrf.mxu1 }
 0x191   : > { %v970_v27 = vadd.f32 %v923_v62, %v863_v10 }
 0x192   : > { %v925_v0 = vpop.f32.mrf.mxu0  ;;  %v1071_v1 = vpop.f32.mrf.mxu1 }
 0x193   : > { %v971_v34 = vadd.f32 %v925_v0, %v864_v21  ;;  %v1079_v37 = vadd.f32 %v1071_v1, %v972_v24 }
 0x194   : > { %v927_v2 = vpop.f32.mrf.mxu0  ;;  %v1577_v3 = vpop.f32.mrf.mxu1 }
 0x196   : > { %v928_v4 = vpop.f32.mrf.mxu0  ;;  %v1074_v5 = vpop.f32.mrf.mxu1 }
 0x198   : > { %v1030_v6 = vpop.f32.mrf.mxu0  ;;  %v1578_v7 = vpop.f32.mrf.mxu1 }
 0x199   : > { %v1077_v38 = vadd.f32 %v1030_v6, %v970_v27 }
 0x19a   : > { %v1032_v8 = vpop.f32.mrf.mxu0  ;;  %v1178_v11 = vpop.f32.mrf.mxu1 }
 0x19b   : > { %v1078_v42 = vadd.f32 %v1032_v8, %v971_v34  ;;  %v1186_v43 = vadd.f32 %v1178_v11, %v1079_v37 }
 0x19c   : > { %v1034_v14 = vpop.f32.mrf.mxu0  ;;  %v1583_v15 = vpop.f32.mrf.mxu1 }
 0x19e   : > { %v1035_v19 = vpop.f32.mrf.mxu0  ;;  %v1181_v20 = vpop.f32.mrf.mxu1 }
 0x1a0   : > { %v1137_v9 = vpop.f32.mrf.mxu0  ;;  %v1584_v28 = vpop.f32.mrf.mxu1 }
 0x1a1   : > { %v1184_v44 = vadd.f32 %v1137_v9, %v1077_v38 }
 0x1a2   : > { %v1139_v35 = vpop.f32.mrf.mxu0  ;;  %v1285_v36 = vpop.f32.mrf.mxu1 }
 0x1a3   : > { %v1185_v48 = vadd.f32 %v1139_v35, %v1078_v42  ;;  %v1293_v49 = vadd.f32 %v1285_v36, %v1186_v43 }
 0x1a4   : > { %v1141_v31 = vpop.f32.mrf.mxu0  ;;  %v1589_v33 = vpop.f32.mrf.mxu1 }
 0x1a5   : > { %v1302_v61 = vadd.f32 %v1298_v53, %v1293_v49 }
 0x1a6   : > { %v1142_v39 = vpop.f32.mrf.mxu0  ;;  %v1288_v41 = vpop.f32.mrf.mxu1 }
 0x1a7   : > { %v1322_v2 = vmul.f32 %v1316_v60, %v1302_v61 }
 0x1a8   : > { %v1244_v46 = vpop.f32.mrf.mxu0  ;;  %v1590_v47 = vpop.f32.mrf.mxu1 }
 0x1a9   : > { %v1291_v51 = vadd.f32 %v1244_v46, %v1184_v44  ;;  %v1518_v4 = vpack.c.bf16 %v1322_v2, %v1322_v2 }
 0x1aa   : > { %v1246_v54 = vpop.f32.mrf.mxu0 }
 0x1ab   : > { %v1300_v55 = vadd.f32 %v1298_v53, %v1291_v51  ;;  %v1292_v57 = vadd.f32 %v1246_v54, %v1185_v48 }
 0x1ac   : > { %v1248_v59 = vpop.f32.mrf.mxu0 }
 0x1ad   : > { %v1301_v62 = vadd.f32 %v1298_v53, %v1292_v57  ;;  %v1320_v0 = vmul.f32 %v1308_v56, %v1300_v55 }
 0x1ae   : > { %v1249_v63 = vpop.f32.mrf.mxu0 }
 0x1af   : > { %v1321_v1 = vmul.f32 %v1312_v58, %v1301_v62 }
 0x1b1   : > { %v1517_v3 = vpack.c.bf16 %v1321_v1, %v1320_v0 }
 0x1b3   : > { %1334 = vrot.lane.b32.xlu1 %v1517_v3, %s1735_s27 }
 0x1b7   : > { %1336 = vrot.lane.b32.xlu1 %v1518_v4, %s1735_s27 }
 0x225   : > { %v1335_v5 = vpop.permute.xlu1 %1334 }
 0x226   : > { %v1338_v6 = vrot.slane %v1335_v5, 4 }
 0x228   : > { %v1340_v7 = vsel %vm1339_vm13, %v1338_v6, %v1335_v5 }
 0x229   : > { %1347 = vst.msk [vmem:[%s1862_s14] sm:$0xff] %vm1346_vm14, %v1340_v7  ;;  %v1337_v8 = vpop.permute.xlu1 %1336 }
 0x22a   : > { %v1341_v11 = vsel %vm1339_vm13, %v1338_v6, %v1337_v8 }
 0x22b   : > { %1349 = vst.msk [vmem:[%s1862_s14 + $0x8] sm:$0xf] %vm1348_vm15, %v1341_v11 }
 0x22c PF: > { %s14_s21 = sadd.s32 1, %s1722_s21   ;;  %s1992_s15 = smov %s1702_s16 }
 0x22d   : > { %p11_p12 = scmp.ge.s32.totalorder %s14_s21, 6   ;;  %s1993_s16 = smov %s1810_s26 }
 0x22e   : > { %s1994_s17 = smov %s1714_s19  ;;  %s1995_s18 = smov %s1718_s20 }
 0x22f   : > { %s1996_s19 = smov %s1999_s22  ;;  %s1997_s20 = smov %s2003_s23 }
 0x230   :  { %13 = sbr.rel (!%p11_p12) target bundleno = 4 (0x4), region = 126 }

// kernel: dcrnn_cell_forward.7
= control target key start
LH: loop header
LB: loop body
LE: loop exit
PB: predicated region body
PF: predicated region fallthrough
CT: control target
= control target key end

     0   :  { %s1627_s15 = smov 0   ;;  %s1629_s16 = smov 0   ;;  %s1836_s0 = inlined_call_operand.vmem [shape: bf16[9,8,11], index: 0, kind: input, shape index: {}]   ;;  %s1837_s1 = inlined_call_operand.vmem [shape: bf16[2,11,384], index: 1, kind: input, shape index: {}]   ;;  %s1838_s2 = inlined_call_operand.vmem [shape: f32[8,1], index: 2, kind: input, shape index: {}]   ;;  %s1839_s3 = inlined_call_operand.vmem [shape: f32[1,286], index: 3, kind: input, shape index: {}]   ;;  %s1840_s4 = inlined_call_operand.vmem [shape: bf16[2,8,384], index: 4, kind: output, shape index: {}]  }
   0x1   :  { %s1631_s17 = smov 0  }
   0x2 LB: > { %s26_s18 = sadd.s32 1, %s1583_s16  ;;  %p1411_p0 = scmp.ge.s32.totalorder %s1587_s17, 1  ;;  %s1587_s17 = sphi %s1631_s17, %s14_s17   ;;  %s1583_s16 = sphi %s1629_s16, %s1842_s16   ;;  %s1579_s15 = sphi %s1627_s15, %s1841_s15  }
   0x3   : > { %p28_p1 = scmp.ge.s32.totalorder %s26_s18, 2  ;;  %p194_p2 = scmp.lt.s32.totalorder %s1587_s17, 3 }
   0x5   : > { %s1844_s18 = smov (%p28_p1, %s26_s18), 0  ;;  %p195_p3 = pnand %p1411_p0, %p194_p2 }
   0x6   : > { %p236_p4 = scmp.lt.s32.totalorder (!%p195_p3), %s1579_s15, 1  ;;  %s1592_s23 = smov (!%p195_p3), 127  }
   0x7   : > { %198 = sbr.rel (%p195_p3) target bundleno = 534 (0x216), region = 36  ;;  %s1593_s24 = smov (!%p195_p3), 126  }
   0x8   : > { %s1594_s25 = smov (!%p195_p3), 110   ;;  %s1595_s26 = smov (!%p195_p3), 109  }
   0x9   : > { %s1596_s27 = smov (!%p195_p3), 108   ;;  %s1597_s28 = smov (!%p195_p3), 92  }
   0xa   : > { %s1598_s29 = smov (!%p195_p3), 91   ;;  %s1599_s30 = smov (!%p195_p3), 90  }
   0xb   : > { %s1601_s8 = smov (!%p195_p3), 19  }
   0xc   : > { %v1589_v0 = vmov 0.0   ;;  %s1846_s15 = smov (!%p236_p4, %s1579_s15), 1  ;;  %vm1590_vm0 = vmmov 0   ;;  %v1591_v1 = vmov 0   ;;  %v1226_v5 = vld [vmem:[%s1838_s2] sm:$0xff]  ;;  %vm290_vm1 = vcmask 1044480  }
   0xd   : > { %1467 = vmatprep.subr.bf16.mxu1 %v1589_v0  ;;  %s1521_s19 = smul.u32 24, %s1846_s15  ;;  %1469 = vmatprep.mubr.msk.bf16.mxu1 %vm1590_vm0, %v1589_v0  ;;  %vm283_vm2 = vcmask 1039360   ;;  %vm291_vm3 = vcmask 1045504   ;;  %v1600_v8 = vmov 65535   ;;  %vm485_vm4 = vcmask 1031168  }
   0xe   : > { %335 = vmatprep.mubr.bf16.mxu0 %v1591_v1  ;;  %1560 = vset.pattern.permute.xlu0 %v1591_v1  ;;  %v292_v9 = vsel %vm290_vm1, 4294967295, %v1600_v8  ;;  %v1414_v19 = vld [vmem:[%s1836_s0 + $0x4] sm:$0xf]  ;;  %vm286_vm5 = vcmask 89088   ;;  %vm592_vm6 = vcmask 900096   ;;  %vm699_vm7 = vcmask 891904  }
   0xf   : > { %s240_s22 = scalar_lea.vmem %s1837_s1, %s1521_s19  ;;  %v1689_v12 = vsel %vm291_vm3, %v292_v9, 0  ;;  %v257_v30 = vld [vmem:[%s1836_s0] sm:$0xf]  ;;  %v1422_v39 = vld [vmem:[%s1836_s0 + $0x8] sm:$0xf]  ;;  %vm806_vm8 = vcmask 883712  }
  0x10   : > { %v1656_v2 = vld [vmem:[%s240_s22 + $0x4] ss:$12 sps:$4 sm:$0x3f]   ;;  %v1658_v3 = vld [vmem:[%s240_s22] ss:$12 sps:$4 sm:$0x3f]  }
  0x11   : > { %279 = vrot.lane.b32.xlu0 %v1656_v2, %s1592_s23  ;;  %v1661_v4 = vld [vmem:[%s240_s22 + $0x8] ss:$12 sps:$4 sm:$0x3f]   ;;  %277 = vrot.lane.b32.xlu1 %v1658_v3, %s1592_s23  ;;  %v391_v17 = vand.u32 %v1656_v2, %v1689_v12  ;;  %v388_v24 = vand.u32 %v1658_v3, %v1689_v12  ;;  %v1425_v48 = vld [vmem:[%s1836_s0 + $0xc] sm:$0xf]  ;;  %vm913_vm9 = vcmask 752640  }
  0x12   : > { %v394_v20 = vand.u32 %v1661_v4, %v1689_v12  ;;  %v1428_v57 = vld [vmem:[%s1836_s0 + $0x10] sm:$0xf]  ;;  %vm1020_vm10 = vcmask 744448   ;;  %vm1127_vm11 = vcmask 736256   ;;  %vm1285_vm15 = vcmask 1043608  }
  0x13   : > { %vm1280_vm1 = vcmask 154624   ;;  %vm1289_vm3 = vcmask 396288  }
  0x15   : > { %281 = vrot.lane.b32.xlu0 %v1661_v4, %s1592_s23  ;;  %481 = vrot.lane.b32.xlu1 %v1656_v2, %s1593_s24 }
  0x19   : > { %483 = vrot.lane.b32.xlu0 %v1661_v4, %s1593_s24  ;;  %479 = vrot.lane.b32.xlu1 %v1658_v3, %s1593_s24 }
  0x1d   : > { %588 = vrot.lane.b32.xlu0 %v1656_v2, %s1594_s25  ;;  %590 = vrot.lane.b32.xlu1 %v1661_v4, %s1594_s25 }
  0x21   : > { %586 = vrot.lane.b32.xlu0 %v1658_v3, %s1594_s25  ;;  %695 = vrot.lane.b32.xlu1 %v1656_v2, %s1595_s26 }
  0x25   : > { %697 = vrot.lane.b32.xlu0 %v1661_v4, %s1595_s26  ;;  %693 = vrot.lane.b32.xlu1 %v1658_v3, %s1595_s26 }
  0x29   : > { %802 = vrot.lane.b32.xlu0 %v1656_v2, %s1596_s27  ;;  %804 = vrot.lane.b32.xlu1 %v1661_v4, %s1596_s27 }
  0x2d   : > { %800 = vrot.lane.b32.xlu0 %v1658_v3, %s1596_s27  ;;  %909 = vrot.lane.b32.xlu1 %v1656_v2, %s1597_s28 }
  0x31   : > { %911 = vrot.lane.b32.xlu0 %v1661_v4, %s1597_s28  ;;  %907 = vrot.lane.b32.xlu1 %v1658_v3, %s1597_s28 }
  0x35   : > { %1016 = vrot.lane.b32.xlu0 %v1656_v2, %s1598_s29  ;;  %1018 = vrot.lane.b32.xlu1 %v1661_v4, %s1598_s29 }
  0x39   : > { %1014 = vrot.lane.b32.xlu0 %v1658_v3, %s1598_s29  ;;  %1123 = vrot.lane.b32.xlu1 %v1656_v2, %s1599_s30  ;;  %s1522_s29 = smul.u32 12, %s1846_s15 }
  0x3b   : > { %s1816_s6 = scalar_lea.vmem %s1840_s4, %s1522_s29 }
  0x3c   : > { %255 = vst [vmem:[%s1816_s6] sm:$0xff] %v1591_v1  ;;  %256 = vst [vmem:[%s1816_s6 + $0x8] sm:$0xf] %v1591_v1 }
  0x3d   : > { %1125 = vrot.lane.b32.xlu0 %v1661_v4, %s1599_s30  ;;  %1121 = vrot.lane.b32.xlu1 %v1658_v3, %s1599_s30  ;;  %v1431_v4 = vld [vmem:[%s1836_s0 + $0x14] sm:$0xf] }
  0x41   : > { %1229 = vperm.xlu0 %1560, %v1226_v5  }
  0x83   : > { %v280_v6 = vpop.permute.xlu0 %279  ;;  %v278_v7 = vpop.permute.xlu1 %277 }
  0x84   : > { %v284_v10 = vsel %vm283_vm2, %v278_v7, %v280_v6 }
  0x85   : > { %v295_v18 = vand.u32 %v1689_v12, %v284_v10 }
  0x87   : > { %v282_v11 = vpop.permute.xlu0 %281  ;;  %v482_v15 = vpop.permute.xlu1 %481 }
  0x88   : > { %v301_v13 = vand.u32 %v1689_v12, %v282_v11  ;;  %v285_v14 = vsel %vm283_vm2, %v280_v6, %v282_v11 }
  0x89   : > { %v298_v16 = vand.u32 %v1689_v12, %v285_v14  ;;  %v1434_v14 = vld [vmem:[%s1836_s0 + $0x18] sm:$0xf] }
  0x8a   : > { %1468 = vmatpush3.bf16.msra.mxu1 %v301_v13 }
  0x8b   : > { %317 = vmatprep.subr.bf16.mxu0 %v298_v16  ;;  %v484_v21 = vpop.permute.xlu0 %483  ;;  %1473 = vmatprep.subr.bf16.mxu1 %v1589_v0  ;;  %v480_v23 = vpop.permute.xlu1 %479 }
  0x8c   : > { %318 = vmatpush1.bf16.msra.mxu0 %v295_v18  ;;  %v487_v22 = vsel %vm485_vm4, %v482_v15, %v484_v21  ;;  %v486_v28 = vsel %vm485_vm4, %v480_v23, %v482_v15  ;;  %v498_v29 = vand.u32 %v484_v21, %v1689_v12  ;;  %v1437_v21 = vld [vmem:[%s1836_s0 + $0x1c] sm:$0xf]  ;;  %v1440_v23 = vld [vmem:[%s1836_s0 + $0x20] sm:$0xf] }
  0x8d   : > { %1470 = vmatmul.mubr.msk.bf16.vlgmr.msra.gmra.mxu1 %vm286_vm5, %v1414_v19  ;;  %410 = vmatprep.subr.bf16.mxu0 %v391_v17  ;;  %v495_v25 = vand.u32 %v487_v22, %v1689_v12  ;;  %v492_v33 = vand.u32 %v486_v28, %v1689_v12 }
  0x8e   : > { %1474 = vmatpush3.bf16.msra.mxu1 %v394_v20  ;;  %1475 = vmatprep.mubr.msk.bf16.mxu1 %vm1590_vm0, %v1589_v0 }
  0x8f   : > { %1418 = vmatmul.mubr.msk.bf16.vlgmr.msra.gmra.mxu0 %vm286_vm5, %v1414_v19  ;;  %v589_v26 = vpop.permute.xlu0 %588  ;;  %1479 = vmatprep.subr.bf16.mxu1 %v1589_v0  ;;  %v591_v27 = vpop.permute.xlu1 %590 }
  0x90   : > { %411 = vmatpush1.bf16.msra.mxu0 %v388_v24  ;;  %428 = vmatprep.mubr.bf16.mxu0 %v1591_v1  ;;  %v594_v31 = vsel %vm592_vm6, %v589_v26, %v591_v27  ;;  %v605_v38 = vand.u32 %v591_v27, %v1689_v12 }
  0x91   : > { %514 = vmatprep.subr.bf16.mxu0 %v495_v25  ;;  %v602_v34 = vand.u32 %v594_v31, %v1689_v12 }
  0x93   : > { %v587_v32 = vpop.permute.xlu0 %586  ;;  %v696_v35 = vpop.permute.xlu1 %695 }
  0x94   : > { %v593_v37 = vsel %vm592_vm6, %v587_v32, %v589_v26 }
  0x95   : > { %1476 = vmatmul.mubr.msk.bf16.vlgmr.msra.gmra.mxu1 %vm286_vm5, %v257_v30  ;;  %v599_v42 = vand.u32 %v593_v37, %v1689_v12 }
  0x96   : > { %1480 = vmatpush3.bf16.msra.mxu1 %v498_v29  ;;  %1481 = vmatprep.mubr.msk.bf16.mxu1 %vm1590_vm0, %v1589_v0 }
  0x97   : > { %1420 = vmatmul.mubr.msk.bf16.vlgmr.msra.gmra.mxu0 %vm286_vm5, %v257_v30  ;;  %1485 = vmatprep.subr.bf16.mxu1 %v1589_v0  ;;  %v698_v36 = vpop.permute.xlu0 %697  ;;  %v694_v41 = vpop.permute.xlu1 %693 }
  0x98   : > { %515 = vmatpush1.bf16.msra.mxu0 %v492_v33  ;;  %532 = vmatprep.mubr.bf16.mxu0 %v1591_v1  ;;  %v701_v40 = vsel %vm699_vm7, %v696_v35, %v698_v36  ;;  %v700_v46 = vsel %vm699_vm7, %v694_v41, %v696_v35  ;;  %v712_v47 = vand.u32 %v698_v36, %v1689_v12 }
  0x99   : > { %621 = vmatprep.subr.bf16.mxu0 %v602_v34  ;;  %v709_v43 = vand.u32 %v701_v40, %v1689_v12  ;;  %v706_v51 = vand.u32 %v700_v46, %v1689_v12 }
  0x9b   : > { %v803_v44 = vpop.permute.xlu0 %802  ;;  %v805_v45 = vpop.permute.xlu1 %804 }
  0x9c   : > { %v808_v49 = vsel %vm806_vm8, %v803_v44, %v805_v45  ;;  %v819_v56 = vand.u32 %v805_v45, %v1689_v12 }
  0x9d   : > { %1482 = vmatmul.mubr.msk.bf16.vlgmr.msra.gmra.mxu1 %vm286_vm5, %v1422_v39  ;;  %v816_v52 = vand.u32 %v808_v49, %v1689_v12 }
  0x9e   : > { %1486 = vmatpush3.bf16.msra.mxu1 %v605_v38  ;;  %1487 = vmatprep.mubr.msk.bf16.mxu1 %vm1590_vm0, %v1589_v0 }
  0x9f   : > { %1423 = vmatmul.mubr.msk.bf16.vlgmr.msra.gmra.mxu0 %vm286_vm5, %v1422_v39  ;;  %1491 = vmatprep.subr.bf16.mxu1 %v1589_v0  ;;  %v801_v50 = vpop.permute.xlu0 %800  ;;  %v910_v53 = vpop.permute.xlu1 %909 }
  0xa0   : > { %622 = vmatpush1.bf16.msra.mxu0 %v599_v42  ;;  %639 = vmatprep.mubr.bf16.mxu0 %v1591_v1  ;;  %v807_v55 = vsel %vm806_vm8, %v801_v50, %v803_v44 }
  0xa1   : > { %728 = vmatprep.subr.bf16.mxu0 %v709_v43  ;;  %v813_v60 = vand.u32 %v807_v55, %v1689_v12 }
  0xa3   : > { %v912_v54 = vpop.permute.xlu0 %911  ;;  %v908_v59 = vpop.permute.xlu1 %907 }
  0xa4   : > { %v915_v58 = vsel %vm913_vm9, %v910_v53, %v912_v54  ;;  %v914_v2 = vsel %vm913_vm9, %v908_v59, %v910_v53  ;;  %v926_v3 = vand.u32 %v912_v54, %v1689_v12 }
  0xa5   : > { %1488 = vmatmul.mubr.msk.bf16.vlgmr.msra.gmra.mxu1 %vm286_vm5, %v1425_v48  ;;  %v923_v61 = vand.u32 %v915_v58, %v1689_v12  ;;  %v920_v7 = vand.u32 %v914_v2, %v1689_v12 }
  0xa6   : > { %1492 = vmatpush3.bf16.msra.mxu1 %v712_v47  ;;  %1493 = vmatprep.mubr.msk.bf16.mxu1 %vm1590_vm0, %v1589_v0 }
  0xa7   : > { %1426 = vmatmul.mubr.msk.bf16.vlgmr.msra.gmra.mxu0 %vm286_vm5, %v1425_v48  ;;  %1497 = vmatprep.subr.bf16.mxu1 %v1589_v0  ;;  %v1017_v62 = vpop.permute.xlu0 %1016  ;;  %v1019_v63 = vpop.permute.xlu1 %1018 }
  0xa8   : > { %729 = vmatpush1.bf16.msra.mxu0 %v706_v51  ;;  %746 = vmatprep.mubr.bf16.mxu0 %v1591_v1  ;;  %v1022_v5 = vsel %vm1020_vm10, %v1017_v62, %v1019_v63  ;;  %v1033_v13 = vand.u32 %v1019_v63, %v1689_v12 }
  0xa9   : > { %835 = vmatprep.subr.bf16.mxu0 %v816_v52  ;;  %v1030_v8 = vand.u32 %v1022_v5, %v1689_v12 }
  0xab   : > { %v1015_v6 = vpop.permute.xlu0 %1014  ;;  %v1124_v10 = vpop.permute.xlu1 %1123 }
  0xac   : > { %v1021_v11 = vsel %vm1020_vm10, %v1015_v6, %v1017_v62 }
  0xad   : > { %1494 = vmatmul.mubr.msk.bf16.vlgmr.msra.gmra.mxu1 %vm286_vm5, %v1428_v57  ;;  %v1027_v16 = vand.u32 %v1021_v11, %v1689_v12 }
  0xae   : > { %1498 = vmatpush3.bf16.msra.mxu1 %v819_v56  ;;  %1499 = vmatprep.mubr.msk.bf16.mxu1 %vm1590_vm0, %v1589_v0 }
  0xaf   : > { %1429 = vmatmul.mubr.msk.bf16.vlgmr.msra.gmra.mxu0 %vm286_vm5, %v1428_v57  ;;  %1503 = vmatprep.subr.bf16.mxu1 %v1589_v0  ;;  %v1126_v9 = vpop.permute.xlu0 %1125  ;;  %v1122_v18 = vpop.permute.xlu1 %1121 }
  0xb0   : > { %836 = vmatpush1.bf16.msra.mxu0 %v813_v60  ;;  %853 = vmatprep.mubr.bf16.mxu0 %v1591_v1  ;;  %v1129_v15 = vsel %vm1127_vm11, %v1124_v10, %v1126_v9  ;;  %v1128_v19 = vsel %vm1127_vm11, %v1122_v18, %v1124_v10  ;;  %v1140_v20 = vand.u32 %v1126_v9, %v1689_v12 }
  0xb1   : > { %942 = vmatprep.subr.bf16.mxu0 %v923_v61  ;;  %v1137_v17 = vand.u32 %v1129_v15, %v1689_v12  ;;  %v1134_v22 = vand.u32 %v1128_v19, %v1689_v12 }
  0xb5   : > { %1500 = vmatmul.mubr.msk.bf16.vlgmr.msra.gmra.mxu1 %vm286_vm5, %v1431_v4 }
  0xb6   : > { %1504 = vmatpush3.bf16.msra.mxu1 %v926_v3  ;;  %1505 = vmatprep.mubr.msk.bf16.mxu1 %vm1590_vm0, %v1589_v0 }
  0xb7   : > { %1432 = vmatmul.mubr.msk.bf16.vlgmr.msra.gmra.mxu0 %vm286_vm5, %v1431_v4  ;;  %1509 = vmatprep.subr.bf16.mxu1 %v1589_v0 }
  0xb8   : > { %943 = vmatpush1.bf16.msra.mxu0 %v920_v7  ;;  %960 = vmatprep.mubr.bf16.mxu0 %v1591_v1 }
  0xb9   : > { %1049 = vmatprep.subr.bf16.mxu0 %v1030_v8 }
  0xbd   : > { %1506 = vmatmul.mubr.msk.bf16.vlgmr.msra.gmra.mxu1 %vm286_vm5, %v1434_v14 }
  0xbe   : > { %1510 = vmatpush3.bf16.msra.mxu1 %v1033_v13  ;;  %1511 = vmatprep.mubr.msk.bf16.mxu1 %vm1590_vm0, %v1589_v0 }
  0xbf   : > { %1435 = vmatmul.mubr.msk.bf16.vlgmr.msra.gmra.mxu0 %vm286_vm5, %v1434_v14  ;;  %1515 = vmatprep.subr.bf16.mxu1 %v1589_v0 }
  0xc0   : > { %1050 = vmatpush1.bf16.msra.mxu0 %v1027_v16  ;;  %1067 = vmatprep.mubr.bf16.mxu0 %v1591_v1 }
  0xc1   : > { %1156 = vmatprep.subr.bf16.mxu0 %v1137_v17 }
  0xc5   : > { %1512 = vmatmul.mubr.msk.bf16.vlgmr.msra.gmra.mxu1 %vm286_vm5, %v1437_v21 }
  0xc6   : > { %1516 = vmatpush3.bf16.msra.mxu1 %v1140_v20  ;;  %1517 = vmatprep.mubr.msk.bf16.mxu1 %vm1590_vm0, %v1589_v0  ;;  %vm1286_vm0 = vcmask 1047556  }
  0xc7   : > { %1438 = vmatmul.mubr.msk.bf16.vlgmr.msra.gmra.mxu0 %vm286_vm5, %v1437_v21  ;;  %vm1287_vm2 = vmor %vm1286_vm0, %vm1285_vm15 }
  0xc8   : > { %1157 = vmatpush1.bf16.msra.mxu0 %v1134_v22  ;;  %1174 = vmatprep.mubr.bf16.mxu0 %v1591_v1 }
  0xcd   : > { %1518 = vmatmul.mubr.msk.bf16.vlgmr.msra.gmra.mxu1 %vm286_vm5, %v1440_v23 }
  0xcf   : > { %1441 = vmatmul.mubr.msk.bf16.vlgmr.msra.gmra.mxu0 %vm286_vm5, %v1440_v23 }
 0x14d   : > { %v378_v0 = vpop.f32.mrf.mxu1 }
 0x14f   : > { %v337_v12 = vpop.f32.mrf.mxu0  ;;  %v1471_v24 = vpop.f32.mrf.mxu1 }
 0x151   : > { %v339_v25 = vpop.f32.mrf.mxu0  ;;  %v381_v26 = vpop.f32.mrf.mxu1 }
 0x153   : > { %v341_v27 = vpop.f32.mrf.mxu0  ;;  %v1472_v28 = vpop.f32.mrf.mxu1 }
 0x155   : > { %v342_v29 = vpop.f32.mrf.mxu0  ;;  %v471_v30 = vpop.f32.mrf.mxu1 }
 0x156   : > { %v472_v10 = vadd.f32 %v471_v30, %v378_v0 }
 0x157   : > { %v430_v31 = vpop.f32.mrf.mxu0  ;;  %v1477_v32 = vpop.f32.mrf.mxu1 }
 0x158   : > { %v431_v14 = vadd.f32 %v430_v31, %v337_v12 }
 0x159   : > { %v432_v33 = vpop.f32.mrf.mxu0  ;;  %v474_v34 = vpop.f32.mrf.mxu1 }
 0x15a   : > { %v433_v18 = vadd.f32 %v432_v33, %v339_v25  ;;  %v1246_v25 = vlaneseq }
 0x15b   : > { %v434_v35 = vpop.f32.mrf.mxu0  ;;  %v1478_v36 = vpop.f32.mrf.mxu1 }
 0x15d   : > { %v435_v37 = vpop.f32.mrf.mxu0  ;;  %v575_v38 = vpop.f32.mrf.mxu1 }
 0x15e   : > { %v583_v15 = vadd.f32 %v575_v38, %v472_v10 }
 0x15f   : > { %v534_v39 = vpop.f32.mrf.mxu0  ;;  %v1483_v40 = vpop.f32.mrf.mxu1 }
 0x160   : > { %v581_v19 = vadd.f32 %v534_v39, %v431_v14  ;;  %v1230_v40 = vpop.permute.xlu0 %1229 }
 0x161   : > { %v536_v1 = vpop.f32.mrf.mxu0  ;;  %v578_v41 = vpop.f32.mrf.mxu1 }
 0x162   : > { %v582_v23 = vadd.f32 %v536_v1, %v433_v18 }
 0x163   : > { %v538_v42 = vpop.f32.mrf.mxu0  ;;  %v1484_v43 = vpop.f32.mrf.mxu1 }
 0x165   : > { %v539_v44 = vpop.f32.mrf.mxu0  ;;  %v682_v45 = vpop.f32.mrf.mxu1 }
 0x166   : > { %v690_v20 = vadd.f32 %v682_v45, %v583_v15 }
 0x167   : > { %v641_v46 = vpop.f32.mrf.mxu0  ;;  %v1489_v47 = vpop.f32.mrf.mxu1 }
 0x168   : > { %v688_v24 = vadd.f32 %v641_v46, %v581_v19  ;;  %v1247_v47 = vshrl.u32 %v1246_v25, 7 }
 0x169   : > { %v643_v48 = vpop.f32.mrf.mxu0  ;;  %v685_v49 = vpop.f32.mrf.mxu1 }
 0x16a   : > { %v689_v29 = vadd.f32 %v643_v48, %v582_v23 }
 0x16b   : > { %v645_v50 = vpop.f32.mrf.mxu0  ;;  %v1490_v51 = vpop.f32.mrf.mxu1 }
 0x16d   : > { %v646_v52 = vpop.f32.mrf.mxu0  ;;  %v789_v53 = vpop.f32.mrf.mxu1 }
 0x16e   : > { %v797_v26 = vadd.f32 %v789_v53, %v690_v20  ;;  %v1248_v53 = vsub.s32 0, %v1247_v47 }
 0x16f   : > { %v748_v54 = vpop.f32.mrf.mxu0  ;;  %v1495_v55 = vpop.f32.mrf.mxu1 }
 0x170   : > { %v795_v32 = vadd.f32 %v748_v54, %v688_v24  ;;  %v1252_v54 = vsub.s32 1, %v1247_v47 }
 0x171   : > { %v750_v56 = vpop.f32.mrf.mxu0  ;;  %v792_v57 = vpop.f32.mrf.mxu1 }
 0x172   : > { %v796_v35 = vadd.f32 %v750_v56, %v689_v29 }
 0x173   : > { %v752_v58 = vpop.f32.mrf.mxu0  ;;  %v1496_v59 = vpop.f32.mrf.mxu1 }
 0x174   : > { %v1244_v59 = vld [vmem:[%s1839_s3] sm:$0x7] }
 0x175   : > { %v753_v60 = vpop.f32.mrf.mxu0  ;;  %v896_v61 = vpop.f32.mrf.mxu1 }
 0x176   : > { %v904_v34 = vadd.f32 %v896_v61, %v797_v26  ;;  %v1256_v60 = vsub.s32 2, %v1247_v47 }
 0x177   : > { %v855_v62 = vpop.f32.mrf.mxu0  ;;  %v1501_v63 = vpop.f32.mrf.mxu1 }
 0x178   : > { %v902_v12 = vadd.f32 %v855_v62, %v795_v32 }
 0x179   : > { %v857_v2 = vpop.f32.mrf.mxu0  ;;  %v899_v3 = vpop.f32.mrf.mxu1 }
 0x17a   : > { %v903_v33 = vadd.f32 %v857_v2, %v796_v35  ;;  %v1249_v3 = vrot.slane %v1244_v59, %v1248_v53 }
 0x17b   : > { %v859_v4 = vpop.f32.mrf.mxu0  ;;  %v1502_v5 = vpop.f32.mrf.mxu1 }
 0x17c   : > { %v1253_v4 = vrot.slane %v1244_v59, %v1252_v54 }
 0x17d   : > { %v860_v6 = vpop.f32.mrf.mxu0  ;;  %v1003_v7 = vpop.f32.mrf.mxu1 }
 0x17e   : > { %v1011_v31 = vadd.f32 %v1003_v7, %v904_v34  ;;  %v1257_v7 = vrot.slane %v1244_v59, %v1256_v60 }
 0x17f   : > { %v962_v8 = vpop.f32.mrf.mxu0  ;;  %v1507_v9 = vpop.f32.mrf.mxu1 }
 0x180   : > { %v1009_v38 = vadd.f32 %v962_v8, %v902_v12 }
 0x181   : > { %v964_v11 = vpop.f32.mrf.mxu0  ;;  %v1006_v13 = vpop.f32.mrf.mxu1 }
 0x182   : > { %v1010_v42 = vadd.f32 %v964_v11, %v903_v33 }
 0x183   : > { %v966_v16 = vpop.f32.mrf.mxu0  ;;  %v1508_v17 = vpop.f32.mrf.mxu1 }
 0x185   : > { %v967_v21 = vpop.f32.mrf.mxu0  ;;  %v1110_v22 = vpop.f32.mrf.mxu1 }
 0x186   : > { %v1118_v39 = vadd.f32 %v1110_v22, %v1011_v31 }
 0x187   : > { %v1069_v27 = vpop.f32.mrf.mxu0  ;;  %v1513_v28 = vpop.f32.mrf.mxu1 }
 0x188   : > { %v1116_v43 = vadd.f32 %v1069_v27, %v1009_v38 }
 0x189   : > { %v1071_v0 = vpop.f32.mrf.mxu0  ;;  %v1113_v30 = vpop.f32.mrf.mxu1 }
 0x18a   : > { %v1117_v48 = vadd.f32 %v1071_v0, %v1010_v42 }
 0x18b   : > { %v1073_v36 = vpop.f32.mrf.mxu0  ;;  %v1514_v37 = vpop.f32.mrf.mxu1 }
 0x18d   : > { %v1074_v1 = vpop.f32.mrf.mxu0  ;;  %v1217_v41 = vpop.f32.mrf.mxu1 }
 0x18e   : > { %v1225_v44 = vadd.f32 %v1217_v41, %v1118_v39 }
 0x18f   : > { %v1176_v45 = vpop.f32.mrf.mxu0  ;;  %v1519_v46 = vpop.f32.mrf.mxu1 }
 0x190   : > { %v1234_v49 = vadd.f32 %v1230_v40, %v1225_v44  ;;  %v1223_v50 = vadd.f32 %v1176_v45, %v1116_v43 }
 0x191   : > { %v1178_v51 = vpop.f32.mrf.mxu0  ;;  %v1220_v52 = vpop.f32.mrf.mxu1 }
 0x192   : > { %v1232_v55 = vadd.f32 %v1230_v40, %v1223_v50  ;;  %v1224_v56 = vadd.f32 %v1178_v51, %v1117_v48  ;;  %v1240_v61 = vmul.f32 0.01, %v1234_v49  ;;  %vm1237_vm13 = vcmp.ge.f32.partialorder %v1234_v49, 0.0 }
 0x193   : > { %v1180_v57 = vpop.f32.mrf.mxu0  ;;  %v1520_v58 = vpop.f32.mrf.mxu1 }
 0x194   : > { %vm1235_vm12 = vcmp.ge.f32.partialorder %v1232_v55, 0.0  ;;  %v1238_v62 = vmul.f32 0.01, %v1232_v55  ;;  %v1233_v63 = vadd.f32 %v1230_v40, %v1224_v56  ;;  %v1243_v9 = vsel %vm1237_vm13, %v1234_v49, %v1240_v61 }
 0x195   : > { %v1181_v2 = vpop.f32.mrf.mxu0  ;;  %v1263_v14 = vmul.f32 %v1257_v7, %v1243_v9 }
 0x196   : > { %vm1236_vm14 = vcmp.ge.f32.partialorder %v1233_v63, 0.0  ;;  %v1239_v5 = vmul.f32 0.01, %v1233_v63  ;;  %v1241_v6 = vsel %vm1235_vm12, %v1232_v55, %v1238_v62 }
 0x197   : > { %v1261_v10 = vmul.f32 %v1249_v3, %v1241_v6  ;;  %v1448_v15 = vpack.c.bf16 %v1263_v14, %v1263_v14 }
 0x198   : > { %v1242_v8 = vsel %vm1236_vm14, %v1233_v63, %v1239_v5 }
 0x199   : > { %v1262_v11 = vmul.f32 %v1253_v4, %v1242_v8 }
 0x19b   : > { %v1447_v13 = vpack.c.bf16 %v1262_v11, %v1261_v10 }
 0x19d   : > { %1275 = vrot.lane.b32.xlu1 %v1447_v13, %s1601_s8 }
 0x1a1   : > { %1277 = vrot.lane.b32.xlu1 %v1448_v15, %s1601_s8 }
 0x20f   : > { %v1276_v16 = vpop.permute.xlu1 %1275 }
 0x210   : > { %v1279_v17 = vrot.slane %v1276_v16, 4 }
 0x212   : > { %v1281_v18 = vsel %vm1280_vm1, %v1279_v17, %v1276_v16 }
 0x213   : > { %1288 = vst.msk [vmem:[%s1816_s6] sm:$0xff] %vm1287_vm2, %v1281_v18  ;;  %v1278_v19 = vpop.permute.xlu1 %1277 }
 0x214   : > { %v1282_v20 = vsel %vm1280_vm1, %v1279_v17, %v1278_v19 }
 0x215   : > { %1290 = vst.msk [vmem:[%s1816_s6 + $0x8] sm:$0xf] %vm1289_vm3, %v1282_v20 }
 0x216 PF: > { %s14_s17 = sadd.s32 1, %s1587_s17   ;;  %s1841_s15 = smov %s1583_s16 }
 0x217   : > { %p11_p5 = scmp.ge.s32.totalorder %s14_s17, 4   ;;  %s1842_s16 = smov %s1844_s18 }
 0x219   :  { %13 = sbr.rel (!%p11_p5) target bundleno = 2 (0x2), region = 80 }

// kernel: dcrnn_cell_forward.10
= control target key start
LH: loop header
LB: loop body
LE: loop exit
PB: predicated region body
PF: predicated region fallthrough
CT: control target
= control target key end

     0   :  { %s1922_s15 = smov 0   ;;  %s1924_s16 = smov 0   ;;  %s2148_s0 = inlined_call_operand.vmem [shape: bf16[9,32,16], index: 0, kind: input, shape index: {}]   ;;  %s2149_s1 = inlined_call_operand.vmem [shape: bf16[2,16,384], index: 1, kind: input, shape index: {}]   ;;  %s2150_s2 = inlined_call_operand.vmem [shape: f32[32,1], index: 2, kind: input, shape index: {}]   ;;  %s2151_s3 = inlined_call_operand.vmem [shape: f32[1,286], index: 3, kind: input, shape index: {}]   ;;  %s2152_s4 = inlined_call_operand.vmem [shape: bf16[2,32,384], index: 4, kind: output, shape index: {}]  }
   0x1   :  { %s1926_s17 = smov 0   ;;  %s1928_s18 = smov 0  }
   0x2   :  { %s1930_s19 = smov 0   ;;  %s1932_s20 = smov 0  }
   0x3   :  { %s1934_s21 = smov 0  }
   0x4 LB: > { %s23_s22 = sadd.s32 1, %s1875_s19  ;;  %s26_s23 = sadd.s32 1, %s1879_s20  ;;  %s1883_s21 = sphi %s1934_s21, %s14_s21   ;;  %s1879_s20 = sphi %s1932_s20, %s2158_s20   ;;  %s1875_s19 = sphi %s1930_s19, %s2157_s19   ;;  %s1871_s18 = sphi %s1928_s18, %s2156_s18   ;;  %s1867_s17 = sphi %s1926_s17, %s2155_s17   ;;  %s1863_s16 = sphi %s1924_s16, %s2154_s16   ;;  %s1859_s15 = sphi %s1922_s15, %s2153_s15  }
   0x5   : > { %p24_p0 = scmp.ge.s32.totalorder %s23_s22, 2  ;;  %s33_s24 = sadd.s32 1, %s1863_s16 }
   0x6   : > { %p40_p1 = scmp.ne.s32.totalorder %s1863_s16, %s1859_s15  ;;  %p41_p2 = scmp.eq.s32.totalorder %s1883_s21, 0 }
   0x7   : > { %s2160_s22 = smov (%p24_p0, %s23_s22), 0  ;;  %s2162_s23 = smov (!%p24_p0, %s26_s23), %s1879_s20 }
   0x8   : > { %s30_s25 = ssub.s32 %s1875_s19, %s2160_s22  ;;  %p42_p3 = por %p41_p2, %p40_p1 }
   0x9   : > { %p28_p4 = scmp.ge.s32.totalorder %s2162_s23, 2  ;;  %p31_p5 = scmp.eq.s32.totalorder %s30_s25, 0 }
   0xa   : > { %p1603_p6 = scmp.ge.s32.totalorder %s1883_s21, 4 }
   0xb   : > { %s2164_s23 = smov (%p28_p4, %s2162_s23), 0 }
   0xc   : > { %s1971_s26 = scalar_select %p31_p5, %s1863_s16, %s33_s24  }
   0xd   : > { %170 = sbr.rel (%p1603_p6) target bundleno = 27 (0x1b), region = 20 }
  0x12   : > { %173 = sbr.rel (!%p42_p3) target bundleno = 27 (0x1b), region = 24  ;;  %s175_s27 = sand.u32 (%p42_p3), 1, %s1863_s16  }
  0x13   : > { %s1664_s28 = sshll.u32 (%p42_p3), %s1875_s19, 3  ;;  %s1741_s29 = smul.u32 (%p42_p3), 72, %s175_s27 }
  0x14   : > { %s180_s6 = scalar_lea.vmem (%p42_p3), %s2148_s0, %s1664_s28 }
  0x15   : > { %v197_v0 = vld [vmem:[%s180_s6] sm:$0xff] (%p42_p3)   ;;  %v201_v1 = vld [vmem:[%s180_s6 + $0x10] sm:$0xff] (%p42_p3)   ;;  %s177_s7 = scalar_lea.vmem (%p42_p3), [#allocation2], %s1741_s29 }
  0x16   : > { %v205_v2 = vld [vmem:[%s180_s6 + $0x20] sm:$0xff] (%p42_p3)   ;;  %v209_v3 = vld [vmem:[%s180_s6 + $0x30] sm:$0xff] (%p42_p3)   ;;  %198 = vst [vmem:[%s177_s7] sm:$0xff] (%p42_p3), %v197_v0   ;;  %202 = vst [vmem:[%s177_s7 + $0x8] sm:$0xff] (%p42_p3), %v201_v1  }
  0x17   : > { %v213_v4 = vld [vmem:[%s180_s6 + $0x40] sm:$0xff]   ;;  %v217_v5 = vld [vmem:[%s180_s6 + $0x50] sm:$0xff]   ;;  %206 = vst [vmem:[%s177_s7 + $0x10] sm:$0xff] %v205_v2   ;;  %210 = vst [vmem:[%s177_s7 + $0x18] sm:$0xff] %v209_v3  }
  0x18   : > { %214 = vst [vmem:[%s177_s7 + $0x20] sm:$0xff] %v213_v4   ;;  %218 = vst [vmem:[%s177_s7 + $0x28] sm:$0xff] %v217_v5   ;;  %v221_v6 = vld [vmem:[%s180_s6 + $0x60] sm:$0xff]   ;;  %v225_v7 = vld [vmem:[%s180_s6 + $0x70] sm:$0xff]  }
  0x19   : > { %v229_v8 = vld [vmem:[%s180_s6 + $0x80] sm:$0xff]   ;;  %222 = vst [vmem:[%s177_s7 + $0x30] sm:$0xff] %v221_v6   ;;  %226 = vst [vmem:[%s177_s7 + $0x38] sm:$0xff] %v225_v7  }
  0x1a   : > { %230 = vst [vmem:[%s177_s7 + $0x40] sm:$0xff] %v229_v8  }
  0x1b PF: > { %p1606_p7 = scmp.ge.s32.totalorder %s1883_s21, 1  ;;  %p308_p8 = scmp.lt.s32.totalorder %s1883_s21, 5 }
  0x1d   : > { %p309_p9 = pnand %p1606_p7, %p308_p8 }
  0x1e   : > { %p356_p10 = scmp.lt.s32.totalorder (!%p309_p9), %s1871_s18, 1  ;;  %s315_s12 = sand.u32 (!%p309_p9), 1, %s1859_s15  }
  0x1f   : > { %312 = sbr.rel (%p309_p9) target bundleno = 557 (0x22d), region = 73  ;;  %s1888_s14 = smov (!%p309_p9), 127  }
  0x20   : > { %s1742_s13 = smul.u32 (!%p309_p9), 72, %s315_s12  ;;  %s1889_s25 = smov (!%p309_p9), 126  }
  0x21   : > { %s1890_s15 = smov (!%p309_p9), 110   ;;  %s1891_s27 = smov (!%p309_p9), 109  }
  0x22   : > { %s2004_s24 = scalar_lea.vmem (!%p309_p9), [#allocation2], %s1742_s13  ;;  %s1892_s28 = smov (!%p309_p9), 108  }
  0x23   : > { %s1893_s29 = smov (!%p309_p9), 92   ;;  %s1894_s30 = smov (!%p309_p9), 91  }
  0x24   : > { %v1885_v9 = vmov 0.0   ;;  %s2166_s18 = smov (!%p356_p10, %s1871_s18), 1  ;;  %vm1886_vm0 = vmmov 0   ;;  %v1887_v10 = vmov 0   ;;  %s1895_s5 = smov 90   ;;  %vm416_vm1 = vcmask 1039360  }
  0x25   : > { %1687 = vmatprep.subr.bf16.mxu1 %v1885_v9  ;;  %1689 = vmatprep.mubr.msk.bf16.mxu1 %vm1886_vm0, %v1885_v9  ;;  %s1743_s8 = smul.u32 24, %s2166_s18  ;;  %s1608_s6 = sshll.u32 %s1867_s17, 1  ;;  %v1820_v19 = vld [vmem:[%s2004_s24 + $0x8] sm:$0xff]   ;;  %vm422_vm2 = vcmask 130048   ;;  %vm619_vm3 = vcmask 1031168   ;;  %v1821_v26 = vld [vmem:[%s2004_s24] sm:$0xff]  }
  0x26   : > { %458 = vmatprep.mubr.bf16.mxu0 %v1887_v10  ;;  %1814 = vset.pattern.permute.xlu0 %v1887_v10  ;;  %p362_p11 = scmp.lt.s32.totalorder %s1608_s6, 3  ;;  %s1745_s7 = smul.u32 12, %s2166_s18  ;;  %vm732_vm4 = vcmask 900096   ;;  %v1822_v32 = vld [vmem:[%s2004_s24 + $0x10] sm:$0xff]   ;;  %vm845_vm5 = vcmask 891904   ;;  %v1823_v38 = vld [vmem:[%s2004_s24 + $0x18] sm:$0xff]  }
  0x27   : > { %1815 = vset.pattern.permute.xlu1 %v1887_v10  ;;  %s360_s11 = scalar_lea.vmem %s2149_s1, %s1743_s8  ;;  %vm958_vm6 = vcmask 883712   ;;  %v1824_v44 = vld [vmem:[%s2004_s24 + $0x20] sm:$0xff]   ;;  %vm1071_vm7 = vcmask 752640   ;;  %v1825_v50 = vld [vmem:[%s2004_s24 + $0x28] sm:$0xff]   ;;  %vm1184_vm8 = vcmask 744448   ;;  %v1826_v56 = vld [vmem:[%s2004_s24 + $0x30] sm:$0xff]  }
  0x28   : > { %v1996_v11 = vld [vmem:[%s360_s11 + $0x4] ss:$12 sps:$4 sm:$0xff]   ;;  %v1998_v12 = vld [vmem:[%s360_s11] ss:$12 sps:$4 sm:$0xff]   ;;  %v2001_v13 = vld [vmem:[%s360_s11 + $0x8] ss:$12 sps:$4 sm:$0xff]  }
  0x29   : > { %412 = vrot.lane.b32.xlu0 %v1996_v11, %s1888_s14  ;;  %410 = vrot.lane.b32.xlu1 %v1998_v12, %s1888_s14  ;;  %s2168_s6 = smov (!%p362_p11, %s1608_s6), 3  ;;  %vm1297_vm9 = vcmask 736256   ;;  %v1827_v61 = vld [vmem:[%s2004_s24 + $0x38] sm:$0xff]   ;;  %v1828_v0 = vld [vmem:[%s2004_s24 + $0x40] sm:$0xff]   ;;  %vm1472_vm10 = vcmask 1043608   ;;  %vm1473_vm11 = vcmask 1047556  }
  0x2a   : > { %s1609_s8 = sshll.u32 %s2168_s6, 3  ;;  %s1744_s9 = smul.u32 3, %s2168_s6  ;;  %vm1463_vm12 = vcmask 154624   ;;  %vm1474_vm13 = vmor %vm1473_vm11, %vm1472_vm10  ;;  %vm1476_vm14 = vcmask 396288  }
  0x2b   : > { %s365_s12 = scalar_lea.vmem %s2150_s2, %s1609_s8 }
  0x2c   : > { %s374_s13 = sadd.s32 %s1745_s7, %s1744_s9  ;;  %v1396_v14 = vld [vmem:[%s365_s12] sm:$0xff]  ;;  %v1397_v15 = vld [vmem:[%s365_s12 + $0x8] sm:$0xff] }
  0x2d   : > { %414 = vrot.lane.b32.xlu0 %v2001_v13, %s1888_s14  ;;  %615 = vrot.lane.b32.xlu1 %v1996_v11, %s1889_s25  ;;  %s1611_s14 = sshll.u32 %s374_s13, 2 }
  0x2e   : > { %s2036_s17 = scalar_lea.vmem %s2152_s4, %s1611_s14 }
  0x2f   : > { %379 = vst [vmem:[%s2036_s17] sm:$0xff] %v1887_v10  ;;  %380 = vst [vmem:[%s2036_s17 + $0x8] sm:$0xf] %v1887_v10 }
  0x30   : > { %381 = vst [vmem:[%s2036_s17 + $0xc] sm:$0xff] %v1887_v10  ;;  %382 = vst [vmem:[%s2036_s17 + $0x14] sm:$0xf] %v1887_v10 }
  0x31   : > { %617 = vrot.lane.b32.xlu0 %v2001_v13, %s1889_s25  ;;  %613 = vrot.lane.b32.xlu1 %v1998_v12, %s1889_s25 }
  0x35   : > { %728 = vrot.lane.b32.xlu0 %v1996_v11, %s1890_s15  ;;  %730 = vrot.lane.b32.xlu1 %v2001_v13, %s1890_s15 }
  0x39   : > { %726 = vrot.lane.b32.xlu0 %v1998_v12, %s1890_s15  ;;  %841 = vrot.lane.b32.xlu1 %v1996_v11, %s1891_s27 }
  0x3d   : > { %843 = vrot.lane.b32.xlu0 %v2001_v13, %s1891_s27  ;;  %839 = vrot.lane.b32.xlu1 %v1998_v12, %s1891_s27  ;;  %s1896_s27 = smov 19  }
  0x41   : > { %954 = vrot.lane.b32.xlu0 %v1996_v11, %s1892_s28  ;;  %956 = vrot.lane.b32.xlu1 %v2001_v13, %s1892_s28 }
  0x45   : > { %952 = vrot.lane.b32.xlu0 %v1998_v12, %s1892_s28  ;;  %1067 = vrot.lane.b32.xlu1 %v1996_v11, %s1893_s29 }
  0x49   : > { %1069 = vrot.lane.b32.xlu0 %v2001_v13, %s1893_s29  ;;  %1065 = vrot.lane.b32.xlu1 %v1998_v12, %s1893_s29 }
  0x4d   : > { %1180 = vrot.lane.b32.xlu0 %v1996_v11, %s1894_s30  ;;  %1182 = vrot.lane.b32.xlu1 %v2001_v13, %s1894_s30 }
  0x51   : > { %1178 = vrot.lane.b32.xlu0 %v1998_v12, %s1894_s30  ;;  %1293 = vrot.lane.b32.xlu1 %v1996_v11, %s1895_s5 }
  0x55   : > { %1295 = vrot.lane.b32.xlu0 %v2001_v13, %s1895_s5  ;;  %1291 = vrot.lane.b32.xlu1 %v1998_v12, %s1895_s5 }
  0x59   : > { %1400 = vperm.xlu0 %1814, %v1396_v14   ;;  %1405 = vperm.xlu1 %1815, %v1397_v15  }
  0x9b   : > { %v413_v16 = vpop.permute.xlu0 %412  ;;  %v411_v17 = vpop.permute.xlu1 %410 }
  0x9c   : > { %v417_v22 = vsel %vm416_vm1, %v411_v17, %v413_v16 }
  0x9f   : > { %v415_v18 = vpop.permute.xlu0 %414  ;;  %v616_v21 = vpop.permute.xlu1 %615 }
  0xa0   : > { %1688 = vmatpush3.bf16.msra.mxu1 %v415_v18  ;;  %v418_v20 = vsel %vm416_vm1, %v413_v16, %v415_v18 }
  0xa1   : > { %440 = vmatprep.subr.bf16.mxu0 %v418_v20  ;;  %1693 = vmatprep.subr.bf16.mxu1 %v1885_v9 }
  0xa2   : > { %441 = vmatpush1.bf16.msra.mxu0 %v417_v22 }
  0xa3   : > { %1690 = vmatmul.mubr.msk.bf16.vlgmr.msra.gmra.mxu1 %vm422_vm2, %v1820_v19  ;;  %535 = vmatprep.subr.bf16.mxu0 %v1996_v11  ;;  %v618_v23 = vpop.permute.xlu0 %617  ;;  %v614_v25 = vpop.permute.xlu1 %613 }
  0xa4   : > { %1694 = vmatpush3.bf16.msra.mxu1 %v2001_v13  ;;  %1695 = vmatprep.mubr.msk.bf16.mxu1 %vm1886_vm0, %v1885_v9  ;;  %v621_v24 = vsel %vm619_vm3, %v616_v21, %v618_v23  ;;  %v620_v29 = vsel %vm619_vm3, %v614_v25, %v616_v21 }
  0xa5   : > { %1618 = vmatmul.mubr.msk.bf16.vlgmr.msra.gmra.mxu0 %vm422_vm2, %v1820_v19  ;;  %1699 = vmatprep.subr.bf16.mxu1 %v1885_v9 }
  0xa6   : > { %536 = vmatpush1.bf16.msra.mxu0 %v1998_v12  ;;  %553 = vmatprep.mubr.bf16.mxu0 %v1887_v10 }
  0xa7   : > { %642 = vmatprep.subr.bf16.mxu0 %v621_v24  ;;  %v729_v27 = vpop.permute.xlu0 %728  ;;  %v731_v28 = vpop.permute.xlu1 %730 }
  0xa8   : > { %v734_v30 = vsel %vm732_vm4, %v729_v27, %v731_v28 }
  0xab   : > { %1696 = vmatmul.mubr.msk.bf16.vlgmr.msra.gmra.mxu1 %vm422_vm2, %v1821_v26  ;;  %v727_v31 = vpop.permute.xlu0 %726  ;;  %v842_v33 = vpop.permute.xlu1 %841 }
  0xac   : > { %1700 = vmatpush3.bf16.msra.mxu1 %v618_v23  ;;  %1701 = vmatprep.mubr.msk.bf16.mxu1 %vm1886_vm0, %v1885_v9  ;;  %v733_v35 = vsel %vm732_vm4, %v727_v31, %v729_v27 }
  0xad   : > { %1621 = vmatmul.mubr.msk.bf16.vlgmr.msra.gmra.mxu0 %vm422_vm2, %v1821_v26  ;;  %1705 = vmatprep.subr.bf16.mxu1 %v1885_v9 }
  0xae   : > { %643 = vmatpush1.bf16.msra.mxu0 %v620_v29  ;;  %660 = vmatprep.mubr.bf16.mxu0 %v1887_v10 }
  0xaf   : > { %755 = vmatprep.subr.bf16.mxu0 %v734_v30  ;;  %v844_v34 = vpop.permute.xlu0 %843  ;;  %v840_v37 = vpop.permute.xlu1 %839 }
  0xb0   : > { %v847_v36 = vsel %vm845_vm5, %v842_v33, %v844_v34  ;;  %v846_v41 = vsel %vm845_vm5, %v840_v37, %v842_v33 }
  0xb3   : > { %1702 = vmatmul.mubr.msk.bf16.vlgmr.msra.gmra.mxu1 %vm422_vm2, %v1822_v32  ;;  %v955_v39 = vpop.permute.xlu0 %954  ;;  %v957_v40 = vpop.permute.xlu1 %956 }
  0xb4   : > { %1706 = vmatpush3.bf16.msra.mxu1 %v731_v28  ;;  %1707 = vmatprep.mubr.msk.bf16.mxu1 %vm1886_vm0, %v1885_v9  ;;  %v960_v42 = vsel %vm958_vm6, %v955_v39, %v957_v40 }
  0xb5   : > { %1626 = vmatmul.mubr.msk.bf16.vlgmr.msra.gmra.mxu0 %vm422_vm2, %v1822_v32  ;;  %1711 = vmatprep.subr.bf16.mxu1 %v1885_v9 }
  0xb6   : > { %756 = vmatpush1.bf16.msra.mxu0 %v733_v35  ;;  %773 = vmatprep.mubr.bf16.mxu0 %v1887_v10 }
  0xb7   : > { %868 = vmatprep.subr.bf16.mxu0 %v847_v36  ;;  %v953_v43 = vpop.permute.xlu0 %952  ;;  %v1068_v45 = vpop.permute.xlu1 %1067 }
  0xb8   : > { %v959_v47 = vsel %vm958_vm6, %v953_v43, %v955_v39 }
  0xbb   : > { %1708 = vmatmul.mubr.msk.bf16.vlgmr.msra.gmra.mxu1 %vm422_vm2, %v1823_v38  ;;  %v1070_v46 = vpop.permute.xlu0 %1069  ;;  %v1066_v49 = vpop.permute.xlu1 %1065 }
  0xbc   : > { %1712 = vmatpush3.bf16.msra.mxu1 %v844_v34  ;;  %1713 = vmatprep.mubr.msk.bf16.mxu1 %vm1886_vm0, %v1885_v9  ;;  %v1073_v48 = vsel %vm1071_vm7, %v1068_v45, %v1070_v46  ;;  %v1072_v53 = vsel %vm1071_vm7, %v1066_v49, %v1068_v45 }
  0xbd   : > { %1631 = vmatmul.mubr.msk.bf16.vlgmr.msra.gmra.mxu0 %vm422_vm2, %v1823_v38  ;;  %1717 = vmatprep.subr.bf16.mxu1 %v1885_v9 }
  0xbe   : > { %869 = vmatpush1.bf16.msra.mxu0 %v846_v41  ;;  %886 = vmatprep.mubr.bf16.mxu0 %v1887_v10 }
  0xbf   : > { %981 = vmatprep.subr.bf16.mxu0 %v960_v42  ;;  %v1181_v51 = vpop.permute.xlu0 %1180  ;;  %v1183_v52 = vpop.permute.xlu1 %1182 }
  0xc0   : > { %v1186_v54 = vsel %vm1184_vm8, %v1181_v51, %v1183_v52 }
  0xc3   : > { %1714 = vmatmul.mubr.msk.bf16.vlgmr.msra.gmra.mxu1 %vm422_vm2, %v1824_v44  ;;  %v1179_v55 = vpop.permute.xlu0 %1178  ;;  %v1294_v58 = vpop.permute.xlu1 %1293 }
  0xc4   : > { %1718 = vmatpush3.bf16.msra.mxu1 %v957_v40  ;;  %1719 = vmatprep.mubr.msk.bf16.mxu1 %vm1886_vm0, %v1885_v9  ;;  %v1185_v59 = vsel %vm1184_vm8, %v1179_v55, %v1181_v51 }
  0xc5   : > { %1636 = vmatmul.mubr.msk.bf16.vlgmr.msra.gmra.mxu0 %vm422_vm2, %v1824_v44  ;;  %1723 = vmatprep.subr.bf16.mxu1 %v1885_v9 }
  0xc6   : > { %982 = vmatpush1.bf16.msra.mxu0 %v959_v47  ;;  %999 = vmatprep.mubr.bf16.mxu0 %v1887_v10 }
  0xc7   : > { %1094 = vmatprep.subr.bf16.mxu0 %v1073_v48  ;;  %v1296_v57 = vpop.permute.xlu0 %1295  ;;  %v1292_v62 = vpop.permute.xlu1 %1291 }
  0xc8   : > { %v1299_v60 = vsel %vm1297_vm9, %v1294_v58, %v1296_v57  ;;  %v1298_v63 = vsel %vm1297_vm9, %v1292_v62, %v1294_v58 }
  0xcb   : > { %1720 = vmatmul.mubr.msk.bf16.vlgmr.msra.gmra.mxu1 %vm422_vm2, %v1825_v50 }
  0xcc   : > { %1724 = vmatpush3.bf16.msra.mxu1 %v1070_v46  ;;  %1725 = vmatprep.mubr.msk.bf16.mxu1 %vm1886_vm0, %v1885_v9 }
  0xcd   : > { %1641 = vmatmul.mubr.msk.bf16.vlgmr.msra.gmra.mxu0 %vm422_vm2, %v1825_v50  ;;  %1729 = vmatprep.subr.bf16.mxu1 %v1885_v9 }
  0xce   : > { %1095 = vmatpush1.bf16.msra.mxu0 %v1072_v53  ;;  %1112 = vmatprep.mubr.bf16.mxu0 %v1887_v10 }
  0xcf   : > { %1207 = vmatprep.subr.bf16.mxu0 %v1186_v54 }
  0xd3   : > { %1726 = vmatmul.mubr.msk.bf16.vlgmr.msra.gmra.mxu1 %vm422_vm2, %v1826_v56 }
  0xd4   : > { %1730 = vmatpush3.bf16.msra.mxu1 %v1183_v52  ;;  %1731 = vmatprep.mubr.msk.bf16.mxu1 %vm1886_vm0, %v1885_v9 }
  0xd5   : > { %1646 = vmatmul.mubr.msk.bf16.vlgmr.msra.gmra.mxu0 %vm422_vm2, %v1826_v56  ;;  %1735 = vmatprep.subr.bf16.mxu1 %v1885_v9 }
  0xd6   : > { %1208 = vmatpush1.bf16.msra.mxu0 %v1185_v59  ;;  %1225 = vmatprep.mubr.bf16.mxu0 %v1887_v10 }
  0xd7   : > { %1320 = vmatprep.subr.bf16.mxu0 %v1299_v60 }
  0xdb   : > { %1732 = vmatmul.mubr.msk.bf16.vlgmr.msra.gmra.mxu1 %vm422_vm2, %v1827_v61 }
  0xdc   : > { %1736 = vmatpush3.bf16.msra.mxu1 %v1296_v57  ;;  %1737 = vmatprep.mubr.msk.bf16.mxu1 %vm1886_vm0, %v1885_v9 }
  0xdd   : > { %1651 = vmatmul.mubr.msk.bf16.vlgmr.msra.gmra.mxu0 %vm422_vm2, %v1827_v61 }
  0xde   : > { %1321 = vmatpush1.bf16.msra.mxu0 %v1298_v63  ;;  %1338 = vmatprep.mubr.bf16.mxu0 %v1887_v10 }
  0xe3   : > { %1738 = vmatmul.mubr.msk.bf16.vlgmr.msra.gmra.mxu1 %vm422_vm2, %v1828_v0 }
  0xe5   : > { %1656 = vmatmul.mubr.msk.bf16.vlgmr.msra.gmra.mxu0 %vm422_vm2, %v1828_v0 }
 0x163   : > { %v503_v1 = vpop.f32.mrf.mxu1 }
 0x165   : > { %v460_v2 = vpop.f32.mrf.mxu0  ;;  %v1691_v3 = vpop.f32.mrf.mxu1 }
 0x167   : > { %v462_v4 = vpop.f32.mrf.mxu0  ;;  %v506_v5 = vpop.f32.mrf.mxu1 }
 0x169   : > { %v464_v6 = vpop.f32.mrf.mxu0  ;;  %v1692_v7 = vpop.f32.mrf.mxu1 }
 0x16b   : > { %v466_v8 = vpop.f32.mrf.mxu0  ;;  %v598_v11 = vpop.f32.mrf.mxu1 }
 0x16c   : > { %v599_v54 = vadd.f32 %v598_v11, %v503_v1 }
 0x16d   : > { %v555_v9 = vpop.f32.mrf.mxu0  ;;  %v1697_v12 = vpop.f32.mrf.mxu1 }
 0x16e   : > { %v556_v55 = vadd.f32 %v555_v9, %v460_v2 }
 0x16f   : > { %v557_v13 = vpop.f32.mrf.mxu0  ;;  %v601_v14 = vpop.f32.mrf.mxu1 }
 0x170   : > { %v558_v58 = vadd.f32 %v557_v13, %v462_v4  ;;  %v602_v61 = vadd.f32 %v601_v14, %v506_v5 }
 0x171   : > { %v559_v15 = vpop.f32.mrf.mxu0  ;;  %v1698_v10 = vpop.f32.mrf.mxu1 }
 0x172   : > { %v560_v0 = vadd.f32 %v559_v15, %v464_v6 }
 0x173   : > { %v561_v16 = vpop.f32.mrf.mxu0  ;;  %v705_v17 = vpop.f32.mrf.mxu1 }
 0x174   : > { %v714_v59 = vadd.f32 %v705_v17, %v599_v54  ;;  %v562_v10 = vadd.f32 %v561_v16, %v466_v8 }
 0x175   : > { %v662_v18 = vpop.f32.mrf.mxu0  ;;  %v1703_v19 = vpop.f32.mrf.mxu1 }
 0x176   : > { %v712_v60 = vadd.f32 %v662_v18, %v556_v55 }
 0x177   : > { %v664_v20 = vpop.f32.mrf.mxu0  ;;  %v708_v21 = vpop.f32.mrf.mxu1 }
 0x178   : > { %v713_v3 = vadd.f32 %v664_v20, %v558_v58  ;;  %v717_v19 = vadd.f32 %v708_v21, %v602_v61 }
 0x179   : > { %v666_v22 = vpop.f32.mrf.mxu0  ;;  %v1704_v23 = vpop.f32.mrf.mxu1 }
 0x17b   : > { %v668_v24 = vpop.f32.mrf.mxu0  ;;  %v818_v25 = vpop.f32.mrf.mxu1 }
 0x17c   : > { %v827_v7 = vadd.f32 %v818_v25, %v714_v59  ;;  %v716_v9 = vadd.f32 %v668_v24, %v562_v10 }
 0x17d   : > { %v775_v26 = vpop.f32.mrf.mxu0  ;;  %v1709_v27 = vpop.f32.mrf.mxu1 }
 0x17e   : > { %v825_v12 = vadd.f32 %v775_v26, %v712_v60 }
 0x17f   : > { %v777_v28 = vpop.f32.mrf.mxu0  ;;  %v821_v29 = vpop.f32.mrf.mxu1 }
 0x180   : > { %v826_v1 = vadd.f32 %v777_v28, %v713_v3  ;;  %v830_v4 = vadd.f32 %v821_v29, %v717_v19  ;;  %v1406_v19 = vpop.permute.xlu1 %1405 }
 0x181   : > { %v779_v30 = vpop.f32.mrf.mxu0  ;;  %v1710_v31 = vpop.f32.mrf.mxu1 }
 0x182   : > { %v1416_v31 = vlaneseq }
 0x183   : > { %v781_v32 = vpop.f32.mrf.mxu0  ;;  %v931_v33 = vpop.f32.mrf.mxu1 }
 0x184   : > { %v940_v2 = vadd.f32 %v931_v33, %v827_v7  ;;  %v829_v15 = vadd.f32 %v781_v32, %v716_v9  ;;  %v1417_v16 = vshrl.u32 %v1416_v31, 7 }
 0x185   : > { %v888_v34 = vpop.f32.mrf.mxu0  ;;  %v1715_v35 = vpop.f32.mrf.mxu1 }
 0x186   : > { %v715_v35 = vadd.f32 %v666_v22, %v560_v0  ;;  %v938_v11 = vadd.f32 %v888_v34, %v825_v12  ;;  %v1418_v29 = vsub.s32 0, %v1417_v16  ;;  %v1426_v54 = vsub.s32 2, %v1417_v16 }
 0x187   : > { %v890_v36 = vpop.f32.mrf.mxu0  ;;  %v934_v37 = vpop.f32.mrf.mxu1 }
 0x188   : > { %v828_v5 = vadd.f32 %v779_v30, %v715_v35  ;;  %v939_v14 = vadd.f32 %v890_v36, %v826_v1  ;;  %v943_v20 = vadd.f32 %v934_v37, %v830_v4 }
 0x189   : > { %v892_v38 = vpop.f32.mrf.mxu0  ;;  %v1716_v39 = vpop.f32.mrf.mxu1 }
 0x18a   : > { %v941_v21 = vadd.f32 %v892_v38, %v828_v5 }
 0x18b   : > { %v894_v40 = vpop.f32.mrf.mxu0  ;;  %v1044_v41 = vpop.f32.mrf.mxu1 }
 0x18c   : > { %v1053_v18 = vadd.f32 %v1044_v41, %v940_v2  ;;  %v942_v28 = vadd.f32 %v894_v40, %v829_v15  ;;  %v1414_v40 = vld [vmem:[%s2151_s3] sm:$0x7] }
 0x18d   : > { %v1001_v42 = vpop.f32.mrf.mxu0  ;;  %v1721_v43 = vpop.f32.mrf.mxu1  ;;  %v1427_v0 = vrot.slane %v1414_v40, %v1426_v54 }
 0x18e   : > { %v1051_v6 = vadd.f32 %v1001_v42, %v938_v11  ;;  %v1422_v43 = vsub.s32 1, %v1417_v16 }
 0x18f   : > { %v1003_v44 = vpop.f32.mrf.mxu0  ;;  %v1047_v45 = vpop.f32.mrf.mxu1 }
 0x190   : > { %v1052_v26 = vadd.f32 %v1003_v44, %v939_v14  ;;  %v1056_v33 = vadd.f32 %v1047_v45, %v943_v20 }
 0x191   : > { %v1005_v46 = vpop.f32.mrf.mxu0  ;;  %v1722_v47 = vpop.f32.mrf.mxu1 }
 0x192   : > { %v1054_v47 = vadd.f32 %v1005_v46, %v941_v21 }
 0x193   : > { %v1007_v48 = vpop.f32.mrf.mxu0  ;;  %v1157_v49 = vpop.f32.mrf.mxu1 }
 0x194   : > { %v1166_v39 = vadd.f32 %v1157_v49, %v1053_v18  ;;  %v1055_v42 = vadd.f32 %v1007_v48, %v942_v28  ;;  %v1401_v49 = vpop.permute.xlu0 %1400 }
 0x195   : > { %v1114_v50 = vpop.f32.mrf.mxu0  ;;  %v1727_v51 = vpop.f32.mrf.mxu1 }
 0x196   : > { %v1164_v22 = vadd.f32 %v1114_v50, %v1051_v6 }
 0x197   : > { %v1116_v52 = vpop.f32.mrf.mxu0  ;;  %v1160_v53 = vpop.f32.mrf.mxu1 }
 0x198   : > { %v1165_v30 = vadd.f32 %v1116_v52, %v1052_v26  ;;  %v1169_v32 = vadd.f32 %v1160_v53, %v1056_v33  ;;  %v1423_v52 = vrot.slane %v1414_v40, %v1422_v43 }
 0x199   : > { %v1118_v56 = vpop.f32.mrf.mxu0  ;;  %v1728_v57 = vpop.f32.mrf.mxu1 }
 0x19a   : > { %v1167_v55 = vadd.f32 %v1118_v56, %v1054_v47  ;;  %v1419_v57 = vrot.slane %v1414_v40, %v1418_v29 }
 0x19b   : > { %v1120_v62 = vpop.f32.mrf.mxu0  ;;  %v1270_v63 = vpop.f32.mrf.mxu1 }
 0x19c   : > { %v1279_v36 = vadd.f32 %v1270_v63, %v1166_v39  ;;  %v1168_v45 = vadd.f32 %v1120_v62, %v1055_v42 }
 0x19d   : > { %v1227_v23 = vpop.f32.mrf.mxu0  ;;  %v1733_v27 = vpop.f32.mrf.mxu1 }
 0x19e   : > { %v1277_v41 = vadd.f32 %v1227_v23, %v1164_v22 }
 0x19f   : > { %v1229_v13 = vpop.f32.mrf.mxu0  ;;  %v1273_v17 = vpop.f32.mrf.mxu1 }
 0x1a0   : > { %v1278_v38 = vadd.f32 %v1229_v13, %v1165_v30  ;;  %v1282_v59 = vadd.f32 %v1273_v17, %v1169_v32 }
 0x1a1   : > { %v1231_v25 = vpop.f32.mrf.mxu0  ;;  %v1734_v8 = vpop.f32.mrf.mxu1 }
 0x1a2   : > { %v1280_v48 = vadd.f32 %v1231_v25, %v1167_v55 }
 0x1a3   : > { %v1233_v34 = vpop.f32.mrf.mxu0  ;;  %v1383_v24 = vpop.f32.mrf.mxu1 }
 0x1a4   : > { %v1392_v44 = vadd.f32 %v1383_v24, %v1279_v36  ;;  %v1281_v61 = vadd.f32 %v1233_v34, %v1168_v45 }
 0x1a5   : > { %v1340_v37 = vpop.f32.mrf.mxu0  ;;  %v1739_v51 = vpop.f32.mrf.mxu1 }
 0x1a6   : > { %v1390_v50 = vadd.f32 %v1340_v37, %v1277_v41  ;;  %v1410_v3 = vadd.f32 %v1401_v49, %v1392_v44 }
 0x1a7   : > { %v1342_v46 = vpop.f32.mrf.mxu0  ;;  %v1386_v58 = vpop.f32.mrf.mxu1 }
 0x1a8   : > { %v1408_v53 = vadd.f32 %v1401_v49, %v1390_v50  ;;  %v1391_v60 = vadd.f32 %v1342_v46, %v1278_v38  ;;  %v1395_v12 = vadd.f32 %v1386_v58, %v1282_v59  ;;  %v1433_v9 = vmul.f32 %v1427_v0, %v1410_v3 }
 0x1a9   : > { %v1344_v63 = vpop.f32.mrf.mxu0  ;;  %v1740_v56 = vpop.f32.mrf.mxu1 }
 0x1aa   : > { %v1409_v7 = vadd.f32 %v1401_v49, %v1391_v60  ;;  %v1393_v10 = vadd.f32 %v1344_v63, %v1280_v48  ;;  %v1431_v27 = vmul.f32 %v1419_v57, %v1408_v53  ;;  %v1413_v1 = vadd.f32 %v1406_v19, %v1395_v12 }
 0x1ab   : > { %v1346_v23 = vpop.f32.mrf.mxu0  ;;  %v1666_v5 = vpack.c.bf16 %v1433_v9, %v1433_v9 }
 0x1ac   : > { %v1432_v62 = vmul.f32 %v1423_v52, %v1409_v7  ;;  %v1411_v31 = vadd.f32 %v1406_v19, %v1393_v10  ;;  %v1394_v35 = vadd.f32 %v1346_v23, %v1281_v61  ;;  %v1436_v14 = vmul.f32 %v1427_v0, %v1413_v1 }
 0x1ae   : > { %v1412_v2 = vadd.f32 %v1406_v19, %v1394_v35  ;;  %v1665_v11 = vpack.c.bf16 %v1432_v62, %v1431_v27  ;;  %v1434_v4 = vmul.f32 %v1419_v57, %v1411_v31  ;;  %v1668_v18 = vpack.c.bf16 %v1436_v14, %v1436_v14 }
 0x1b0   : > { %v1435_v13 = vmul.f32 %v1423_v52, %v1412_v2  ;;  %1453 = vrot.lane.b32.xlu1 %v1665_v11, %s1896_s27 }
 0x1b2   : > { %v1667_v17 = vpack.c.bf16 %v1435_v13, %v1434_v4 }
 0x1b4   : > { %1457 = vrot.lane.b32.xlu0 %v1667_v17, %s1896_s27  ;;  %1455 = vrot.lane.b32.xlu1 %v1666_v5, %s1896_s27 }
 0x1b8   : > { %1459 = vrot.lane.b32.xlu0 %v1668_v18, %s1896_s27 }
 0x222   : > { %v1454_v6 = vpop.permute.xlu1 %1453 }
 0x223   : > { %v1461_v15 = vrot.slane %v1454_v6, 4 }
 0x225   : > { %v1464_v20 = vsel %vm1463_vm12, %v1461_v15, %v1454_v6 }
 0x226   : > { %1475 = vst.msk [vmem:[%s2036_s17] sm:$0xff] %vm1474_vm13, %v1464_v20  ;;  %v1458_v25 = vpop.permute.xlu0 %1457  ;;  %v1456_v8 = vpop.permute.xlu1 %1455 }
 0x227   : > { %v1462_v16 = vrot.slane %v1458_v25, 4  ;;  %v1465_v21 = vsel %vm1463_vm12, %v1461_v15, %v1456_v8 }
 0x228   : > { %1477 = vst.msk [vmem:[%s2036_s17 + $0x8] sm:$0xf] %vm1476_vm14, %v1465_v21 }
 0x229   : > { %v1466_v26 = vsel %vm1463_vm12, %v1462_v16, %v1458_v25 }
 0x22a   : > { %1478 = vst.msk [vmem:[%s2036_s17 + $0xc] sm:$0xff] %vm1474_vm13, %v1466_v26  ;;  %v1460_v39 = vpop.permute.xlu0 %1459 }
 0x22b   : > { %v1467_v22 = vsel %vm1463_vm12, %v1462_v16, %v1460_v39 }
 0x22c   : > { %1479 = vst.msk [vmem:[%s2036_s17 + $0x14] sm:$0xf] %vm1476_vm14, %v1467_v22 }
 0x22d PF: > { %s14_s21 = sadd.s32 1, %s1883_s21   ;;  %s2153_s15 = smov %s1863_s16 }
 0x22e   : > { %p11_p12 = scmp.ge.s32.totalorder %s14_s21, 6   ;;  %s2154_s16 = smov %s1971_s26 }
 0x22f   : > { %s2155_s17 = smov %s1875_s19  ;;  %s2156_s18 = smov %s1879_s20 }
 0x230   : > { %s2157_s19 = smov %s2160_s22  ;;  %s2158_s20 = smov %s2164_s23 }
 0x231   :  { %13 = sbr.rel (!%p11_p12) target bundleno = 4 (0x4), region = 126 }

// kernel: dcrnn_cell_forward.11
= control target key start
LH: loop header
LB: loop body
LE: loop exit
PB: predicated region body
PF: predicated region fallthrough
CT: control target
= control target key end

     0   :  { %s770_s15 = smov 0   ;;  %s772_s16 = smov 0   ;;  %s934_s0 = inlined_call_operand.vmem [shape: bf16[2,32,384], index: 0, kind: input, shape index: {}]   ;;  %s935_s1 = inlined_call_operand.vmem [shape: f32[1,32,1], index: 1, kind: input, shape index: {}]   ;;  %s936_s2 = inlined_call_operand.vmem [shape: f32[1,32,1], index: 2, kind: input, shape index: {}]   ;;  %s937_s3 = inlined_call_operand.vmem [shape: f32[1,1,384], index: 3, kind: input, shape index: {}]   ;;  %s938_s4 = inlined_call_operand.vmem [shape: bf16[2,32,384], index: 4, kind: output, shape index: {}]  }
   0x1   :  { %s774_s17 = smov 0  }
   0x2 LB: > { %s786_s18 = sadd.s32 4294967295, %s742_s17   ;;  %s789_s19 = sadd.s32 1, %s742_s17   ;;  %s742_s17 = sphi %s774_s17, %s942_s17   ;;  %s738_s16 = sphi %s772_s16, %s941_s16   ;;  %s734_s15 = sphi %s770_s15, %s940_s15  }
   0x3   : > { %s18_s20 = ssub.s32 %s742_s17, %s789_s19  ;;  %s21_s21 = sadd.s32 1, %s738_s16 }
   0x4   : > { %p19_p0 = scmp.eq.s32.totalorder %s18_s20, 0  ;;  %p28_p1 = scmp.ne.s32.totalorder %s738_s16, %s734_s15 }
   0x5   : > { %p29_p2 = scmp.eq.s32.totalorder %s742_s17, 0  ;;  %p131_p3 = scmp.eq.s32.totalorder %s786_s18, 1 }
   0x6   : > { %s799_s22 = scalar_select %p19_p0, %s738_s16, %s21_s21  }
   0x7   : > { %p30_p4 = por %p29_p2, %p28_p1  ;;  %p801_p5 = por %p131_p3, %p28_p1 }
   0x8   : > { %p639_p6 = scmp.ge.s32.totalorder %s742_s17, 2 }
   0xa   : > { %156 = sbr.rel (%p639_p6) target bundleno = 24 (0x18), region = 20 }
   0xf   : > { %159 = sbr.rel (!%p30_p4) target bundleno = 24 (0x18), region = 24  ;;  %s161_s24 = sand.u32 (%p30_p4), 1, %s738_s16  }
  0x10   : > { %s686_s25 = smul.u32 (%p30_p4), 24, %s742_s17 }
  0x11   : > { %s685_s26 = smul.u32 (%p30_p4), 48, %s161_s24 }
  0x12   : > { %s167_s29 = scalar_lea.vmem (%p30_p4), %s934_s0, %s686_s25 }
  0x13   : > { %v182_v0 = vld [vmem:[%s167_s29] sm:$0xff] (%p30_p4)  ;;  %v184_v1 = vld [vmem:[%s167_s29 + $0xc] sm:$0xff] (%p30_p4)  ;;  %s163_s30 = scalar_lea.vmem (%p30_p4), [#allocation2], %s685_s26  ;;  %v643_v4 = vld [vmem:[%s167_s29 + $0x8] sm:$0xf] (%p30_p4) }
  0x14   : > { %v186_v2 = vld [vmem:[%s167_s29 + $0x30] sm:$0xff]  ;;  %183 = vst [vmem:[%s163_s30] sm:$0xff] %v182_v0  ;;  %185 = vst [vmem:[%s163_s30 + $0xc] sm:$0xff] %v184_v1  ;;  %v188_v3 = vld [vmem:[%s167_s29 + $0x3c] sm:$0xff] }
  0x15   : > { %187 = vst [vmem:[%s163_s30 + $0x18] sm:$0xff] %v186_v2  ;;  %v645_v5 = vld [vmem:[%s167_s29 + $0x14] sm:$0xf]  ;;  %189 = vst [vmem:[%s163_s30 + $0x24] sm:$0xff] %v188_v3  ;;  %v647_v6 = vld [vmem:[%s167_s29 + $0x38] sm:$0xf] }
  0x16   : > { %644 = vst [vmem:[%s163_s30 + $0x8] sm:$0xf] %v643_v4  ;;  %646 = vst [vmem:[%s163_s30 + $0x14] sm:$0xf] %v645_v5  ;;  %v649_v7 = vld [vmem:[%s167_s29 + $0x44] sm:$0xf] }
  0x17   : > { %648 = vst [vmem:[%s163_s30 + $0x20] sm:$0xf] %v647_v6  ;;  %650 = vst [vmem:[%s163_s30 + $0x2c] sm:$0xf] %v649_v7 }
  0x18 PF: > { %p651_p7 = scmp.ge.s32.totalorder %s742_s17, 1  ;;  %p228_p8 = scmp.lt.s32.totalorder %s742_s17, 3 }
  0x1a   : > { %p229_p9 = pnand %p651_p7, %p228_p8 }
  0x1b   : > { %s235_s5 = sand.u32 (!%p229_p9), 1, %s734_s15   ;;  %s652_s8 = sshll.u32 (!%p229_p9), %s786_s18, 1 }
  0x1c   : > { %232 = sbr.rel (%p229_p9) target bundleno = 366 (0x16e), region = 58  ;;  %p271_p10 = scmp.lt.s32.totalorder (!%p229_p9), %s652_s8, 3 }
  0x1d   : > { %s814_s6 = smul.u32 (!%p229_p9), 48, %s235_s5 }
  0x1f   : > { %s237_s7 = scalar_lea.vmem (!%p229_p9), [#allocation2], %s814_s6  ;;  %s900_s21 = scalar_lea.vmem (!%p229_p9), [#allocation3], %s814_s6 }
  0x21   : > { %v287_v8 = vld [vmem:[%s237_s7 + $0x18] sm:$0xff]  ;;  %v288_v9 = vld [vmem:[%s237_s7 + $0x8] ss:$24 sps:$4 sm:$0xff]   ;;  %v290_v16 = vld [vmem:[%s237_s7 + $0x14] ss:$24 sps:$4 sm:$0xff]   ;;  %v744_v54 = vmov 0  }
  0x22   : > { %v283_v10 = vld [vmem:[%s237_s7] sm:$0xff]  ;;  %v817_v11 = vunpack.c.l.bf16 %v287_v8  ;;  %v819_v12 = vunpack.c.h.bf16 %v287_v8  ;;  %v821_v13 = vunpack.c.h.bf16 %v288_v9  ;;  %v285_v17 = vld [vmem:[%s237_s7 + $0xc] sm:$0xff]  ;;  %v827_v19 = vunpack.c.l.bf16 %v288_v9  ;;  %715 = vset.pattern.permute.xlu1 %v744_v54  ;;  %714 = vset.pattern.permute.xlu0 %v744_v54  ;;  %s944_s8 = smov (!%p271_p10, %s652_s8), 3  ;;  %s688_s24 = smul.u32 (%p801_p5), 24, %s786_s18 }
  0x23   : > { %v823_v14 = vunpack.c.l.bf16 %v283_v10  ;;  %v289_v15 = vld [vmem:[%s237_s7 + $0x24] sm:$0xff]  ;;  %v825_v18 = vunpack.c.h.bf16 %v283_v10  ;;  %v835_v23 = vunpack.c.h.bf16 %v290_v16  ;;  %v837_v24 = vunpack.c.l.bf16 %v285_v17  ;;  %s653_s9 = sshll.u32 %s944_s8, 3 }
  0x24   : > { %v829_v20 = vunpack.c.l.bf16 %v289_v15  ;;  %v831_v21 = vunpack.c.h.bf16 %v289_v15  ;;  %v311_v22 = vadd.f32 %v819_v12, %v817_v11  ;;  %v839_v25 = vunpack.c.h.bf16 %v285_v17  ;;  %s274_s12 = scalar_lea.vmem %s935_s1, %s653_s9  ;;  %s280_s15 = scalar_lea.vmem %s936_s2, %s653_s9 }
  0x25   : > { %v303_v26 = vadd.f32 %v825_v18, %v823_v14  ;;  %v845_v28 = vunpack.c.l.bf16 %v290_v16  ;;  %v321_v29 = vmul.f32 %v823_v14, %v823_v14  ;;  %v324_v32 = vmul.f32 %v837_v24, %v837_v24  ;;  %s506_s23 = scalar_lea.vmem (%p801_p5), %s938_s4, %s688_s24 }
  0x26   : > { %v315_v27 = vadd.f32 %v831_v21, %v829_v20  ;;  %v312_v30 = vadd.f32 %v311_v22, %v821_v13  ;;  %v307_v31 = vadd.f32 %v839_v25, %v837_v24  ;;  %v325_v33 = vmul.f32 %v839_v25, %v839_v25 }
  0x27   : > { %v304_v34 = vadd.f32 %v303_v26, %v827_v19  ;;  %v322_v36 = vmul.f32 %v825_v18, %v825_v18  ;;  %v326_v38 = vmul.f32 %v845_v28, %v845_v28  ;;  %v330_v40 = vmul.f32 %v829_v20, %v829_v20  ;;  %v362_v26 = vld [vmem:[%s274_s12 + $0x8] sm:$0xff] }
  0x28   : > { %v316_v35 = vadd.f32 %v315_v27, %v835_v23  ;;  %313 = vadd.xlane.f32.xlu1 %v312_v30  ;;  %v308_v37 = vadd.f32 %v307_v31, %v845_v28  ;;  %v337_v39 = vadd.f32 %v325_v33, %v324_v32  ;;  %v323_v41 = vmul.f32 %v827_v19, %v827_v19  ;;  %v361_v27 = vld [vmem:[%s274_s12] sm:$0xff] }
  0x29   : > { %305 = vadd.xlane.f32.xlu0 %v304_v34  ;;  %v333_v42 = vadd.f32 %v322_v36, %v321_v29  ;;  %v331_v43 = vmul.f32 %v831_v21, %v831_v21  ;;  %v327_v44 = vmul.f32 %v817_v11, %v817_v11  ;;  %v328_v45 = vmul.f32 %v819_v12, %v819_v12  ;;  %v369_v33 = vld [vmem:[%s280_s15] sm:$0xff] }
  0x2a   : > { %v338_v46 = vadd.f32 %v337_v39, %v326_v38  ;;  %v332_v47 = vmul.f32 %v835_v23, %v835_v23  ;;  %v329_v50 = vmul.f32 %v821_v13, %v821_v13  ;;  %v421_v39 = vlaneseq }
  0x2b   : > { %v345_v48 = vadd.f32 %v331_v43, %v330_v40  ;;  %v334_v49 = vadd.f32 %v333_v42, %v323_v41  ;;  %v341_v51 = vadd.f32 %v328_v45, %v327_v44  ;;  %v419_v45 = vld [vmem:[%s937_s3] sm:$0x7] }
  0x2c   : > { %317 = vadd.xlane.f32.xlu1 %v316_v35  ;;  %v422_v40 = vshrl.u32 %v421_v39, 7 }
  0x2d   : > { %309 = vadd.xlane.f32.xlu0 %v308_v37  ;;  %v346_v52 = vadd.f32 %v345_v48, %v332_v47  ;;  %v342_v53 = vadd.f32 %v341_v51, %v329_v50  ;;  %v370_v37 = vld [vmem:[%s280_s15 + $0x8] sm:$0xff] }
  0x2e   : > { %v423_v41 = vsub.s32 0, %v422_v40  ;;  %v427_v42 = vsub.s32 1, %v422_v40  ;;  %v431_v43 = vsub.s32 2, %v422_v40 }
  0x30   : > { %339 = vadd.xlane.f32.xlu1 %v338_v46  ;;  %v424_v47 = vrot.slane %v419_v45, %v423_v41  ;;  %v428_v48 = vrot.slane %v419_v45, %v427_v42 }
  0x31   : > { %335 = vadd.xlane.f32.xlu0 %v334_v49  ;;  %v432_v49 = vrot.slane %v419_v45, %v431_v43 }
  0x34   : > { %347 = vadd.xlane.f32.xlu1 %v346_v52 }
  0x35   : > { %343 = vadd.xlane.f32.xlu0 %v342_v53 }
  0xb1   : > { %v314_v55 = vpop.xlane.xlu1 %313 }
  0xb2   : > { %v306_v56 = vpop.xlane.xlu0 %305 }
  0xb3   : > { %v319_v60 = vadd.f32 %v314_v55, %v306_v56 }
  0xb5   : > { %v318_v57 = vpop.xlane.xlu1 %317  ;;  %v351_v0 = vmul.f32 0.001953125, %v319_v60 }
  0xb6   : > { %v310_v58 = vpop.xlane.xlu0 %309 }
  0xb7   : > { %v320_v59 = vadd.f32 %v318_v57, %v310_v58  ;;  %v355_v7 = vmul.f32 %v351_v0, %v351_v0 }
  0xb9   : > { %v340_v61 = vpop.xlane.xlu1 %339  ;;  %v352_v63 = vmul.f32 0.001953125, %v320_v59 }
  0xba   : > { %v336_v62 = vpop.xlane.xlu0 %335 }
  0xbb   : > { %v356_v5 = vmul.f32 %v352_v63, %v352_v63 }
  0xbd   : > { %v348_v1 = vpop.xlane.xlu1 %347 }
  0xbe   : > { %v350_v2 = vadd.f32 %v348_v1, %v340_v61  ;;  %v344_v3 = vpop.xlane.xlu0 %343 }
  0xbf   : > { %v349_v4 = vadd.f32 %v344_v3, %v336_v62 }
  0xc0   : > { %v354_v6 = vmul.f32 0.001953125, %v350_v2 }
  0xc1   : > { %v353_v8 = vmul.f32 0.001953125, %v349_v4 }
  0xc2   : > { %v358_v9 = vsub.f32 %v354_v6, %v356_v5 }
  0xc3   : > { %v357_v10 = vsub.f32 %v353_v8, %v355_v7 }
  0xc4   : > { %v360_v15 = vmax.f32 %v358_v9, 0.0 }
  0xc5   : > { %v359_v16 = vmax.f32 %v357_v10, 0.0 }
  0xc6   : > { %v364_v17 = vadd.f32 1e-05, %v360_v15 }
  0xc7   : > { %v363_v22 = vadd.f32 1e-05, %v359_v16 }
  0xc8   : > { %716 = vrsqrt.f32 %v364_v17 }
  0xc9   : > { %718 = vrsqrt.f32 %v363_v22 }
  0xd5   : > { %v717_v29 = vpop.eup %716 }
  0xd6   : > { %v719_v30 = vpop.eup %718  ;;  %v368_v31 = vmul.f32 %v717_v29, %v362_v26 }
  0xd7   : > { %v367_v32 = vmul.f32 %v719_v30, %v361_v27 }
  0xd8   : > { %382 = vperm.xlu1 %715, %v368_v31   ;;  %v372_v36 = vmul.f32 %v368_v31, %v352_v63 }
  0xd9   : > { %377 = vperm.xlu0 %714, %v367_v32   ;;  %v371_v34 = vmul.f32 %v367_v32, %v351_v0 }
  0xda   : > { %v374_v38 = vsub.f32 %v370_v37, %v372_v36 }
  0xdb   : > { %v373_v35 = vsub.f32 %v369_v33, %v371_v34 }
  0xdd   : > { %399 = vperm.xlu1 %715, %v373_v35  }
  0xe1   : > { %404 = vperm.xlu1 %715, %v374_v38  }
 0x153   : > { %v383_v44 = vpop.permute.xlu1 %382 }
 0x154   : > { %v378_v46 = vpop.permute.xlu0 %377  ;;  %v388_v57 = vmul.f32 %v383_v44, %v837_v24  ;;  %v389_v58 = vmul.f32 %v383_v44, %v839_v25  ;;  %v395_v24 = vmul.f32 %v383_v44, %v831_v21  ;;  %v396_v25 = vmul.f32 %v383_v44, %v835_v23 }
 0x155   : > { %v385_v50 = vmul.f32 %v378_v46, %v823_v14  ;;  %v386_v51 = vmul.f32 %v378_v46, %v825_v18  ;;  %v387_v52 = vmul.f32 %v378_v46, %v827_v19  ;;  %v391_v53 = vmul.f32 %v378_v46, %v817_v11 }
 0x156   : > { %v392_v54 = vmul.f32 %v378_v46, %v819_v12  ;;  %v393_v55 = vmul.f32 %v378_v46, %v821_v13  ;;  %v390_v18 = vmul.f32 %v383_v44, %v845_v28  ;;  %v394_v19 = vmul.f32 %v383_v44, %v829_v20 }
 0x158   : > { %v400_v56 = vpop.permute.xlu1 %399 }
 0x159   : > { %v407_v59 = vadd.f32 %v400_v56, %v385_v50  ;;  %v408_v60 = vadd.f32 %v400_v56, %v386_v51  ;;  %v409_v61 = vadd.f32 %v400_v56, %v387_v52  ;;  %v413_v62 = vadd.f32 %v400_v56, %v391_v53 }
 0x15a   : > { %v414_v14 = vadd.f32 %v400_v56, %v392_v54  ;;  %v415_v63 = vadd.f32 %v400_v56, %v393_v55 }
 0x15b   : > { %v436_v11 = vmul.f32 %v424_v47, %v407_v59  ;;  %v437_v0 = vmul.f32 %v428_v48, %v408_v60  ;;  %v438_v12 = vmul.f32 %v432_v49, %v409_v61  ;;  %v442_v13 = vmul.f32 %v424_v47, %v413_v62 }
 0x15c   : > { %v443_v1 = vmul.f32 %v428_v48, %v414_v14  ;;  %v444_v2 = vmul.f32 %v432_v49, %v415_v63  ;;  %v405_v3 = vpop.permute.xlu1 %404 }
 0x15d   : > { %v677_v4 = vpack.c.bf16 %v437_v0, %v436_v11  ;;  %v678_v5 = vpack.c.bf16 %v438_v12, %v438_v12  ;;  %v410_v6 = vadd.f32 %v405_v3, %v388_v57  ;;  %v411_v7 = vadd.f32 %v405_v3, %v389_v58 }
 0x15e   : > { %v681_v8 = vpack.c.bf16 %v443_v1, %v442_v13  ;;  %v682_v28 = vpack.c.bf16 %v444_v2, %v444_v2  ;;  %v412_v9 = vadd.f32 %v405_v3, %v390_v18  ;;  %v416_v20 = vadd.f32 %v405_v3, %v394_v19 }
 0x15f   : > { %488 = vst [vmem:[%s900_s21] sm:$0xff] %v677_v4  ;;  %489 = vst [vmem:[%s900_s21 + $0x8] sm:$0xf] %v678_v5  ;;  %v417_v21 = vadd.f32 %v405_v3, %v395_v24  ;;  %v418_v23 = vadd.f32 %v405_v3, %v396_v25  ;;  %v439_v10 = vmul.f32 %v424_v47, %v410_v6 }
 0x160   : > { %v440_v15 = vmul.f32 %v428_v48, %v411_v7  ;;  %492 = vst [vmem:[%s900_s21 + $0x18] sm:$0xff] %v681_v8  ;;  %493 = vst [vmem:[%s900_s21 + $0x20] sm:$0xf] %v682_v28  ;;  %v441_v16 = vmul.f32 %v432_v49, %v412_v9  ;;  %v445_v17 = vmul.f32 %v424_v47, %v416_v20 }
 0x161   : > { %v446_v22 = vmul.f32 %v428_v48, %v417_v21  ;;  %v447_v26 = vmul.f32 %v432_v49, %v418_v23  ;;  %502 = sbr.rel (!%p801_p5) target bundleno = 366 (0x16e), region = 66 }
 0x162   : > { %v679_v27 = vpack.c.bf16 %v440_v15, %v439_v10  ;;  %v680_v29 = vpack.c.bf16 %v441_v16, %v441_v16 }
 0x163   : > { %v683_v30 = vpack.c.bf16 %v446_v22, %v445_v17  ;;  %v684_v31 = vpack.c.bf16 %v447_v26, %v447_v26 }
 0x164   : > { %490 = vst [vmem:[%s900_s21 + $0xc] sm:$0xff] %v679_v27  ;;  %491 = vst [vmem:[%s900_s21 + $0x14] sm:$0xf] %v680_v29 }
 0x165   : > { %494 = vst [vmem:[%s900_s21 + $0x24] sm:$0xff] %v683_v30  ;;  %495 = vst [vmem:[%s900_s21 + $0x2c] sm:$0xf] %v684_v31 }
 0x166   : > { %v521_v32 = vld [vmem:[%s900_s21] sm:$0xff]  ;;  %v667_v36 = vld [vmem:[%s900_s21 + $0x8] sm:$0xf] }
 0x167   : > { %v525_v34 = vld [vmem:[%s900_s21 + $0x18] sm:$0xff]  ;;  %v671_v38 = vld [vmem:[%s900_s21 + $0x20] sm:$0xf]  ;;  %522 = vst [vmem:[%s506_s23] sm:$0xff] %v521_v32  ;;  %668 = vst [vmem:[%s506_s23 + $0x8] sm:$0xf] %v667_v36 }
 0x168   : > { %526 = vst [vmem:[%s506_s23 + $0x30] sm:$0xff] %v525_v34  ;;  %672 = vst [vmem:[%s506_s23 + $0x38] sm:$0xf] %v671_v38 }
 0x16b   : > { %v523_v33 = vld [vmem:[%s900_s21 + $0xc] sm:$0xff]  ;;  %v669_v37 = vld [vmem:[%s900_s21 + $0x14] sm:$0xf] }
 0x16c   : > { %v527_v35 = vld [vmem:[%s900_s21 + $0x24] sm:$0xff]  ;;  %v673_v39 = vld [vmem:[%s900_s21 + $0x2c] sm:$0xf]  ;;  %524 = vst [vmem:[%s506_s23 + $0xc] sm:$0xff] %v523_v33  ;;  %670 = vst [vmem:[%s506_s23 + $0x14] sm:$0xf] %v669_v37 }
 0x16d   : > { %528 = vst [vmem:[%s506_s23 + $0x3c] sm:$0xff] %v527_v35  ;;  %674 = vst [vmem:[%s506_s23 + $0x44] sm:$0xf] %v673_v39 }
 0x16e PF: > { %p11_p11 = scmp.ge.s32.totalorder %s789_s19, 4   ;;  %s940_s15 = smov %s738_s16 }
 0x16f   : > { %s941_s16 = smov %s799_s22  ;;  %s942_s17 = smov %s789_s19 }
 0x170   :  { %13 = sbr.rel (!%p11_p11) target bundleno = 2 (0x2), region = 141 }

// kernel: dcrnn_cell_forward.13
= control target key start
LH: loop header
LB: loop body
LE: loop exit
PB: predicated region body
PF: predicated region fallthrough
CT: control target
= control target key end

     0   :  { %v90_v5 = vmov 0   ;;  %s134_s0 = inlined_call_operand.vmem [shape: bf16[2,8,128], index: 0, kind: input, shape index: {}]   ;;  %s135_s1 = inlined_call_operand.vmem [shape: f32[1,8,1], index: 1, kind: input, shape index: {}]   ;;  %s136_s2 = inlined_call_operand.vmem [shape: f32[1,8,1], index: 2, kind: input, shape index: {}]   ;;  %s137_s3 = inlined_call_operand.vmem [shape: f32[1,1,128], index: 3, kind: input, shape index: {}]   ;;  %s138_s4 = inlined_call_operand.vmem [shape: f32[2,8,128], index: 4, kind: output, shape index: {}]  }
   0x1   :  { %v82_v0 = vld [vmem:[%s134_s0] sm:$0xff]   ;;  %86 = vset.pattern.permute.xlu0 %v90_v5  ;;  %87 = vset.pattern.permute.xlu1 %v90_v5 }
   0x2   :  { %v83_v1 = vunpack.c.l.bf16 %v82_v0  ;;  %v84_v2 = vunpack.c.h.bf16 %v82_v0  ;;  %v38_v18 = vld [vmem:[%s135_s1] sm:$0xff] }
   0x3   :  { %v42_v21 = vld [vmem:[%s136_s2] sm:$0xff] }
   0x4   :  { %21 = vadd.xlane.f32.xlu0 %v83_v1  ;;  %v26_v3 = vmul.f32 %v83_v1, %v83_v1  ;;  %v27_v4 = vmul.f32 %v84_v2, %v84_v2  ;;  %v80_v30 = vld [vmem:[%s137_s3] ss:$0 sm:$0xff] }
   0x6   :  { %28 = vadd.xlane.f32.xlu1 %v26_v3 }
   0x8   :  { %23 = vadd.xlane.f32.xlu0 %v84_v2 }
   0xa   :  { %30 = vadd.xlane.f32.xlu1 %v27_v4 }
  0x8d   :  { %v22_v6 = vpop.xlane.xlu0 %21 }
  0x8f   :  { %v29_v7 = vpop.xlane.xlu1 %28 }
  0x91   :  { %v24_v8 = vpop.xlane.xlu0 %23 }
  0x92   :  { %v25_v9 = vadd.f32 %v24_v8, %v22_v6 }
  0x93   :  { %v31_v10 = vpop.xlane.xlu1 %30 }
  0x94   :  { %v33_v11 = vmul.f32 0.0078125, %v25_v9  ;;  %v32_v12 = vadd.f32 %v31_v10, %v29_v7 }
  0x96   :  { %v35_v13 = vmul.f32 %v33_v11, %v33_v11  ;;  %v34_v14 = vmul.f32 0.0078125, %v32_v12 }
  0x98   :  { %v36_v15 = vsub.f32 %v34_v14, %v35_v13 }
  0x9a   :  { %v37_v16 = vmax.f32 %v36_v15, 0.0 }
  0x9c   :  { %v39_v17 = vadd.f32 1e-05, %v37_v16 }
  0x9e   :  { %88 = vrsqrt.f32 %v39_v17 }
  0xab   :  { %v89_v19 = vpop.eup %88 }
  0xac   :  { %v41_v20 = vmul.f32 %v89_v19, %v38_v18 }
  0xae   :  { %47 = vperm.xlu0 %86, %v41_v20   ;;  %v43_v22 = vmul.f32 %v41_v20, %v33_v11 }
  0xb0   :  { %v44_v23 = vsub.f32 %v42_v21, %v43_v22 }
  0xb2   :  { %54 = vperm.xlu1 %87, %v44_v23  }
 0x129   :  { %v48_v24 = vpop.permute.xlu0 %47 }
 0x12a   :  { %v50_v25 = vmul.f32 %v83_v1, %v48_v24  ;;  %v51_v26 = vmul.f32 %v84_v2, %v48_v24 }
 0x12d   :  { %v55_v27 = vpop.permute.xlu1 %54 }
 0x12e   :  { %v57_v28 = vadd.f32 %v55_v27, %v50_v25  ;;  %v58_v29 = vadd.f32 %v55_v27, %v51_v26 }
 0x130   :  { %vm59_vm0 = vcmp.ge.f32.partialorder %v57_v28, 0.0  ;;  %vm60_vm1 = vcmp.ge.f32.partialorder %v58_v29, 0.0  ;;  %v61_v31 = vmul.f32 0.01, %v57_v28  ;;  %v62_v32 = vmul.f32 0.01, %v58_v29 }
 0x132   :  { %v63_v33 = vsel %vm59_vm0, %v57_v28, %v61_v31  ;;  %v64_v34 = vsel %vm60_vm1, %v58_v29, %v62_v32 }
 0x133   :  { %v72_v35 = vmul.f32 %v80_v30, %v63_v33  ;;  %v73_v36 = vmul.f32 %v80_v30, %v64_v34 }
 0x135   :  { %74 = vst [vmem:[%s138_s4] sm:$0xff] %v72_v35  ;;  %75 = vst [vmem:[%s138_s4 + $0x8] sm:$0xff] %v73_v36 }

// kernel: dcrnn_cell_forward.12
= control target key start
LH: loop header
LB: loop body
LE: loop exit
PB: predicated region body
PF: predicated region fallthrough
CT: control target
= control target key end

     0   :  { %s1088_s15 = smov 0   ;;  %s1090_s16 = smov 0   ;;  %s1207_s0 = inlined_call_operand.vmem [shape: bf16[9,8,32], index: 0, kind: input, shape index: {}]   ;;  %s1208_s1 = inlined_call_operand.vmem [shape: bf16[2,32,128], index: 1, kind: input, shape index: {}]   ;;  %s1209_s2 = inlined_call_operand.vmem [shape: f32[8,1], index: 2, kind: input, shape index: {}]   ;;  %s1210_s3 = inlined_call_operand.vmem [shape: f32[1,78], index: 3, kind: input, shape index: {}]   ;;  %s1211_s4 = inlined_call_operand.vmem [shape: bf16[2,8,128], index: 4, kind: output, shape index: {}]  }
   0x1   :  { %s1092_s17 = smov 0  }
   0x2 LB: > { %s26_s18 = sadd.s32 1, %s1045_s16  ;;  %p860_p0 = scmp.ge.s32.totalorder %s1049_s17, 1  ;;  %s1049_s17 = sphi %s1092_s17, %s14_s17   ;;  %s1045_s16 = sphi %s1090_s16, %s1213_s16   ;;  %s1041_s15 = sphi %s1088_s15, %s1212_s15  }
   0x3   : > { %p28_p1 = scmp.ge.s32.totalorder %s26_s18, 2  ;;  %p194_p2 = scmp.lt.s32.totalorder %s1049_s17, 3 }
   0x5   : > { %s1215_s18 = smov (%p28_p1, %s26_s18), 0  ;;  %p195_p3 = pnand %p860_p0, %p194_p2 }
   0x6   : > { %p234_p4 = scmp.lt.s32.totalorder (!%p195_p3), %s1041_s15, 1  ;;  %s1053_s23 = smov (!%p195_p3), 127  }
   0x7   : > { %198 = sbr.rel (%p195_p3) target bundleno = 487 (0x1e7), region = 36  ;;  %s1054_s24 = smov (!%p195_p3), 126  }
   0x8   : > { %s1055_s27 = smov (!%p195_p3), 118   ;;  %s1056_s28 = smov (!%p195_p3), 117  }
   0x9   : > { %s1057_s29 = smov (!%p195_p3), 116   ;;  %s1058_s30 = smov (!%p195_p3), 108  }
   0xa   : > { %s1059_s5 = smov (!%p195_p3), 107   ;;  %s1060_s6 = smov (!%p195_p3), 106  }
   0xb   : > { %s1062_s8 = smov (!%p195_p3), 11  }
   0xc   : > { %v1051_v0 = vmov 0.0   ;;  %s1217_s15 = smov (!%p234_p4, %s1041_s15), 1  ;;  %vm1052_vm0 = vmmov 0   ;;  %vm275_vm1 = vcmask 261120   ;;  %v252_v3 = vld [vmem:[%s1207_s0] sm:$0xf] }
   0xd   : > { %916 = vmatprep.subr.bf16.mxu0 %v1051_v0  ;;  %924 = vmatprep.subr.bf16.mxu1 %v1051_v0  ;;  %s887_s19 = sshll.u32 %s1217_s15, 4  ;;  %s863_s7 = sshll.u32 %s1217_s15, 2  ;;  %v1061_v4 = vmov 0   ;;  %v728_v5 = vld [vmem:[%s1209_s2] sm:$0xff]  ;;  %v869_v15 = vld [vmem:[%s1207_s0 + $0x8] sm:$0xf] }
   0xe   : > { %920 = vmatprep.mubr.msk.bf16.mxu0 %vm1052_vm0, %v1051_v0  ;;  %928 = vmatprep.mubr.msk.bf16.mxu1 %vm1052_vm0, %v1051_v0  ;;  %s238_s22 = scalar_lea.vmem %s1208_s1, %s887_s19  ;;  %s1130_s10 = scalar_lea.vmem %s1211_s4, %s863_s7  ;;  %v864_v10 = vld [vmem:[%s1207_s0 + $0x4] sm:$0xf]  ;;  %v871_v16 = vld [vmem:[%s1207_s0 + $0xc] sm:$0xf]  ;;  %v873_v20 = vld [vmem:[%s1207_s0 + $0x10] sm:$0xf] }
   0xf   : > { %v1025_v1 = vld [vmem:[%s238_s22 + $0x8] sm:$0xff]   ;;  %v1026_v2 = vld [vmem:[%s238_s22] sm:$0xff]   ;;  %1024 = vset.pattern.permute.xlu0 %v1061_v4  ;;  %251 = vst [vmem:[%s1130_s10] sm:$0xf] %v1061_v4  ;;  %v875_v21 = vld [vmem:[%s1207_s0 + $0x14] sm:$0xf]  ;;  %vm750_vm2 = vcmask 724056  }
  0x10   : > { %271 = vrot.lane.b32.xlu0 %v1025_v1, %s1053_s23  ;;  %368 = vrot.lane.b32.xlu1 %v1025_v1, %s1054_s24  ;;  %v877_v26 = vld [vmem:[%s1207_s0 + $0x18] sm:$0xf]  ;;  %v879_v27 = vld [vmem:[%s1207_s0 + $0x1c] sm:$0xf] }
  0x11   : > { %925 = vmatpush3.bf16.msra.mxu1 %v1025_v1  ;;  %v881_v29 = vld [vmem:[%s1207_s0 + $0x20] sm:$0xf] }
  0x12   : > { %926 = vmatprep.subr.bf16.mxu1 %v1051_v0 }
  0x14   : > { %269 = vrot.lane.b32.xlu0 %v1026_v2, %s1053_s23  ;;  %366 = vrot.lane.b32.xlu1 %v1026_v2, %s1054_s24 }
  0x15   : > { %927 = vmatpush3.bf16.msra.mxu1 %v1026_v2 }
  0x16   : > { %940 = vmatprep.subr.bf16.mxu1 %v1051_v0 }
  0x18   : > { %420 = vrot.lane.b32.xlu0 %v1025_v1, %s1055_s27  ;;  %472 = vrot.lane.b32.xlu1 %v1025_v1, %s1056_s28 }
  0x19   : > { %929 = vmatmul.mubr.msk.bf16.vlgmr.msra.gmra.mxu1 %vm275_vm1, %v252_v3 }
  0x1a   : > { %944 = vmatprep.mubr.msk.bf16.mxu1 %vm1052_vm0, %v1051_v0 }
  0x1c   : > { %418 = vrot.lane.b32.xlu0 %v1026_v2, %s1055_s27  ;;  %470 = vrot.lane.b32.xlu1 %v1026_v2, %s1056_s28 }
  0x20   : > { %524 = vrot.lane.b32.xlu0 %v1025_v1, %s1057_s29  ;;  %576 = vrot.lane.b32.xlu1 %v1025_v1, %s1058_s30 }
  0x24   : > { %522 = vrot.lane.b32.xlu0 %v1026_v2, %s1057_s29  ;;  %574 = vrot.lane.b32.xlu1 %v1026_v2, %s1058_s30 }
  0x28   : > { %628 = vrot.lane.b32.xlu0 %v1025_v1, %s1059_s5  ;;  %680 = vrot.lane.b32.xlu1 %v1025_v1, %s1060_s6 }
  0x2c   : > { %626 = vrot.lane.b32.xlu0 %v1026_v2, %s1059_s5  ;;  %678 = vrot.lane.b32.xlu1 %v1026_v2, %s1060_s6 }
  0x30   : > { %731 = vperm.xlu0 %1024, %v728_v5  }
  0x82   : > { %v272_v6 = vpop.permute.xlu0 %271  ;;  %v369_v7 = vpop.permute.xlu1 %368 }
  0x83   : > { %917 = vmatpush3.bf16.msra.mxu0 %v272_v6 }
  0x84   : > { %918 = vmatprep.subr.bf16.mxu0 %v1051_v0 }
  0x86   : > { %v270_v8 = vpop.permute.xlu0 %269  ;;  %v367_v9 = vpop.permute.xlu1 %366 }
  0x87   : > { %919 = vmatpush3.bf16.msra.mxu0 %v270_v8 }
  0x88   : > { %932 = vmatprep.subr.bf16.mxu0 %v1051_v0 }
  0x8a   : > { %921 = vmatmul.mubr.msk.bf16.vlgmr.msra.gmra.mxu0 %vm275_vm1, %v864_v10  ;;  %v421_v11 = vpop.permute.xlu0 %420  ;;  %v473_v12 = vpop.permute.xlu1 %472 }
  0x8b   : > { %933 = vmatpush3.bf16.msra.mxu0 %v369_v7  ;;  %941 = vmatpush3.bf16.msra.mxu1 %v421_v11 }
  0x8c   : > { %934 = vmatprep.subr.bf16.mxu0 %v1051_v0  ;;  %942 = vmatprep.subr.bf16.mxu1 %v1051_v0 }
  0x8d   : > { %936 = vmatprep.mubr.msk.bf16.mxu0 %vm1052_vm0, %v1051_v0 }
  0x8e   : > { %v419_v13 = vpop.permute.xlu0 %418  ;;  %v471_v14 = vpop.permute.xlu1 %470 }
  0x8f   : > { %935 = vmatpush3.bf16.msra.mxu0 %v367_v9  ;;  %943 = vmatpush3.bf16.msra.mxu1 %v419_v13  ;;  %v883_v9 = vld [vmem:[%s1210_s3] ss:$0 sm:$0xff] }
  0x90   : > { %948 = vmatprep.subr.bf16.mxu0 %v1051_v0  ;;  %956 = vmatprep.subr.bf16.mxu1 %v1051_v0 }
  0x92   : > { %937 = vmatmul.mubr.msk.bf16.vlgmr.msra.gmra.mxu0 %vm275_vm1, %v869_v15  ;;  %v525_v17 = vpop.permute.xlu0 %524  ;;  %945 = vmatmul.mubr.msk.bf16.vlgmr.msra.gmra.mxu1 %vm275_vm1, %v871_v16  ;;  %v577_v18 = vpop.permute.xlu1 %576 }
  0x93   : > { %949 = vmatpush3.bf16.msra.mxu0 %v473_v12  ;;  %957 = vmatpush3.bf16.msra.mxu1 %v525_v17 }
  0x94   : > { %950 = vmatprep.subr.bf16.mxu0 %v1051_v0  ;;  %958 = vmatprep.subr.bf16.mxu1 %v1051_v0 }
  0x95   : > { %952 = vmatprep.mubr.msk.bf16.mxu0 %vm1052_vm0, %v1051_v0  ;;  %960 = vmatprep.mubr.msk.bf16.mxu1 %vm1052_vm0, %v1051_v0 }
  0x96   : > { %v523_v19 = vpop.permute.xlu0 %522  ;;  %v575_v22 = vpop.permute.xlu1 %574 }
  0x97   : > { %951 = vmatpush3.bf16.msra.mxu0 %v471_v14  ;;  %959 = vmatpush3.bf16.msra.mxu1 %v523_v19 }
  0x98   : > { %964 = vmatprep.subr.bf16.mxu0 %v1051_v0  ;;  %972 = vmatprep.subr.bf16.mxu1 %v1051_v0 }
  0x9a   : > { %953 = vmatmul.mubr.msk.bf16.vlgmr.msra.gmra.mxu0 %vm275_vm1, %v873_v20  ;;  %v629_v23 = vpop.permute.xlu0 %628  ;;  %961 = vmatmul.mubr.msk.bf16.vlgmr.msra.gmra.mxu1 %vm275_vm1, %v875_v21  ;;  %v681_v25 = vpop.permute.xlu1 %680 }
  0x9b   : > { %965 = vmatpush3.bf16.msra.mxu0 %v577_v18  ;;  %973 = vmatpush3.bf16.msra.mxu1 %v629_v23 }
  0x9c   : > { %966 = vmatprep.subr.bf16.mxu0 %v1051_v0  ;;  %974 = vmatprep.subr.bf16.mxu1 %v1051_v0 }
  0x9d   : > { %968 = vmatprep.mubr.msk.bf16.mxu0 %vm1052_vm0, %v1051_v0  ;;  %976 = vmatprep.mubr.msk.bf16.mxu1 %vm1052_vm0, %v1051_v0 }
  0x9e   : > { %v627_v24 = vpop.permute.xlu0 %626  ;;  %v679_v28 = vpop.permute.xlu1 %678 }
  0x9f   : > { %967 = vmatpush3.bf16.msra.mxu0 %v575_v22  ;;  %975 = vmatpush3.bf16.msra.mxu1 %v627_v24 }
  0xa0   : > { %980 = vmatprep.subr.bf16.mxu0 %v1051_v0 }
  0xa2   : > { %969 = vmatmul.mubr.msk.bf16.vlgmr.msra.gmra.mxu0 %vm275_vm1, %v877_v26  ;;  %977 = vmatmul.mubr.msk.bf16.vlgmr.msra.gmra.mxu1 %vm275_vm1, %v879_v27 }
  0xa3   : > { %981 = vmatpush3.bf16.msra.mxu0 %v681_v25  ;;  %984 = vmatprep.mubr.msk.bf16.mxu0 %vm1052_vm0, %v1051_v0 }
  0xa4   : > { %982 = vmatprep.subr.bf16.mxu0 %v1051_v0 }
  0xa7   : > { %983 = vmatpush3.bf16.msra.mxu0 %v679_v28 }
  0xaa   : > { %985 = vmatmul.mubr.msk.bf16.vlgmr.msra.gmra.mxu0 %vm275_vm1, %v881_v29 }
  0xab   : > { %v732_v6 = vpop.permute.xlu0 %731 }
  0xd9   : > { %v358_v30 = vpop.f32.mrf.mxu1 }
  0xdb   : > { %v930_v31 = vpop.f32.mrf.mxu1 }
  0xdd   : > { %v361_v32 = vpop.f32.mrf.mxu1 }
  0xdf   : > { %v931_v33 = vpop.f32.mrf.mxu1 }
 0x14a   : > { %v313_v34 = vpop.f32.mrf.mxu0 }
 0x14b   : > { %v359_v44 = vadd.f32 %v358_v30, %v313_v34 }
 0x14c   : > { %v922_v35 = vpop.f32.mrf.mxu0 }
 0x14e   : > { %v316_v36 = vpop.f32.mrf.mxu0 }
 0x150   : > { %v923_v37 = vpop.f32.mrf.mxu0 }
 0x152   : > { %v409_v38 = vpop.f32.mrf.mxu0  ;;  %v461_v39 = vpop.f32.mrf.mxu1 }
 0x153   : > { %v415_v47 = vadd.f32 %v409_v38, %v359_v44 }
 0x154   : > { %v938_v40 = vpop.f32.mrf.mxu0  ;;  %v946_v41 = vpop.f32.mrf.mxu1 }
 0x155   : > { %v467_v52 = vadd.f32 %v461_v39, %v415_v47 }
 0x156   : > { %v412_v42 = vpop.f32.mrf.mxu0  ;;  %v464_v43 = vpop.f32.mrf.mxu1 }
 0x158   : > { %v939_v45 = vpop.f32.mrf.mxu0  ;;  %v947_v46 = vpop.f32.mrf.mxu1 }
 0x15a   : > { %v513_v48 = vpop.f32.mrf.mxu0  ;;  %v565_v49 = vpop.f32.mrf.mxu1 }
 0x15b   : > { %v519_v55 = vadd.f32 %v513_v48, %v467_v52 }
 0x15c   : > { %v954_v50 = vpop.f32.mrf.mxu0  ;;  %v962_v51 = vpop.f32.mrf.mxu1 }
 0x15d   : > { %v571_v60 = vadd.f32 %v565_v49, %v519_v55 }
 0x15e   : > { %v516_v53 = vpop.f32.mrf.mxu0  ;;  %v568_v54 = vpop.f32.mrf.mxu1 }
 0x160   : > { %v955_v56 = vpop.f32.mrf.mxu0  ;;  %v963_v57 = vpop.f32.mrf.mxu1 }
 0x162   : > { %v617_v58 = vpop.f32.mrf.mxu0  ;;  %v669_v59 = vpop.f32.mrf.mxu1 }
 0x163   : > { %v623_v63 = vadd.f32 %v617_v58, %v571_v60 }
 0x164   : > { %v970_v61 = vpop.f32.mrf.mxu0  ;;  %v978_v62 = vpop.f32.mrf.mxu1 }
 0x165   : > { %v675_v4 = vadd.f32 %v669_v59, %v623_v63 }
 0x166   : > { %v620_v0 = vpop.f32.mrf.mxu0  ;;  %v672_v1 = vpop.f32.mrf.mxu1 }
 0x168   : > { %v971_v2 = vpop.f32.mrf.mxu0  ;;  %v979_v3 = vpop.f32.mrf.mxu1 }
 0x16a   : > { %v721_v5 = vpop.f32.mrf.mxu0 }
 0x16b   : > { %v727_v7 = vadd.f32 %v721_v5, %v675_v4 }
 0x16c   : > { %v986_v8 = vpop.f32.mrf.mxu0 }
 0x16d   : > { %v734_v10 = vadd.f32 %v732_v6, %v727_v7 }
 0x16e   : > { %v724_v11 = vpop.f32.mrf.mxu0 }
 0x16f   : > { %v742_v12 = vmul.f32 %v883_v9, %v734_v10 }
 0x170   : > { %v987_v13 = vpop.f32.mrf.mxu0 }
 0x171   : > { %v888_v14 = vpack.c.bf16 %v742_v12, %v742_v12 }
 0x173   : > { %747 = vrot.lane.b32.xlu1 %v888_v14, %s1062_s8 }
 0x1e5   : > { %v748_v15 = vpop.permute.xlu1 %747 }
 0x1e6   : > { %751 = vst.msk [vmem:[%s1130_s10] sm:$0xf] %vm750_vm2, %v748_v15 }
 0x1e7 PF: > { %s14_s17 = sadd.s32 1, %s1049_s17   ;;  %s1212_s15 = smov %s1045_s16 }
 0x1e8   : > { %p11_p5 = scmp.ge.s32.totalorder %s14_s17, 4   ;;  %s1213_s16 = smov %s1215_s18 }
 0x1ea   :  { %13 = sbr.rel (!%p11_p5) target bundleno = 2 (0x2), region = 80 }

</bundles_post_ra>
